<compile_context>
chip_gen: v7x
topology: tpu7x:2x2x1
jax: 0.10.0
libtpu: 0.0.40
codegen_flags: <defaults>
</compile_context>

<pallas_src>
import dataclasses
import functools

import jax
import jax.numpy as jnp
from jax.experimental import pallas as pl
from jax.experimental.pallas import tpu as pltpu


@dataclasses.dataclass(frozen=True)
class TrackLossCfg:
    kernel_size: int = 7
    sigma: float = 0.25
    threshold: float = 0.5
    crit: str = "mse"            # only 'mse' supported
    pre: bool = True
    norm: bool = True
    consistency_weights: float = 1.0  # not used by the torch forward either


def _default_weight_dtype():
    """bf16 sqrt/exp on v6e/v7x (bf16 EUP/VPU); f32 everywhere else (v5e etc.)."""
    try:
        kind = jax.devices()[0].device_kind.lower()
    except Exception:
        return jnp.float32
    if ("v6" in kind) or ("v7" in kind) or ("7x" in kind):
        return jnp.bfloat16
    return jnp.float32


# --------------------------------------------------------------------------
# Fused kernel: per-batch partial sums for
#   mse_part[b]  = sum((yhat[b] - y[b])^2)
#   cons_part[b] = sum(mask * (clamp(moved, 1e-4, 0.9999) - target)^2)
# where
#   moved[y,x] = sum_{i,j} hm_pad[y+i, x+j] *
#                exp(-||(ox_pad[y+i,x+j] - (i-p), oy_pad[y+i,x+j] - (j-p))|| / sigma)
# which is exactly F.conv2d(heatmap*weights, one-hot gather, padding=p)
# with zero padding (padded offsets are 0 but hm_pad==0 there => product 0).
# --------------------------------------------------------------------------
def _fused_track_loss_kernel(a_ref, b_ref, hm_ref, ox_ref, oy_ref, tgt_ref,
                             cons_ref, mse_ref,
                             *, ks, p, sigma, thresh, H, W, wdtype):
    # ---------------- MSE partial (lane-dense (1, R, 128) slabs) ----------
    a = a_ref[...].astype(jnp.float32)
    b = b_ref[...].astype(jnp.float32)
    d = a - b
    mse_ref[...] = jnp.sum(d * d).reshape(1, 1, 1)

    # ---------------- consistency partial ---------------------------------
    hm_p = hm_ref[...][0].astype(jnp.float32)    # (Hp, Wp) padded cur_hm
    ox_p = ox_ref[...][0].astype(jnp.float32)    # (Hp, Wp) padded offset ch0 (H dir)
    oy_p = oy_ref[...][0].astype(jnp.float32)    # (Hp, Wp) padded offset ch1 (W dir)
    tgt = tgt_ref[...][0].astype(jnp.float32)    # (H, W)

    neg_inv_sigma = -1.0 / sigma                 # python float -> stays in wdtype
    acc = jnp.zeros((H, W), jnp.float32)

    for i in range(ks):                          # sublane (H) shift hoisted out
        di = float(i - p)
        hm_row = hm_p[i:i + H, :]                # (H, Wp)
        ox_row = ox_p[i:i + H, :]
        oy_row = oy_p[i:i + H, :]
        dx = ox_row - di
        dx2 = dx * dx
        # Batch all `ks` lane-taps' r^2 -> one bulk sqrt/exp keeps the EUP fed.
        r2 = jnp.stack(
            [dx2 + (oy_row - float(j - p)) ** 2 for j in range(ks)], axis=0
        )                                        # (ks, H, Wp) f32
        w = jnp.exp(jnp.sqrt(r2.astype(wdtype)) * neg_inv_sigma)   # wdtype EUP
        g = w.astype(jnp.float32) * hm_row[None, :, :]             # f32 products
        for j in range(ks):                      # lane (W) shift only
            acc = acc + g[j, :, j:j + W]

    moved = jnp.clip(acc, 0.0001, 0.9999)
    mask = (tgt > thresh).astype(jnp.float32)
    err = moved - tgt
    cons_ref[...] = jnp.sum(mask * err * err).reshape(1, 1, 1)


def _fused_track_losses(mse_a, mse_b, cur_hm, offset, target,
                        *, ks, sigma, thresh, weight_dtype):
    """One pallas_call -> (consistency_loss, mse_loss)."""
    assert mse_a.shape == mse_b.shape, "MSE operands must have matching shapes"
    B, _, H, W = offset.shape
    assert cur_hm.shape == (B, H, W) and target.shape == (B, H, W)
    p = (ks - 1) // 2
    Hp, Wp = H + 2 * p, W + 2 * p

    # Pad the three consistency planes in the wrapper (zero padding matches
    # conv2d's zero padding of heatmap*weights) -> no in-kernel scratch copies.
    pad2 = lambda x: jnp.pad(x.astype(jnp.float32), ((0, 0), (p, p), (p, p)))
    hm_pad = pad2(cur_hm)
    ox_pad = pad2(offset[:, 0])
    oy_pad = pad2(offset[:, 1])
    tgt = target.astype(jnp.float32)

    # Lane-dense flattening of the MSE operands: (B, R, 128); zero-padding the
    # flattened axis on both operands contributes 0 to the squared-diff sum.
    L = int(mse_a.size // B)
    Lpad = max(128, ((L + 127) // 128) * 128)
    a_flat = mse_a.reshape(B, L).astype(jnp.float32)
    b_flat = mse_b.reshape(B, L).astype(jnp.float32)
    if Lpad != L:
        a_flat = jnp.pad(a_flat, ((0, 0), (0, Lpad - L)))
        b_flat = jnp.pad(b_flat, ((0, 0), (0, Lpad - L)))
    R = Lpad // 128
    a_flat = a_flat.reshape(B, R, 128)
    b_flat = b_flat.reshape(B, R, 128)

    kern = functools.partial(_fused_track_loss_kernel, ks=ks, p=p, sigma=sigma,
                             thresh=thresh, H=H, W=W, wdtype=weight_dtype)

    per_step_bytes = 4 * (2 * R * 128 + 3 * Hp * Wp + H * W + 2)
    vmem_limit = int(min(max(6 * per_step_bytes + (4 << 20), 16 << 20), 48 << 20))
    cost = pl.CostEstimate(
        flops=int(8 * ks * ks * B * H * Wp + 6 * B * H * W + 3 * B * Lpad),
        transcendentals=int(2 * ks * ks * B * H * Wp),
        bytes_accessed=int(4 * (2 * B * Lpad + 3 * B * Hp * Wp + B * H * W + 2 * B)),
    )

    cons_part, mse_part = pl.pallas_call(
        kern,
        out_shape=[jax.ShapeDtypeStruct((B, 1, 1), jnp.float32),
                   jax.ShapeDtypeStruct((B, 1, 1), jnp.float32)],
        grid_spec=pltpu.PrefetchScalarGridSpec(
            num_scalar_prefetch=0,
            grid=(B,),
            in_specs=[
                pl.BlockSpec((1, R, 128), lambda bb: (bb, 0, 0)),   # yhat (flat)
                pl.BlockSpec((1, R, 128), lambda bb: (bb, 0, 0)),   # y    (flat)
                pl.BlockSpec((1, Hp, Wp), lambda bb: (bb, 0, 0)),   # hm_pad
                pl.BlockSpec((1, Hp, Wp), lambda bb: (bb, 0, 0)),   # ox_pad
                pl.BlockSpec((1, Hp, Wp), lambda bb: (bb, 0, 0)),   # oy_pad
                pl.BlockSpec((1, H, W), lambda bb: (bb, 0, 0)),     # target
            ],
            out_specs=[
                pl.BlockSpec((1, 1, 1), lambda bb: (bb, 0, 0)),     # cons partial
                pl.BlockSpec((1, 1, 1), lambda bb: (bb, 0, 0)),     # mse partial
            ],
        ),
        compiler_params=pltpu.CompilerParams(
            dimension_semantics=("parallel",),   # independent per-batch partials
            vmem_limit_bytes=vmem_limit,
        ),
        cost_estimate=cost,
    )(a_flat, b_flat, hm_pad, ox_pad, oy_pad, tgt)

    cons_loss = jnp.sum(cons_part) / float(B * H * W)
    mse_loss = jnp.sum(mse_part) / float(B * L)
    return cons_loss, mse_loss


# --------------------------------------------------------------------------
# trackLoss.forward — cfg branching is static glue, losses come from one
# fused Pallas kernel.
# --------------------------------------------------------------------------
def track_loss_forward(yhat, y, cfg: TrackLossCfg, weight_dtype=None):
    if cfg.crit != "mse":
        # TODO(synk): crit='kld' (KLDivLoss(reduction='sum')) not implemented.
        raise NotImplementedError("only crit='mse' is implemented")
    if weight_dtype is None:
        weight_dtype = _default_weight_dtype()

    if cfg.pre:
        mse_a, mse_b = yhat, y
        target = yhat[:, 0]                      # pre_hm
        offset = yhat[:, 1:3]
        if cfg.norm:
            cur_hm = jnp.sqrt(jnp.sum(jnp.square(yhat[:, 1:].astype(jnp.float32)),
                                      axis=1))   # torch.norm(dim=1)
        else:
            cur_hm = yhat[:, -1]                 # torch drops the channel dim here
    elif cfg.norm:
        offset = yhat[:, 0:2]
        target = y[:, 0]
        mse_a, mse_b = yhat, y[:, 1:]
        cur_hm = jnp.sqrt(jnp.sum(jnp.square(yhat.astype(jnp.float32)), axis=1))
    else:
        offset = yhat[:, 0:2]
        target = y[:, 0]
        mse_a, mse_b = yhat, y[:, 1:]
        cur_hm = yhat[:, -1]

    return _fused_track_losses(mse_a, mse_b, cur_hm, offset, target,
                               ks=cfg.kernel_size, sigma=cfg.sigma,
                               thresh=cfg.threshold, weight_dtype=weight_dtype)


# --------------------------------------------------------------------------
# Pure-JAX f32 reference (for correctness check only).
# --------------------------------------------------------------------------
def _ref_consistency(cur_hm, offset, target, *, ks, sigma, thresh):
    B, _, H, W = offset.shape
    p = (ks - 1) // 2
    ox, oy = offset[:, 0], offset[:, 1]
    pad = lambda x: jnp.pad(x, ((0, 0), (p, p), (p, p)))
    hm_p, ox_p, oy_p = pad(cur_hm), pad(ox), pad(oy)
    acc = jnp.zeros((B, H, W), jnp.float32)
    for i in range(ks):
        for j in range(ks):
            di, dj = float(i - p), float(j - p)
            w = jnp.exp(-jnp.sqrt((ox_p[:, i:i + H, j:j + W] - di) ** 2 +
                                  (oy_p[:, i:i + H, j:j + W] - dj) ** 2) / sigma)
            acc = acc + hm_p[:, i:i + H, j:j + W] * w
    moved = jnp.clip(acc, 0.0001, 0.9999)
    mask = (target > thresh).astype(jnp.float32)
    return jnp.mean(mask * (moved - target) ** 2)


def ref_track_loss(yhat, y, cfg: TrackLossCfg):
    assert cfg.pre and cfg.norm and cfg.crit == "mse"
    mse_loss = jnp.mean((yhat - y) ** 2)
    target = yhat[:, 0]
    offset = yhat[:, 1:3]
    cur_hm = jnp.sqrt(jnp.sum(jnp.square(yhat[:, 1:]), axis=1))
    cons = _ref_consistency(cur_hm, offset, target,
                            ks=cfg.kernel_size, sigma=cfg.sigma,
                            thresh=cfg.threshold)
    return cons, mse_loss


if __name__ == "__main__":
    cfg = TrackLossCfg()
    key = jax.random.PRNGKey(0)
    k1, k2 = jax.random.split(key)
    # yhat/y: [batch=2, channels=3 (pre_hm, offset_x, offset_y), H=16, W=16]
    yhat = jax.random.normal(k1, (2, 3, 16, 16), dtype=jnp.float32)
    y = jax.random.normal(k2, (2, 3, 16, 16), dtype=jnp.float32)

    wdtype = _default_weight_dtype()
    cons, mse = track_loss_forward(yhat, y, cfg, weight_dtype=wdtype)
    cons, mse = jax.block_until_ready((cons, mse))

    ref_cons, ref_mse = ref_track_loss(yhat, y, cfg)
    if wdtype is jnp.bfloat16:
        rtol_c, atol_c = 5e-2, 5e-3   # bf16 sqrt/exp path (v6e/v7x)
    else:
        rtol_c, atol_c = 1e-3, 1e-5   # f32 path (v5e and others)
    assert jnp.allclose(mse, ref_mse, rtol=1e-3, atol=1e-5), (mse, ref_mse)
    assert jnp.allclose(cons, ref_cons, rtol=rtol_c, atol=atol_c), (cons, ref_cons)

    print("KERNEL_OK")
</pallas_src>

<mosaic_0001>
module attributes {stable_mosaic.version = 11 : i64} {
  func.func @_fused_track_loss_kernel(%arg0: i32, %arg1: memref<1x6x128xf32, #tpu.memory_space<vmem>>, %arg2: memref<1x6x128xf32, #tpu.memory_space<vmem>>, %arg3: memref<1x22x22xf32, #tpu.memory_space<vmem>>, %arg4: memref<1x22x22xf32, #tpu.memory_space<vmem>>, %arg5: memref<1x22x22xf32, #tpu.memory_space<vmem>>, %arg6: memref<1x16x16xf32, #tpu.memory_space<vmem>>, %arg7: memref<1x1x1xf32, #tpu.memory_space<vmem>>, %arg8: memref<1x1x1xf32, #tpu.memory_space<vmem>>) attributes {dimension_semantics = [#tpu.dimension_semantics<parallel>], iteration_bounds = array<i64: 2>, scalar_prefetch = 0 : i64, scratch_operands = 0 : i64, tpu.core_type = #tpu.core_type<tc>, window_params = [{transform_indices = @transform_0, window_bounds = array<i64: 1, 6, 128>}, {transform_indices = @transform_1, window_bounds = array<i64: 1, 6, 128>}, {transform_indices = @transform_2, window_bounds = array<i64: 1, 22, 22>}, {transform_indices = @transform_3, window_bounds = array<i64: 1, 22, 22>}, {transform_indices = @transform_4, window_bounds = array<i64: 1, 22, 22>}, {transform_indices = @transform_5, window_bounds = array<i64: 1, 16, 16>}, {transform_indices = @transform_6, window_bounds = array<i64: 1, 1, 1>}, {transform_indices = @transform_7, window_bounds = array<i64: 1, 1, 1>}]} {
    %c0 = arith.constant 0 : index
    %c0_0 = arith.constant 0 : index
    %c0_1 = arith.constant 0 : index
    %0 = vector.load %arg1[%c0, %c0_0, %c0_1] : memref<1x6x128xf32, #tpu.memory_space<vmem>>, vector<1x6x128xf32>
    %c0_2 = arith.constant 0 : index
    %c0_3 = arith.constant 0 : index
    %c0_4 = arith.constant 0 : index
    %1 = vector.load %arg2[%c0_2, %c0_3, %c0_4] : memref<1x6x128xf32, #tpu.memory_space<vmem>>, vector<1x6x128xf32>
    %2 = arith.subf %0, %1 : vector<1x6x128xf32>
    %3 = arith.mulf %2, %2 : vector<1x6x128xf32>
    %4 = vector.shape_cast %3 : vector<1x6x128xf32> to vector<1x1x6x128xf32>
    %cst = arith.constant dense<0.000000e+00> : vector<1xf32>
    %5 = vector.multi_reduction <add>, %4, %cst [1, 2, 3] : vector<1x1x6x128xf32> to vector<1xf32>
    %6 = vector.shape_cast %5 : vector<1xf32> to vector<1x1x1x1xf32>
    %7 = vector.extract %6[0, 0, 0, 0] : f32 from vector<1x1x1x1xf32>
    %8 = vector.broadcast %7 : f32 to vector<1x1x1xf32>
    %c0_5 = arith.constant 0 : index
    %c0_6 = arith.constant 0 : index
    %c0_7 = arith.constant 0 : index
    %9 = vector.load %arg8[%c0_5, %c0_6, %c0_7] : memref<1x1x1xf32, #tpu.memory_space<vmem>>, vector<1x1x1xf32>
    tpu.vector_store %arg8[%c0_5, %c0_6, %c0_7], %8 {strides = array<i32>} : memref<1x1x1xf32, #tpu.memory_space<vmem>>, vector<1x1x1xf32>,
    %c0_8 = arith.constant 0 : index
    %c0_9 = arith.constant 0 : index
    %c0_10 = arith.constant 0 : index
    %10 = vector.load %arg3[%c0_8, %c0_9, %c0_10] : memref<1x22x22xf32, #tpu.memory_space<vmem>>, vector<1x22x22xf32>
    %11 = vector.shape_cast %10 : vector<1x22x22xf32> to vector<22x22xf32>
    %c0_11 = arith.constant 0 : index
    %c0_12 = arith.constant 0 : index
    %c0_13 = arith.constant 0 : index
    %12 = vector.load %arg4[%c0_11, %c0_12, %c0_13] : memref<1x22x22xf32, #tpu.memory_space<vmem>>, vector<1x22x22xf32>
    %13 = vector.shape_cast %12 : vector<1x22x22xf32> to vector<22x22xf32>
    %c0_14 = arith.constant 0 : index
    %c0_15 = arith.constant 0 : index
    %c0_16 = arith.constant 0 : index
    %14 = vector.load %arg5[%c0_14, %c0_15, %c0_16] : memref<1x22x22xf32, #tpu.memory_space<vmem>>, vector<1x22x22xf32>
    %15 = vector.shape_cast %14 : vector<1x22x22xf32> to vector<22x22xf32>
    %c0_17 = arith.constant 0 : index
    %c0_18 = arith.constant 0 : index
    %c0_19 = arith.constant 0 : index
    %16 = vector.load %arg6[%c0_17, %c0_18, %c0_19] : memref<1x16x16xf32, #tpu.memory_space<vmem>>, vector<1x16x16xf32>
    %17 = vector.shape_cast %16 : vector<1x16x16xf32> to vector<16x16xf32>
    %cst_20 = arith.constant 0.000000e+00 : f32
    %18 = vector.broadcast %cst_20 : f32 to vector<16x16xf32>
    %19 = vector.extract_strided_slice %11 {offsets = [0, 0], sizes = [16, 22], strides = [1, 1]} : vector<22x22xf32> to vector<16x22xf32>
    %20 = vector.extract_strided_slice %13 {offsets = [0, 0], sizes = [16, 22], strides = [1, 1]} : vector<22x22xf32> to vector<16x22xf32>
    %21 = vector.extract_strided_slice %15 {offsets = [0, 0], sizes = [16, 22], strides = [1, 1]} : vector<22x22xf32> to vector<16x22xf32>
    %cst_21 = arith.constant -3.000000e+00 : f32
    %22 = vector.broadcast %cst_21 : f32 to vector<16x22xf32>
    %23 = arith.subf %20, %22 : vector<16x22xf32>
    %24 = arith.mulf %23, %23 : vector<16x22xf32>
    %cst_22 = arith.constant -3.000000e+00 : f32
    %25 = vector.broadcast %cst_22 : f32 to vector<16x22xf32>
    %26 = arith.subf %21, %25 : vector<16x22xf32>
    %27 = arith.mulf %26, %26 : vector<16x22xf32>
    %28 = arith.addf %24, %27 : vector<16x22xf32>
    %cst_23 = arith.constant -2.000000e+00 : f32
    %29 = vector.broadcast %cst_23 : f32 to vector<16x22xf32>
    %30 = arith.subf %21, %29 : vector<16x22xf32>
    %31 = arith.mulf %30, %30 : vector<16x22xf32>
    %32 = arith.addf %24, %31 : vector<16x22xf32>
    %cst_24 = arith.constant -1.000000e+00 : f32
    %33 = vector.broadcast %cst_24 : f32 to vector<16x22xf32>
    %34 = arith.subf %21, %33 : vector<16x22xf32>
    %35 = arith.mulf %34, %34 : vector<16x22xf32>
    %36 = arith.addf %24, %35 : vector<16x22xf32>
    %cst_25 = arith.constant 0.000000e+00 : f32
    %37 = vector.broadcast %cst_25 : f32 to vector<16x22xf32>
    %38 = arith.subf %21, %37 : vector<16x22xf32>
    %39 = arith.mulf %38, %38 : vector<16x22xf32>
    %40 = arith.addf %24, %39 : vector<16x22xf32>
    %cst_26 = arith.constant 1.000000e+00 : f32
    %41 = vector.broadcast %cst_26 : f32 to vector<16x22xf32>
    %42 = arith.subf %21, %41 : vector<16x22xf32>
    %43 = arith.mulf %42, %42 : vector<16x22xf32>
    %44 = arith.addf %24, %43 : vector<16x22xf32>
    %cst_27 = arith.constant 2.000000e+00 : f32
    %45 = vector.broadcast %cst_27 : f32 to vector<16x22xf32>
    %46 = arith.subf %21, %45 : vector<16x22xf32>
    %47 = arith.mulf %46, %46 : vector<16x22xf32>
    %48 = arith.addf %24, %47 : vector<16x22xf32>
    %cst_28 = arith.constant 3.000000e+00 : f32
    %49 = vector.broadcast %cst_28 : f32 to vector<16x22xf32>
    %50 = arith.subf %21, %49 : vector<16x22xf32>
    %51 = arith.mulf %50, %50 : vector<16x22xf32>
    %52 = arith.addf %24, %51 : vector<16x22xf32>
    %53 = vector.shape_cast %28 : vector<16x22xf32> to vector<1x16x22xf32>
    %54 = vector.shape_cast %32 : vector<16x22xf32> to vector<1x16x22xf32>
    %55 = vector.shape_cast %36 : vector<16x22xf32> to vector<1x16x22xf32>
    %56 = vector.shape_cast %40 : vector<16x22xf32> to vector<1x16x22xf32>
    %57 = vector.shape_cast %44 : vector<16x22xf32> to vector<1x16x22xf32>
    %58 = vector.shape_cast %48 : vector<16x22xf32> to vector<1x16x22xf32>
    %59 = vector.shape_cast %52 : vector<16x22xf32> to vector<1x16x22xf32>
    %60 = tpu.concatenate %53, %54, %55, %56, %57, %58, %59 in 0 : vector<1x16x22xf32>, vector<1x16x22xf32>, vector<1x16x22xf32>, vector<1x16x22xf32>, vector<1x16x22xf32>, vector<1x16x22xf32>, vector<1x16x22xf32> -> vector<7x16x22xf32>
    %61 = math.sqrt %60 : vector<7x16x22xf32>
    %cst_29 = arith.constant -4.000000e+00 : f32
    %62 = vector.broadcast %cst_29 : f32 to vector<7x16x22xf32>
    %63 = arith.mulf %61, %62 : vector<7x16x22xf32>
    %64 = math.exp %63 : vector<7x16x22xf32>
    %65 = vector.shape_cast %19 : vector<16x22xf32> to vector<1x16x22xf32>
    %66 = vector.broadcast %65 : vector<1x16x22xf32> to vector<7x16x22xf32>
    %67 = arith.mulf %64, %66 : vector<7x16x22xf32>
    %68 = vector.extract_strided_slice %67 {offsets = [0, 0, 0], sizes = [1, 16, 16], strides = [1, 1, 1]} : vector<7x16x22xf32> to vector<1x16x16xf32>
    %69 = vector.shape_cast %68 : vector<1x16x16xf32> to vector<16x16xf32>
    %70 = arith.addf %18, %69 : vector<16x16xf32>
    %71 = vector.extract_strided_slice %67 {offsets = [1, 0, 1], sizes = [1, 16, 16], strides = [1, 1, 1]} : vector<7x16x22xf32> to vector<1x16x16xf32>
    %72 = vector.shape_cast %71 : vector<1x16x16xf32> to vector<16x16xf32>
    %73 = arith.addf %70, %72 : vector<16x16xf32>
    %74 = vector.extract_strided_slice %67 {offsets = [2, 0, 2], sizes = [1, 16, 16], strides = [1, 1, 1]} : vector<7x16x22xf32> to vector<1x16x16xf32>
    %75 = vector.shape_cast %74 : vector<1x16x16xf32> to vector<16x16xf32>
    %76 = arith.addf %73, %75 : vector<16x16xf32>
    %77 = vector.extract_strided_slice %67 {offsets = [3, 0, 3], sizes = [1, 16, 16], strides = [1, 1, 1]} : vector<7x16x22xf32> to vector<1x16x16xf32>
    %78 = vector.shape_cast %77 : vector<1x16x16xf32> to vector<16x16xf32>
    %79 = arith.addf %76, %78 : vector<16x16xf32>
    %80 = vector.extract_strided_slice %67 {offsets = [4, 0, 4], sizes = [1, 16, 16], strides = [1, 1, 1]} : vector<7x16x22xf32> to vector<1x16x16xf32>
    %81 = vector.shape_cast %80 : vector<1x16x16xf32> to vector<16x16xf32>
    %82 = arith.addf %79, %81 : vector<16x16xf32>
    %83 = vector.extract_strided_slice %67 {offsets = [5, 0, 5], sizes = [1, 16, 16], strides = [1, 1, 1]} : vector<7x16x22xf32> to vector<1x16x16xf32>
    %84 = vector.shape_cast %83 : vector<1x16x16xf32> to vector<16x16xf32>
    %85 = arith.addf %82, %84 : vector<16x16xf32>
    %86 = vector.extract_strided_slice %67 {offsets = [6, 0, 6], sizes = [1, 16, 16], strides = [1, 1, 1]} : vector<7x16x22xf32> to vector<1x16x16xf32>
    %87 = vector.shape_cast %86 : vector<1x16x16xf32> to vector<16x16xf32>
    %88 = arith.addf %85, %87 : vector<16x16xf32>
    %89 = vector.extract_strided_slice %11 {offsets = [1, 0], sizes = [16, 22], strides = [1, 1]} : vector<22x22xf32> to vector<16x22xf32>
    %90 = vector.extract_strided_slice %13 {offsets = [1, 0], sizes = [16, 22], strides = [1, 1]} : vector<22x22xf32> to vector<16x22xf32>
    %91 = vector.extract_strided_slice %15 {offsets = [1, 0], sizes = [16, 22], strides = [1, 1]} : vector<22x22xf32> to vector<16x22xf32>
    %cst_30 = arith.constant -2.000000e+00 : f32
    %92 = vector.broadcast %cst_30 : f32 to vector<16x22xf32>
    %93 = arith.subf %90, %92 : vector<16x22xf32>
    %94 = arith.mulf %93, %93 : vector<16x22xf32>
    %cst_31 = arith.constant -3.000000e+00 : f32
    %95 = vector.broadcast %cst_31 : f32 to vector<16x22xf32>
    %96 = arith.subf %91, %95 : vector<16x22xf32>
    %97 = arith.mulf %96, %96 : vector<16x22xf32>
    %98 = arith.addf %94, %97 : vector<16x22xf32>
    %cst_32 = arith.constant -2.000000e+00 : f32
    %99 = vector.broadcast %cst_32 : f32 to vector<16x22xf32>
    %100 = arith.subf %91, %99 : vector<16x22xf32>
    %101 = arith.mulf %100, %100 : vector<16x22xf32>
    %102 = arith.addf %94, %101 : vector<16x22xf32>
    %cst_33 = arith.constant -1.000000e+00 : f32
    %103 = vector.broadcast %cst_33 : f32 to vector<16x22xf32>
    %104 = arith.subf %91, %103 : vector<16x22xf32>
    %105 = arith.mulf %104, %104 : vector<16x22xf32>
    %106 = arith.addf %94, %105 : vector<16x22xf32>
    %cst_34 = arith.constant 0.000000e+00 : f32
    %107 = vector.broadcast %cst_34 : f32 to vector<16x22xf32>
    %108 = arith.subf %91, %107 : vector<16x22xf32>
    %109 = arith.mulf %108, %108 : vector<16x22xf32>
    %110 = arith.addf %94, %109 : vector<16x22xf32>
    %cst_35 = arith.constant 1.000000e+00 : f32
    %111 = vector.broadcast %cst_35 : f32 to vector<16x22xf32>
    %112 = arith.subf %91, %111 : vector<16x22xf32>
    %113 = arith.mulf %112, %112 : vector<16x22xf32>
    %114 = arith.addf %94, %113 : vector<16x22xf32>
    %cst_36 = arith.constant 2.000000e+00 : f32
    %115 = vector.broadcast %cst_36 : f32 to vector<16x22xf32>
    %116 = arith.subf %91, %115 : vector<16x22xf32>
    %117 = arith.mulf %116, %116 : vector<16x22xf32>
    %118 = arith.addf %94, %117 : vector<16x22xf32>
    %cst_37 = arith.constant 3.000000e+00 : f32
    %119 = vector.broadcast %cst_37 : f32 to vector<16x22xf32>
    %120 = arith.subf %91, %119 : vector<16x22xf32>
    %121 = arith.mulf %120, %120 : vector<16x22xf32>
    %122 = arith.addf %94, %121 : vector<16x22xf32>
    %123 = vector.shape_cast %98 : vector<16x22xf32> to vector<1x16x22xf32>
    %124 = vector.shape_cast %102 : vector<16x22xf32> to vector<1x16x22xf32>
    %125 = vector.shape_cast %106 : vector<16x22xf32> to vector<1x16x22xf32>
    %126 = vector.shape_cast %110 : vector<16x22xf32> to vector<1x16x22xf32>
    %127 = vector.shape_cast %114 : vector<16x22xf32> to vector<1x16x22xf32>
    %128 = vector.shape_cast %118 : vector<16x22xf32> to vector<1x16x22xf32>
    %129 = vector.shape_cast %122 : vector<16x22xf32> to vector<1x16x22xf32>
    %130 = tpu.concatenate %123, %124, %125, %126, %127, %128, %129 in 0 : vector<1x16x22xf32>, vector<1x16x22xf32>, vector<1x16x22xf32>, vector<1x16x22xf32>, vector<1x16x22xf32>, vector<1x16x22xf32>, vector<1x16x22xf32> -> vector<7x16x22xf32>
    %131 = math.sqrt %130 : vector<7x16x22xf32>
    %cst_38 = arith.constant -4.000000e+00 : f32
    %132 = vector.broadcast %cst_38 : f32 to vector<7x16x22xf32>
    %133 = arith.mulf %131, %132 : vector<7x16x22xf32>
    %134 = math.exp %133 : vector<7x16x22xf32>
    %135 = vector.shape_cast %89 : vector<16x22xf32> to vector<1x16x22xf32>
    %136 = vector.broadcast %135 : vector<1x16x22xf32> to vector<7x16x22xf32>
    %137 = arith.mulf %134, %136 : vector<7x16x22xf32>
    %138 = vector.extract_strided_slice %137 {offsets = [0, 0, 0], sizes = [1, 16, 16], strides = [1, 1, 1]} : vector<7x16x22xf32> to vector<1x16x16xf32>
    %139 = vector.shape_cast %138 : vector<1x16x16xf32> to vector<16x16xf32>
    %140 = arith.addf %88, %139 : vector<16x16xf32>
    %141 = vector.extract_strided_slice %137 {offsets = [1, 0, 1], sizes = [1, 16, 16], strides = [1, 1, 1]} : vector<7x16x22xf32> to vector<1x16x16xf32>
    %142 = vector.shape_cast %141 : vector<1x16x16xf32> to vector<16x16xf32>
    %143 = arith.addf %140, %142 : vector<16x16xf32>
    %144 = vector.extract_strided_slice %137 {offsets = [2, 0, 2], sizes = [1, 16, 16], strides = [1, 1, 1]} : vector<7x16x22xf32> to vector<1x16x16xf32>
    %145 = vector.shape_cast %144 : vector<1x16x16xf32> to vector<16x16xf32>
    %146 = arith.addf %143, %145 : vector<16x16xf32>
    %147 = vector.extract_strided_slice %137 {offsets = [3, 0, 3], sizes = [1, 16, 16], strides = [1, 1, 1]} : vector<7x16x22xf32> to vector<1x16x16xf32>
    %148 = vector.shape_cast %147 : vector<1x16x16xf32> to vector<16x16xf32>
    %149 = arith.addf %146, %148 : vector<16x16xf32>
    %150 = vector.extract_strided_slice %137 {offsets = [4, 0, 4], sizes = [1, 16, 16], strides = [1, 1, 1]} : vector<7x16x22xf32> to vector<1x16x16xf32>
    %151 = vector.shape_cast %150 : vector<1x16x16xf32> to vector<16x16xf32>
    %152 = arith.addf %149, %151 : vector<16x16xf32>
    %153 = vector.extract_strided_slice %137 {offsets = [5, 0, 5], sizes = [1, 16, 16], strides = [1, 1, 1]} : vector<7x16x22xf32> to vector<1x16x16xf32>
    %154 = vector.shape_cast %153 : vector<1x16x16xf32> to vector<16x16xf32>
    %155 = arith.addf %152, %154 : vector<16x16xf32>
    %156 = vector.extract_strided_slice %137 {offsets = [6, 0, 6], sizes = [1, 16, 16], strides = [1, 1, 1]} : vector<7x16x22xf32> to vector<1x16x16xf32>
    %157 = vector.shape_cast %156 : vector<1x16x16xf32> to vector<16x16xf32>
    %158 = arith.addf %155, %157 : vector<16x16xf32>
    %159 = vector.extract_strided_slice %11 {offsets = [2, 0], sizes = [16, 22], strides = [1, 1]} : vector<22x22xf32> to vector<16x22xf32>
    %160 = vector.extract_strided_slice %13 {offsets = [2, 0], sizes = [16, 22], strides = [1, 1]} : vector<22x22xf32> to vector<16x22xf32>
    %161 = vector.extract_strided_slice %15 {offsets = [2, 0], sizes = [16, 22], strides = [1, 1]} : vector<22x22xf32> to vector<16x22xf32>
    %cst_39 = arith.constant -1.000000e+00 : f32
    %162 = vector.broadcast %cst_39 : f32 to vector<16x22xf32>
    %163 = arith.subf %160, %162 : vector<16x22xf32>
    %164 = arith.mulf %163, %163 : vector<16x22xf32>
    %cst_40 = arith.constant -3.000000e+00 : f32
    %165 = vector.broadcast %cst_40 : f32 to vector<16x22xf32>
    %166 = arith.subf %161, %165 : vector<16x22xf32>
    %167 = arith.mulf %166, %166 : vector<16x22xf32>
    %168 = arith.addf %164, %167 : vector<16x22xf32>
    %cst_41 = arith.constant -2.000000e+00 : f32
    %169 = vector.broadcast %cst_41 : f32 to vector<16x22xf32>
    %170 = arith.subf %161, %169 : vector<16x22xf32>
    %171 = arith.mulf %170, %170 : vector<16x22xf32>
    %172 = arith.addf %164, %171 : vector<16x22xf32>
    %cst_42 = arith.constant -1.000000e+00 : f32
    %173 = vector.broadcast %cst_42 : f32 to vector<16x22xf32>
    %174 = arith.subf %161, %173 : vector<16x22xf32>
    %175 = arith.mulf %174, %174 : vector<16x22xf32>
    %176 = arith.addf %164, %175 : vector<16x22xf32>
    %cst_43 = arith.constant 0.000000e+00 : f32
    %177 = vector.broadcast %cst_43 : f32 to vector<16x22xf32>
    %178 = arith.subf %161, %177 : vector<16x22xf32>
    %179 = arith.mulf %178, %178 : vector<16x22xf32>
    %180 = arith.addf %164, %179 : vector<16x22xf32>
    %cst_44 = arith.constant 1.000000e+00 : f32
    %181 = vector.broadcast %cst_44 : f32 to vector<16x22xf32>
    %182 = arith.subf %161, %181 : vector<16x22xf32>
    %183 = arith.mulf %182, %182 : vector<16x22xf32>
    %184 = arith.addf %164, %183 : vector<16x22xf32>
    %cst_45 = arith.constant 2.000000e+00 : f32
    %185 = vector.broadcast %cst_45 : f32 to vector<16x22xf32>
    %186 = arith.subf %161, %185 : vector<16x22xf32>
    %187 = arith.mulf %186, %186 : vector<16x22xf32>
    %188 = arith.addf %164, %187 : vector<16x22xf32>
    %cst_46 = arith.constant 3.000000e+00 : f32
    %189 = vector.broadcast %cst_46 : f32 to vector<16x22xf32>
    %190 = arith.subf %161, %189 : vector<16x22xf32>
    %191 = arith.mulf %190, %190 : vector<16x22xf32>
    %192 = arith.addf %164, %191 : vector<16x22xf32>
    %193 = vector.shape_cast %168 : vector<16x22xf32> to vector<1x16x22xf32>
    %194 = vector.shape_cast %172 : vector<16x22xf32> to vector<1x16x22xf32>
    %195 = vector.shape_cast %176 : vector<16x22xf32> to vector<1x16x22xf32>
    %196 = vector.shape_cast %180 : vector<16x22xf32> to vector<1x16x22xf32>
    %197 = vector.shape_cast %184 : vector<16x22xf32> to vector<1x16x22xf32>
    %198 = vector.shape_cast %188 : vector<16x22xf32> to vector<1x16x22xf32>
    %199 = vector.shape_cast %192 : vector<16x22xf32> to vector<1x16x22xf32>
    %200 = tpu.concatenate %193, %194, %195, %196, %197, %198, %199 in 0 : vector<1x16x22xf32>, vector<1x16x22xf32>, vector<1x16x22xf32>, vector<1x16x22xf32>, vector<1x16x22xf32>, vector<1x16x22xf32>, vector<1x16x22xf32> -> vector<7x16x22xf32>
    %201 = math.sqrt %200 : vector<7x16x22xf32>
    %cst_47 = arith.constant -4.000000e+00 : f32
    %202 = vector.broadcast %cst_47 : f32 to vector<7x16x22xf32>
    %203 = arith.mulf %201, %202 : vector<7x16x22xf32>
    %204 = math.exp %203 : vector<7x16x22xf32>
    %205 = vector.shape_cast %159 : vector<16x22xf32> to vector<1x16x22xf32>
    %206 = vector.broadcast %205 : vector<1x16x22xf32> to vector<7x16x22xf32>
    %207 = arith.mulf %204, %206 : vector<7x16x22xf32>
    %208 = vector.extract_strided_slice %207 {offsets = [0, 0, 0], sizes = [1, 16, 16], strides = [1, 1, 1]} : vector<7x16x22xf32> to vector<1x16x16xf32>
    %209 = vector.shape_cast %208 : vector<1x16x16xf32> to vector<16x16xf32>
    %210 = arith.addf %158, %209 : vector<16x16xf32>
    %211 = vector.extract_strided_slice %207 {offsets = [1, 0, 1], sizes = [1, 16, 16], strides = [1, 1, 1]} : vector<7x16x22xf32> to vector<1x16x16xf32>
    %212 = vector.shape_cast %211 : vector<1x16x16xf32> to vector<16x16xf32>
    %213 = arith.addf %210, %212 : vector<16x16xf32>
    %214 = vector.extract_strided_slice %207 {offsets = [2, 0, 2], sizes = [1, 16, 16], strides = [1, 1, 1]} : vector<7x16x22xf32> to vector<1x16x16xf32>
    %215 = vector.shape_cast %214 : vector<1x16x16xf32> to vector<16x16xf32>
    %216 = arith.addf %213, %215 : vector<16x16xf32>
    %217 = vector.extract_strided_slice %207 {offsets = [3, 0, 3], sizes = [1, 16, 16], strides = [1, 1, 1]} : vector<7x16x22xf32> to vector<1x16x16xf32>
    %218 = vector.shape_cast %217 : vector<1x16x16xf32> to vector<16x16xf32>
    %219 = arith.addf %216, %218 : vector<16x16xf32>
    %220 = vector.extract_strided_slice %207 {offsets = [4, 0, 4], sizes = [1, 16, 16], strides = [1, 1, 1]} : vector<7x16x22xf32> to vector<1x16x16xf32>
    %221 = vector.shape_cast %220 : vector<1x16x16xf32> to vector<16x16xf32>
    %222 = arith.addf %219, %221 : vector<16x16xf32>
    %223 = vector.extract_strided_slice %207 {offsets = [5, 0, 5], sizes = [1, 16, 16], strides = [1, 1, 1]} : vector<7x16x22xf32> to vector<1x16x16xf32>
    %224 = vector.shape_cast %223 : vector<1x16x16xf32> to vector<16x16xf32>
    %225 = arith.addf %222, %224 : vector<16x16xf32>
    %226 = vector.extract_strided_slice %207 {offsets = [6, 0, 6], sizes = [1, 16, 16], strides = [1, 1, 1]} : vector<7x16x22xf32> to vector<1x16x16xf32>
    %227 = vector.shape_cast %226 : vector<1x16x16xf32> to vector<16x16xf32>
    %228 = arith.addf %225, %227 : vector<16x16xf32>
    %229 = vector.extract_strided_slice %11 {offsets = [3, 0], sizes = [16, 22], strides = [1, 1]} : vector<22x22xf32> to vector<16x22xf32>
    %230 = vector.extract_strided_slice %13 {offsets = [3, 0], sizes = [16, 22], strides = [1, 1]} : vector<22x22xf32> to vector<16x22xf32>
    %231 = vector.extract_strided_slice %15 {offsets = [3, 0], sizes = [16, 22], strides = [1, 1]} : vector<22x22xf32> to vector<16x22xf32>
    %cst_48 = arith.constant 0.000000e+00 : f32
    %232 = vector.broadcast %cst_48 : f32 to vector<16x22xf32>
    %233 = arith.subf %230, %232 : vector<16x22xf32>
    %234 = arith.mulf %233, %233 : vector<16x22xf32>
    %cst_49 = arith.constant -3.000000e+00 : f32
    %235 = vector.broadcast %cst_49 : f32 to vector<16x22xf32>
    %236 = arith.subf %231, %235 : vector<16x22xf32>
    %237 = arith.mulf %236, %236 : vector<16x22xf32>
    %238 = arith.addf %234, %237 : vector<16x22xf32>
    %cst_50 = arith.constant -2.000000e+00 : f32
    %239 = vector.broadcast %cst_50 : f32 to vector<16x22xf32>
    %240 = arith.subf %231, %239 : vector<16x22xf32>
    %241 = arith.mulf %240, %240 : vector<16x22xf32>
    %242 = arith.addf %234, %241 : vector<16x22xf32>
    %cst_51 = arith.constant -1.000000e+00 : f32
    %243 = vector.broadcast %cst_51 : f32 to vector<16x22xf32>
    %244 = arith.subf %231, %243 : vector<16x22xf32>
    %245 = arith.mulf %244, %244 : vector<16x22xf32>
    %246 = arith.addf %234, %245 : vector<16x22xf32>
    %cst_52 = arith.constant 0.000000e+00 : f32
    %247 = vector.broadcast %cst_52 : f32 to vector<16x22xf32>
    %248 = arith.subf %231, %247 : vector<16x22xf32>
    %249 = arith.mulf %248, %248 : vector<16x22xf32>
    %250 = arith.addf %234, %249 : vector<16x22xf32>
    %cst_53 = arith.constant 1.000000e+00 : f32
    %251 = vector.broadcast %cst_53 : f32 to vector<16x22xf32>
    %252 = arith.subf %231, %251 : vector<16x22xf32>
    %253 = arith.mulf %252, %252 : vector<16x22xf32>
    %254 = arith.addf %234, %253 : vector<16x22xf32>
    %cst_54 = arith.constant 2.000000e+00 : f32
    %255 = vector.broadcast %cst_54 : f32 to vector<16x22xf32>
    %256 = arith.subf %231, %255 : vector<16x22xf32>
    %257 = arith.mulf %256, %256 : vector<16x22xf32>
    %258 = arith.addf %234, %257 : vector<16x22xf32>
    %cst_55 = arith.constant 3.000000e+00 : f32
    %259 = vector.broadcast %cst_55 : f32 to vector<16x22xf32>
    %260 = arith.subf %231, %259 : vector<16x22xf32>
    %261 = arith.mulf %260, %260 : vector<16x22xf32>
    %262 = arith.addf %234, %261 : vector<16x22xf32>
    %263 = vector.shape_cast %238 : vector<16x22xf32> to vector<1x16x22xf32>
    %264 = vector.shape_cast %242 : vector<16x22xf32> to vector<1x16x22xf32>
    %265 = vector.shape_cast %246 : vector<16x22xf32> to vector<1x16x22xf32>
    %266 = vector.shape_cast %250 : vector<16x22xf32> to vector<1x16x22xf32>
    %267 = vector.shape_cast %254 : vector<16x22xf32> to vector<1x16x22xf32>
    %268 = vector.shape_cast %258 : vector<16x22xf32> to vector<1x16x22xf32>
    %269 = vector.shape_cast %262 : vector<16x22xf32> to vector<1x16x22xf32>
    %270 = tpu.concatenate %263, %264, %265, %266, %267, %268, %269 in 0 : vector<1x16x22xf32>, vector<1x16x22xf32>, vector<1x16x22xf32>, vector<1x16x22xf32>, vector<1x16x22xf32>, vector<1x16x22xf32>, vector<1x16x22xf32> -> vector<7x16x22xf32>
    %271 = math.sqrt %270 : vector<7x16x22xf32>
    %cst_56 = arith.constant -4.000000e+00 : f32
    %272 = vector.broadcast %cst_56 : f32 to vector<7x16x22xf32>
    %273 = arith.mulf %271, %272 : vector<7x16x22xf32>
    %274 = math.exp %273 : vector<7x16x22xf32>
    %275 = vector.shape_cast %229 : vector<16x22xf32> to vector<1x16x22xf32>
    %276 = vector.broadcast %275 : vector<1x16x22xf32> to vector<7x16x22xf32>
    %277 = arith.mulf %274, %276 : vector<7x16x22xf32>
    %278 = vector.extract_strided_slice %277 {offsets = [0, 0, 0], sizes = [1, 16, 16], strides = [1, 1, 1]} : vector<7x16x22xf32> to vector<1x16x16xf32>
    %279 = vector.shape_cast %278 : vector<1x16x16xf32> to vector<16x16xf32>
    %280 = arith.addf %228, %279 : vector<16x16xf32>
    %281 = vector.extract_strided_slice %277 {offsets = [1, 0, 1], sizes = [1, 16, 16], strides = [1, 1, 1]} : vector<7x16x22xf32> to vector<1x16x16xf32>
    %282 = vector.shape_cast %281 : vector<1x16x16xf32> to vector<16x16xf32>
    %283 = arith.addf %280, %282 : vector<16x16xf32>
    %284 = vector.extract_strided_slice %277 {offsets = [2, 0, 2], sizes = [1, 16, 16], strides = [1, 1, 1]} : vector<7x16x22xf32> to vector<1x16x16xf32>
    %285 = vector.shape_cast %284 : vector<1x16x16xf32> to vector<16x16xf32>
    %286 = arith.addf %283, %285 : vector<16x16xf32>
    %287 = vector.extract_strided_slice %277 {offsets = [3, 0, 3], sizes = [1, 16, 16], strides = [1, 1, 1]} : vector<7x16x22xf32> to vector<1x16x16xf32>
    %288 = vector.shape_cast %287 : vector<1x16x16xf32> to vector<16x16xf32>
    %289 = arith.addf %286, %288 : vector<16x16xf32>
    %290 = vector.extract_strided_slice %277 {offsets = [4, 0, 4], sizes = [1, 16, 16], strides = [1, 1, 1]} : vector<7x16x22xf32> to vector<1x16x16xf32>
    %291 = vector.shape_cast %290 : vector<1x16x16xf32> to vector<16x16xf32>
    %292 = arith.addf %289, %291 : vector<16x16xf32>
    %293 = vector.extract_strided_slice %277 {offsets = [5, 0, 5], sizes = [1, 16, 16], strides = [1, 1, 1]} : vector<7x16x22xf32> to vector<1x16x16xf32>
    %294 = vector.shape_cast %293 : vector<1x16x16xf32> to vector<16x16xf32>
    %295 = arith.addf %292, %294 : vector<16x16xf32>
    %296 = vector.extract_strided_slice %277 {offsets = [6, 0, 6], sizes = [1, 16, 16], strides = [1, 1, 1]} : vector<7x16x22xf32> to vector<1x16x16xf32>
    %297 = vector.shape_cast %296 : vector<1x16x16xf32> to vector<16x16xf32>
    %298 = arith.addf %295, %297 : vector<16x16xf32>
    %299 = vector.extract_strided_slice %11 {offsets = [4, 0], sizes = [16, 22], strides = [1, 1]} : vector<22x22xf32> to vector<16x22xf32>
    %300 = vector.extract_strided_slice %13 {offsets = [4, 0], sizes = [16, 22], strides = [1, 1]} : vector<22x22xf32> to vector<16x22xf32>
    %301 = vector.extract_strided_slice %15 {offsets = [4, 0], sizes = [16, 22], strides = [1, 1]} : vector<22x22xf32> to vector<16x22xf32>
    %cst_57 = arith.constant 1.000000e+00 : f32
    %302 = vector.broadcast %cst_57 : f32 to vector<16x22xf32>
    %303 = arith.subf %300, %302 : vector<16x22xf32>
    %304 = arith.mulf %303, %303 : vector<16x22xf32>
    %cst_58 = arith.constant -3.000000e+00 : f32
    %305 = vector.broadcast %cst_58 : f32 to vector<16x22xf32>
    %306 = arith.subf %301, %305 : vector<16x22xf32>
    %307 = arith.mulf %306, %306 : vector<16x22xf32>
    %308 = arith.addf %304, %307 : vector<16x22xf32>
    %cst_59 = arith.constant -2.000000e+00 : f32
    %309 = vector.broadcast %cst_59 : f32 to vector<16x22xf32>
    %310 = arith.subf %301, %309 : vector<16x22xf32>
    %311 = arith.mulf %310, %310 : vector<16x22xf32>
    %312 = arith.addf %304, %311 : vector<16x22xf32>
    %cst_60 = arith.constant -1.000000e+00 : f32
    %313 = vector.broadcast %cst_60 : f32 to vector<16x22xf32>
    %314 = arith.subf %301, %313 : vector<16x22xf32>
    %315 = arith.mulf %314, %314 : vector<16x22xf32>
    %316 = arith.addf %304, %315 : vector<16x22xf32>
    %cst_61 = arith.constant 0.000000e+00 : f32
    %317 = vector.broadcast %cst_61 : f32 to vector<16x22xf32>
    %318 = arith.subf %301, %317 : vector<16x22xf32>
    %319 = arith.mulf %318, %318 : vector<16x22xf32>
    %320 = arith.addf %304, %319 : vector<16x22xf32>
    %cst_62 = arith.constant 1.000000e+00 : f32
    %321 = vector.broadcast %cst_62 : f32 to vector<16x22xf32>
    %322 = arith.subf %301, %321 : vector<16x22xf32>
    %323 = arith.mulf %322, %322 : vector<16x22xf32>
    %324 = arith.addf %304, %323 : vector<16x22xf32>
    %cst_63 = arith.constant 2.000000e+00 : f32
    %325 = vector.broadcast %cst_63 : f32 to vector<16x22xf32>
    %326 = arith.subf %301, %325 : vector<16x22xf32>
    %327 = arith.mulf %326, %326 : vector<16x22xf32>
    %328 = arith.addf %304, %327 : vector<16x22xf32>
    %cst_64 = arith.constant 3.000000e+00 : f32
    %329 = vector.broadcast %cst_64 : f32 to vector<16x22xf32>
    %330 = arith.subf %301, %329 : vector<16x22xf32>
    %331 = arith.mulf %330, %330 : vector<16x22xf32>
    %332 = arith.addf %304, %331 : vector<16x22xf32>
    %333 = vector.shape_cast %308 : vector<16x22xf32> to vector<1x16x22xf32>
    %334 = vector.shape_cast %312 : vector<16x22xf32> to vector<1x16x22xf32>
    %335 = vector.shape_cast %316 : vector<16x22xf32> to vector<1x16x22xf32>
    %336 = vector.shape_cast %320 : vector<16x22xf32> to vector<1x16x22xf32>
    %337 = vector.shape_cast %324 : vector<16x22xf32> to vector<1x16x22xf32>
    %338 = vector.shape_cast %328 : vector<16x22xf32> to vector<1x16x22xf32>
    %339 = vector.shape_cast %332 : vector<16x22xf32> to vector<1x16x22xf32>
    %340 = tpu.concatenate %333, %334, %335, %336, %337, %338, %339 in 0 : vector<1x16x22xf32>, vector<1x16x22xf32>, vector<1x16x22xf32>, vector<1x16x22xf32>, vector<1x16x22xf32>, vector<1x16x22xf32>, vector<1x16x22xf32> -> vector<7x16x22xf32>
    %341 = math.sqrt %340 : vector<7x16x22xf32>
    %cst_65 = arith.constant -4.000000e+00 : f32
    %342 = vector.broadcast %cst_65 : f32 to vector<7x16x22xf32>
    %343 = arith.mulf %341, %342 : vector<7x16x22xf32>
    %344 = math.exp %343 : vector<7x16x22xf32>
    %345 = vector.shape_cast %299 : vector<16x22xf32> to vector<1x16x22xf32>
    %346 = vector.broadcast %345 : vector<1x16x22xf32> to vector<7x16x22xf32>
    %347 = arith.mulf %344, %346 : vector<7x16x22xf32>
    %348 = vector.extract_strided_slice %347 {offsets = [0, 0, 0], sizes = [1, 16, 16], strides = [1, 1, 1]} : vector<7x16x22xf32> to vector<1x16x16xf32>
    %349 = vector.shape_cast %348 : vector<1x16x16xf32> to vector<16x16xf32>
    %350 = arith.addf %298, %349 : vector<16x16xf32>
    %351 = vector.extract_strided_slice %347 {offsets = [1, 0, 1], sizes = [1, 16, 16], strides = [1, 1, 1]} : vector<7x16x22xf32> to vector<1x16x16xf32>
    %352 = vector.shape_cast %351 : vector<1x16x16xf32> to vector<16x16xf32>
    %353 = arith.addf %350, %352 : vector<16x16xf32>
    %354 = vector.extract_strided_slice %347 {offsets = [2, 0, 2], sizes = [1, 16, 16], strides = [1, 1, 1]} : vector<7x16x22xf32> to vector<1x16x16xf32>
    %355 = vector.shape_cast %354 : vector<1x16x16xf32> to vector<16x16xf32>
    %356 = arith.addf %353, %355 : vector<16x16xf32>
    %357 = vector.extract_strided_slice %347 {offsets = [3, 0, 3], sizes = [1, 16, 16], strides = [1, 1, 1]} : vector<7x16x22xf32> to vector<1x16x16xf32>
    %358 = vector.shape_cast %357 : vector<1x16x16xf32> to vector<16x16xf32>
    %359 = arith.addf %356, %358 : vector<16x16xf32>
    %360 = vector.extract_strided_slice %347 {offsets = [4, 0, 4], sizes = [1, 16, 16], strides = [1, 1, 1]} : vector<7x16x22xf32> to vector<1x16x16xf32>
    %361 = vector.shape_cast %360 : vector<1x16x16xf32> to vector<16x16xf32>
    %362 = arith.addf %359, %361 : vector<16x16xf32>
    %363 = vector.extract_strided_slice %347 {offsets = [5, 0, 5], sizes = [1, 16, 16], strides = [1, 1, 1]} : vector<7x16x22xf32> to vector<1x16x16xf32>
    %364 = vector.shape_cast %363 : vector<1x16x16xf32> to vector<16x16xf32>
    %365 = arith.addf %362, %364 : vector<16x16xf32>
    %366 = vector.extract_strided_slice %347 {offsets = [6, 0, 6], sizes = [1, 16, 16], strides = [1, 1, 1]} : vector<7x16x22xf32> to vector<1x16x16xf32>
    %367 = vector.shape_cast %366 : vector<1x16x16xf32> to vector<16x16xf32>
    %368 = arith.addf %365, %367 : vector<16x16xf32>
    %369 = vector.extract_strided_slice %11 {offsets = [5, 0], sizes = [16, 22], strides = [1, 1]} : vector<22x22xf32> to vector<16x22xf32>
    %370 = vector.extract_strided_slice %13 {offsets = [5, 0], sizes = [16, 22], strides = [1, 1]} : vector<22x22xf32> to vector<16x22xf32>
    %371 = vector.extract_strided_slice %15 {offsets = [5, 0], sizes = [16, 22], strides = [1, 1]} : vector<22x22xf32> to vector<16x22xf32>
    %cst_66 = arith.constant 2.000000e+00 : f32
    %372 = vector.broadcast %cst_66 : f32 to vector<16x22xf32>
    %373 = arith.subf %370, %372 : vector<16x22xf32>
    %374 = arith.mulf %373, %373 : vector<16x22xf32>
    %cst_67 = arith.constant -3.000000e+00 : f32
    %375 = vector.broadcast %cst_67 : f32 to vector<16x22xf32>
    %376 = arith.subf %371, %375 : vector<16x22xf32>
    %377 = arith.mulf %376, %376 : vector<16x22xf32>
    %378 = arith.addf %374, %377 : vector<16x22xf32>
    %cst_68 = arith.constant -2.000000e+00 : f32
    %379 = vector.broadcast %cst_68 : f32 to vector<16x22xf32>
    %380 = arith.subf %371, %379 : vector<16x22xf32>
    %381 = arith.mulf %380, %380 : vector<16x22xf32>
    %382 = arith.addf %374, %381 : vector<16x22xf32>
    %cst_69 = arith.constant -1.000000e+00 : f32
    %383 = vector.broadcast %cst_69 : f32 to vector<16x22xf32>
    %384 = arith.subf %371, %383 : vector<16x22xf32>
    %385 = arith.mulf %384, %384 : vector<16x22xf32>
    %386 = arith.addf %374, %385 : vector<16x22xf32>
    %cst_70 = arith.constant 0.000000e+00 : f32
    %387 = vector.broadcast %cst_70 : f32 to vector<16x22xf32>
    %388 = arith.subf %371, %387 : vector<16x22xf32>
    %389 = arith.mulf %388, %388 : vector<16x22xf32>
    %390 = arith.addf %374, %389 : vector<16x22xf32>
    %cst_71 = arith.constant 1.000000e+00 : f32
    %391 = vector.broadcast %cst_71 : f32 to vector<16x22xf32>
    %392 = arith.subf %371, %391 : vector<16x22xf32>
    %393 = arith.mulf %392, %392 : vector<16x22xf32>
    %394 = arith.addf %374, %393 : vector<16x22xf32>
    %cst_72 = arith.constant 2.000000e+00 : f32
    %395 = vector.broadcast %cst_72 : f32 to vector<16x22xf32>
    %396 = arith.subf %371, %395 : vector<16x22xf32>
    %397 = arith.mulf %396, %396 : vector<16x22xf32>
    %398 = arith.addf %374, %397 : vector<16x22xf32>
    %cst_73 = arith.constant 3.000000e+00 : f32
    %399 = vector.broadcast %cst_73 : f32 to vector<16x22xf32>
    %400 = arith.subf %371, %399 : vector<16x22xf32>
    %401 = arith.mulf %400, %400 : vector<16x22xf32>
    %402 = arith.addf %374, %401 : vector<16x22xf32>
    %403 = vector.shape_cast %378 : vector<16x22xf32> to vector<1x16x22xf32>
    %404 = vector.shape_cast %382 : vector<16x22xf32> to vector<1x16x22xf32>
    %405 = vector.shape_cast %386 : vector<16x22xf32> to vector<1x16x22xf32>
    %406 = vector.shape_cast %390 : vector<16x22xf32> to vector<1x16x22xf32>
    %407 = vector.shape_cast %394 : vector<16x22xf32> to vector<1x16x22xf32>
    %408 = vector.shape_cast %398 : vector<16x22xf32> to vector<1x16x22xf32>
    %409 = vector.shape_cast %402 : vector<16x22xf32> to vector<1x16x22xf32>
    %410 = tpu.concatenate %403, %404, %405, %406, %407, %408, %409 in 0 : vector<1x16x22xf32>, vector<1x16x22xf32>, vector<1x16x22xf32>, vector<1x16x22xf32>, vector<1x16x22xf32>, vector<1x16x22xf32>, vector<1x16x22xf32> -> vector<7x16x22xf32>
    %411 = math.sqrt %410 : vector<7x16x22xf32>
    %cst_74 = arith.constant -4.000000e+00 : f32
    %412 = vector.broadcast %cst_74 : f32 to vector<7x16x22xf32>
    %413 = arith.mulf %411, %412 : vector<7x16x22xf32>
    %414 = math.exp %413 : vector<7x16x22xf32>
    %415 = vector.shape_cast %369 : vector<16x22xf32> to vector<1x16x22xf32>
    %416 = vector.broadcast %415 : vector<1x16x22xf32> to vector<7x16x22xf32>
    %417 = arith.mulf %414, %416 : vector<7x16x22xf32>
    %418 = vector.extract_strided_slice %417 {offsets = [0, 0, 0], sizes = [1, 16, 16], strides = [1, 1, 1]} : vector<7x16x22xf32> to vector<1x16x16xf32>
    %419 = vector.shape_cast %418 : vector<1x16x16xf32> to vector<16x16xf32>
    %420 = arith.addf %368, %419 : vector<16x16xf32>
    %421 = vector.extract_strided_slice %417 {offsets = [1, 0, 1], sizes = [1, 16, 16], strides = [1, 1, 1]} : vector<7x16x22xf32> to vector<1x16x16xf32>
    %422 = vector.shape_cast %421 : vector<1x16x16xf32> to vector<16x16xf32>
    %423 = arith.addf %420, %422 : vector<16x16xf32>
    %424 = vector.extract_strided_slice %417 {offsets = [2, 0, 2], sizes = [1, 16, 16], strides = [1, 1, 1]} : vector<7x16x22xf32> to vector<1x16x16xf32>
    %425 = vector.shape_cast %424 : vector<1x16x16xf32> to vector<16x16xf32>
    %426 = arith.addf %423, %425 : vector<16x16xf32>
    %427 = vector.extract_strided_slice %417 {offsets = [3, 0, 3], sizes = [1, 16, 16], strides = [1, 1, 1]} : vector<7x16x22xf32> to vector<1x16x16xf32>
    %428 = vector.shape_cast %427 : vector<1x16x16xf32> to vector<16x16xf32>
    %429 = arith.addf %426, %428 : vector<16x16xf32>
    %430 = vector.extract_strided_slice %417 {offsets = [4, 0, 4], sizes = [1, 16, 16], strides = [1, 1, 1]} : vector<7x16x22xf32> to vector<1x16x16xf32>
    %431 = vector.shape_cast %430 : vector<1x16x16xf32> to vector<16x16xf32>
    %432 = arith.addf %429, %431 : vector<16x16xf32>
    %433 = vector.extract_strided_slice %417 {offsets = [5, 0, 5], sizes = [1, 16, 16], strides = [1, 1, 1]} : vector<7x16x22xf32> to vector<1x16x16xf32>
    %434 = vector.shape_cast %433 : vector<1x16x16xf32> to vector<16x16xf32>
    %435 = arith.addf %432, %434 : vector<16x16xf32>
    %436 = vector.extract_strided_slice %417 {offsets = [6, 0, 6], sizes = [1, 16, 16], strides = [1, 1, 1]} : vector<7x16x22xf32> to vector<1x16x16xf32>
    %437 = vector.shape_cast %436 : vector<1x16x16xf32> to vector<16x16xf32>
    %438 = arith.addf %435, %437 : vector<16x16xf32>
    %439 = vector.extract_strided_slice %11 {offsets = [6, 0], sizes = [16, 22], strides = [1, 1]} : vector<22x22xf32> to vector<16x22xf32>
    %440 = vector.extract_strided_slice %13 {offsets = [6, 0], sizes = [16, 22], strides = [1, 1]} : vector<22x22xf32> to vector<16x22xf32>
    %441 = vector.extract_strided_slice %15 {offsets = [6, 0], sizes = [16, 22], strides = [1, 1]} : vector<22x22xf32> to vector<16x22xf32>
    %cst_75 = arith.constant 3.000000e+00 : f32
    %442 = vector.broadcast %cst_75 : f32 to vector<16x22xf32>
    %443 = arith.subf %440, %442 : vector<16x22xf32>
    %444 = arith.mulf %443, %443 : vector<16x22xf32>
    %cst_76 = arith.constant -3.000000e+00 : f32
    %445 = vector.broadcast %cst_76 : f32 to vector<16x22xf32>
    %446 = arith.subf %441, %445 : vector<16x22xf32>
    %447 = arith.mulf %446, %446 : vector<16x22xf32>
    %448 = arith.addf %444, %447 : vector<16x22xf32>
    %cst_77 = arith.constant -2.000000e+00 : f32
    %449 = vector.broadcast %cst_77 : f32 to vector<16x22xf32>
    %450 = arith.subf %441, %449 : vector<16x22xf32>
    %451 = arith.mulf %450, %450 : vector<16x22xf32>
    %452 = arith.addf %444, %451 : vector<16x22xf32>
    %cst_78 = arith.constant -1.000000e+00 : f32
    %453 = vector.broadcast %cst_78 : f32 to vector<16x22xf32>
    %454 = arith.subf %441, %453 : vector<16x22xf32>
    %455 = arith.mulf %454, %454 : vector<16x22xf32>
    %456 = arith.addf %444, %455 : vector<16x22xf32>
    %cst_79 = arith.constant 0.000000e+00 : f32
    %457 = vector.broadcast %cst_79 : f32 to vector<16x22xf32>
    %458 = arith.subf %441, %457 : vector<16x22xf32>
    %459 = arith.mulf %458, %458 : vector<16x22xf32>
    %460 = arith.addf %444, %459 : vector<16x22xf32>
    %cst_80 = arith.constant 1.000000e+00 : f32
    %461 = vector.broadcast %cst_80 : f32 to vector<16x22xf32>
    %462 = arith.subf %441, %461 : vector<16x22xf32>
    %463 = arith.mulf %462, %462 : vector<16x22xf32>
    %464 = arith.addf %444, %463 : vector<16x22xf32>
    %cst_81 = arith.constant 2.000000e+00 : f32
    %465 = vector.broadcast %cst_81 : f32 to vector<16x22xf32>
    %466 = arith.subf %441, %465 : vector<16x22xf32>
    %467 = arith.mulf %466, %466 : vector<16x22xf32>
    %468 = arith.addf %444, %467 : vector<16x22xf32>
    %cst_82 = arith.constant 3.000000e+00 : f32
    %469 = vector.broadcast %cst_82 : f32 to vector<16x22xf32>
    %470 = arith.subf %441, %469 : vector<16x22xf32>
    %471 = arith.mulf %470, %470 : vector<16x22xf32>
    %472 = arith.addf %444, %471 : vector<16x22xf32>
    %473 = vector.shape_cast %448 : vector<16x22xf32> to vector<1x16x22xf32>
    %474 = vector.shape_cast %452 : vector<16x22xf32> to vector<1x16x22xf32>
    %475 = vector.shape_cast %456 : vector<16x22xf32> to vector<1x16x22xf32>
    %476 = vector.shape_cast %460 : vector<16x22xf32> to vector<1x16x22xf32>
    %477 = vector.shape_cast %464 : vector<16x22xf32> to vector<1x16x22xf32>
    %478 = vector.shape_cast %468 : vector<16x22xf32> to vector<1x16x22xf32>
    %479 = vector.shape_cast %472 : vector<16x22xf32> to vector<1x16x22xf32>
    %480 = tpu.concatenate %473, %474, %475, %476, %477, %478, %479 in 0 : vector<1x16x22xf32>, vector<1x16x22xf32>, vector<1x16x22xf32>, vector<1x16x22xf32>, vector<1x16x22xf32>, vector<1x16x22xf32>, vector<1x16x22xf32> -> vector<7x16x22xf32>
    %481 = math.sqrt %480 : vector<7x16x22xf32>
    %cst_83 = arith.constant -4.000000e+00 : f32
    %482 = vector.broadcast %cst_83 : f32 to vector<7x16x22xf32>
    %483 = arith.mulf %481, %482 : vector<7x16x22xf32>
    %484 = math.exp %483 : vector<7x16x22xf32>
    %485 = vector.shape_cast %439 : vector<16x22xf32> to vector<1x16x22xf32>
    %486 = vector.broadcast %485 : vector<1x16x22xf32> to vector<7x16x22xf32>
    %487 = arith.mulf %484, %486 : vector<7x16x22xf32>
    %488 = vector.extract_strided_slice %487 {offsets = [0, 0, 0], sizes = [1, 16, 16], strides = [1, 1, 1]} : vector<7x16x22xf32> to vector<1x16x16xf32>
    %489 = vector.shape_cast %488 : vector<1x16x16xf32> to vector<16x16xf32>
    %490 = arith.addf %438, %489 : vector<16x16xf32>
    %491 = vector.extract_strided_slice %487 {offsets = [1, 0, 1], sizes = [1, 16, 16], strides = [1, 1, 1]} : vector<7x16x22xf32> to vector<1x16x16xf32>
    %492 = vector.shape_cast %491 : vector<1x16x16xf32> to vector<16x16xf32>
    %493 = arith.addf %490, %492 : vector<16x16xf32>
    %494 = vector.extract_strided_slice %487 {offsets = [2, 0, 2], sizes = [1, 16, 16], strides = [1, 1, 1]} : vector<7x16x22xf32> to vector<1x16x16xf32>
    %495 = vector.shape_cast %494 : vector<1x16x16xf32> to vector<16x16xf32>
    %496 = arith.addf %493, %495 : vector<16x16xf32>
    %497 = vector.extract_strided_slice %487 {offsets = [3, 0, 3], sizes = [1, 16, 16], strides = [1, 1, 1]} : vector<7x16x22xf32> to vector<1x16x16xf32>
    %498 = vector.shape_cast %497 : vector<1x16x16xf32> to vector<16x16xf32>
    %499 = arith.addf %496, %498 : vector<16x16xf32>
    %500 = vector.extract_strided_slice %487 {offsets = [4, 0, 4], sizes = [1, 16, 16], strides = [1, 1, 1]} : vector<7x16x22xf32> to vector<1x16x16xf32>
    %501 = vector.shape_cast %500 : vector<1x16x16xf32> to vector<16x16xf32>
    %502 = arith.addf %499, %501 : vector<16x16xf32>
    %503 = vector.extract_strided_slice %487 {offsets = [5, 0, 5], sizes = [1, 16, 16], strides = [1, 1, 1]} : vector<7x16x22xf32> to vector<1x16x16xf32>
    %504 = vector.shape_cast %503 : vector<1x16x16xf32> to vector<16x16xf32>
    %505 = arith.addf %502, %504 : vector<16x16xf32>
    %506 = vector.extract_strided_slice %487 {offsets = [6, 0, 6], sizes = [1, 16, 16], strides = [1, 1, 1]} : vector<7x16x22xf32> to vector<1x16x16xf32>
    %507 = vector.shape_cast %506 : vector<1x16x16xf32> to vector<16x16xf32>
    %508 = arith.addf %505, %507 : vector<16x16xf32>
    %cst_84 = arith.constant 9.99999974E-5 : f32
    %cst_85 = arith.constant 0.999899983 : f32
    %509 = vector.broadcast %cst_84 : f32 to vector<16x16xf32>
    %510 = arith.maximumf %509, %508 : vector<16x16xf32>
    %511 = vector.broadcast %cst_85 : f32 to vector<16x16xf32>
    %512 = arith.minimumf %511, %510 : vector<16x16xf32>
    %cst_86 = arith.constant 5.000000e-01 : f32
    %513 = vector.broadcast %cst_86 : f32 to vector<16x16xf32>
    %514 = arith.cmpf ogt, %17, %513 : vector<16x16xf32>
    %515 = arith.extui %514 : vector<16x16xi1> to vector<16x16xi32>
    %516 = arith.sitofp %515 : vector<16x16xi32> to vector<16x16xf32>
    %517 = arith.subf %512, %17 : vector<16x16xf32>
    %518 = arith.mulf %516, %517 : vector<16x16xf32>
    %519 = arith.mulf %518, %517 : vector<16x16xf32>
    %520 = vector.shape_cast %519 : vector<16x16xf32> to vector<1x16x16xf32>
    %cst_87 = arith.constant dense<0.000000e+00> : vector<1xf32>
    %521 = vector.multi_reduction <add>, %520, %cst_87 [1, 2] : vector<1x16x16xf32> to vector<1xf32>
    %522 = vector.shape_cast %521 : vector<1xf32> to vector<1x1x1xf32>
    %523 = vector.extract %522[0, 0, 0] : f32 from vector<1x1x1xf32>
    %524 = vector.broadcast %523 : f32 to vector<1x1x1xf32>
    %c0_88 = arith.constant 0 : index
    %c0_89 = arith.constant 0 : index
    %c0_90 = arith.constant 0 : index
    %525 = vector.load %arg7[%c0_88, %c0_89, %c0_90] : memref<1x1x1xf32, #tpu.memory_space<vmem>>, vector<1x1x1xf32>
    tpu.vector_store %arg7[%c0_88, %c0_89, %c0_90], %524 {strides = array<i32>} : memref<1x1x1xf32, #tpu.memory_space<vmem>>, vector<1x1x1xf32>,
    return
  }
  func.func @transform_0(%arg0: i32) -> (i32, i32, i32) {
    %c0_i32 = arith.constant 0 : i32
    %c0_i32_0 = arith.constant 0 : i32
    %c0_i32_1 = arith.constant 0 : i32
    return %arg0, %c0_i32, %c0_i32_0 : i32, i32, i32
  }
  func.func @transform_1(%arg0: i32) -> (i32, i32, i32) {
    %c0_i32 = arith.constant 0 : i32
    %c0_i32_0 = arith.constant 0 : i32
    %c0_i32_1 = arith.constant 0 : i32
    return %arg0, %c0_i32, %c0_i32_0 : i32, i32, i32
  }
  func.func @transform_2(%arg0: i32) -> (i32, i32, i32) {
    %c0_i32 = arith.constant 0 : i32
    %c0_i32_0 = arith.constant 0 : i32
    %c0_i32_1 = arith.constant 0 : i32
    return %arg0, %c0_i32, %c0_i32_0 : i32, i32, i32
  }
  func.func @transform_3(%arg0: i32) -> (i32, i32, i32) {
    %c0_i32 = arith.constant 0 : i32
    %c0_i32_0 = arith.constant 0 : i32
    %c0_i32_1 = arith.constant 0 : i32
    return %arg0, %c0_i32, %c0_i32_0 : i32, i32, i32
  }
  func.func @transform_4(%arg0: i32) -> (i32, i32, i32) {
    %c0_i32 = arith.constant 0 : i32
    %c0_i32_0 = arith.constant 0 : i32
    %c0_i32_1 = arith.constant 0 : i32
    return %arg0, %c0_i32, %c0_i32_0 : i32, i32, i32
  }
  func.func @transform_5(%arg0: i32) -> (i32, i32, i32) {
    %c0_i32 = arith.constant 0 : i32
    %c0_i32_0 = arith.constant 0 : i32
    %c0_i32_1 = arith.constant 0 : i32
    return %arg0, %c0_i32, %c0_i32_0 : i32, i32, i32
  }
  func.func @transform_6(%arg0: i32) -> (i32, i32, i32) {
    %c0_i32 = arith.constant 0 : i32
    %c0_i32_0 = arith.constant 0 : i32
    %c0_i32_1 = arith.constant 0 : i32
    return %arg0, %c0_i32, %c0_i32_0 : i32, i32, i32
  }
  func.func @transform_7(%arg0: i32) -> (i32, i32, i32) {
    %c0_i32 = arith.constant 0 : i32
    %c0_i32_0 = arith.constant 0 : i32
    %c0_i32_1 = arith.constant 0 : i32
    return %arg0, %c0_i32, %c0_i32_0 : i32, i32, i32
  }
}

</mosaic_0001>

<bundles_post_ra>
// kernel: tpu_custom_call.1
= control target key start
LH: loop header
LB: loop body
LE: loop exit
PB: predicated region body
PF: predicated region fallthrough
CT: control target
= control target key end

     0   :  { %s3750_s24 = smov 0   ;;  %s6381_s0 = inlined_call_operand.vmem [shape: f32[2,6,128], index: 0, kind: input, shape index: {}]   ;;  %s6382_s1 = inlined_call_operand.vmem [shape: f32[2,6,128], index: 1, kind: input, shape index: {}]   ;;  %s6383_s2 = inlined_call_operand.vmem [shape: f32[2,22,22], index: 2, kind: input, shape index: {}]   ;;  %s6384_s3 = inlined_call_operand.vmem [shape: f32[2,22,22], index: 3, kind: input, shape index: {}]   ;;  %s6385_s4 = inlined_call_operand.vmem [shape: f32[2,22,22], index: 4, kind: input, shape index: {}]   ;;  %s6386_s5 = inlined_call_operand.vmem [shape: f32[2,16,16], index: 5, kind: input, shape index: {}]   ;;  %s6387_s6 = inlined_call_operand.vmem [shape: f32[2,1,1], index: 6, kind: output, shape index: {0}]   ;;  %s6388_s7 = inlined_call_operand.vmem [shape: f32[2,1,1], index: 7, kind: output, shape index: {1}]  }
   0x1 LB: > { %s3041_s25 = sadd.s32 4294967295, %s3701_s24   ;;  %p3045_p0 = scmp.ge.s32.totalorder %s3701_s24, 1  ;;  %s3701_s24 = sphi %s3750_s24, %s18_s24  }
   0x2   : > { %p288_p1 = scmp.lt.s32.totalorder %s3701_s24, 3 }
   0x4   : > { %p289_p2 = pnand %p3045_p0, %p288_p1 }
   0x6   : > { %292 = sbr.rel (%p289_p2) target bundleno = 829 (0x33d), region = 44 }
   0xd   : > { %p344_p3 = scmp.lt.s32.totalorder %s3041_s25, 1  ;;  %s3703_s13 = smov 126  }
   0xe   : > { %s3704_s14 = smov 127   ;;  %s3705_s15 = smov 125  }
   0xf   : > { %s6414_s25 = smov (!%p344_p3, %s3041_s25), 1  ;;  %s3706_s16 = smov 124  }
  0x10   : > { %s3761_s26 = smul.u32 24, %s6414_s25  ;;  %s3707_s17 = smov 123  }
  0x11   : > { %s3708_s18 = smov 122   ;;  %s3046_s19 = sshll.u32 %s6414_s25, 3 }
  0x12   : > { %s3767_s29 = scalar_lea.vmem %s6384_s3, %s3761_s26  ;;  %s3773_s9 = scalar_lea.vmem %s6385_s4, %s3761_s26 }
  0x13   : > { %v3776_v0 = vld [vmem:[%s3767_s29] sm:$0xff]  ;;  %v3780_v2 = vld [vmem:[%s3767_s29 + $0x8] sm:$0xff]  ;;  %v3866_v42 = vld [vmem:[%s3767_s29 + $0x10] sm:$0x3f]  ;;  %s3950_s12 = scalar_lea.vmem %s6383_s2, %s3761_s26  ;;  %s347_s22 = scalar_lea.vmem %s6381_s0, %s3046_s19 }
  0x14   : > { %v402_v1 = vld [vmem:[%s3773_s9] sm:$0xff]  ;;  %v3053_v3 = vadd.f32 3.0, %v3776_v0  ;;  %v403_v6 = vld [vmem:[%s3773_s9 + $0x8] sm:$0xff]  ;;  %v3054_v7 = vadd.f32 3.0, %v3780_v2  ;;  %v3869_v43 = vadd.f32 2.0, %v3780_v2  ;;  %v3894_v57 = vadd.f32 2.0, %v3866_v42  ;;  %s351_s27 = scalar_lea.vmem %s6382_s1, %s3046_s19  ;;  %s377_s11 = scalar_lea.vmem %s6388_s7, %s6414_s25 }
  0x15   : > { %v3059_v4 = vadd.f32 1.0, %v402_v1  ;;  %v3057_v5 = vadd.f32 2.0, %v402_v1  ;;  %v3060_v8 = vadd.f32 1.0, %v403_v6  ;;  %v3058_v9 = vadd.f32 2.0, %v403_v6  ;;  %s3092_s28 = sshll.u32 %s6414_s25, 4 }
  0x16   : > { %v3785_v10 = vmul.f32 %v403_v6, %v403_v6  ;;  %v3787_v11 = vmul.f32 %v3053_v3, %v3053_v3  ;;  %v3793_v14 = vmul.f32 %v3054_v7, %v3054_v7  ;;  %v3799_v17 = vmul.f32 %v402_v1, %v402_v1  ;;  %s371_s8 = scalar_lea.vmem %s6386_s5, %s3092_s28 }
  0x17   : > { %v3789_v12 = vmul.f32 %v3059_v4, %v3059_v4  ;;  %v3791_v13 = vmul.f32 %v3057_v5, %v3057_v5  ;;  %v3795_v15 = vmul.f32 %v3060_v8, %v3060_v8  ;;  %v3797_v16 = vmul.f32 %v3058_v9, %v3058_v9 }
  0x18   : > { %v3062_v20 = vadd.f32 -1.0, %v403_v6  ;;  %v3061_v21 = vadd.f32 -1.0, %v402_v1  ;;  %v3820_v24 = vadd.f32 %v3785_v10, %v3793_v14  ;;  %v3825_v25 = vadd.f32 %v3799_v17, %v3787_v11 }
  0x19   : > { %v3803_v18 = vadd.f32 %v3789_v12, %v3787_v11  ;;  %v3807_v19 = vadd.f32 %v3791_v13, %v3787_v11  ;;  %v3811_v22 = vadd.f32 %v3795_v15, %v3793_v14  ;;  %v3815_v23 = vadd.f32 %v3797_v16, %v3793_v14 }
  0x1a   : > { %v3828_v26 = vmul.f32 %v3062_v20, %v3062_v20  ;;  %v3830_v27 = vmul.f32 %v3061_v21, %v3061_v21  ;;  %v3064_v33 = vadd.f32 -2.0, %v403_v6  ;;  %vm502_vm8 = vcmp.eq.f32.partialorder %v3820_v24, inf }
  0x1b   : > { %3113 = vrsqrt.f32 %v3803_v18  ;;  %vm481_vm0 = vcmp.eq.f32.partialorder %v3803_v18, inf  ;;  %vm483_vm1 = vcmp.eq.f32.partialorder %v3803_v18, 0.0  ;;  %v484_v28 = vand.u32 2147483648, %v3803_v18 }
  0x1c   : > { %3115 = vrsqrt.f32 %v3807_v19  ;;  %vm467_vm2 = vcmp.eq.f32.partialorder %v3807_v19, inf  ;;  %vm469_vm3 = vcmp.eq.f32.partialorder %v3807_v19, 0.0  ;;  %v470_v29 = vand.u32 2147483648, %v3807_v19 }
  0x1d   : > { %3117 = vrsqrt.f32 %v3811_v22  ;;  %vm488_vm4 = vcmp.eq.f32.partialorder %v3811_v22, inf  ;;  %vm490_vm5 = vcmp.eq.f32.partialorder %v3811_v22, 0.0  ;;  %v491_v30 = vand.u32 2147483648, %v3811_v22 }
  0x1e   : > { %3119 = vrsqrt.f32 %v3815_v23  ;;  %v3846_v31 = vadd.f32 %v3828_v26, %v3793_v14  ;;  %v3850_v32 = vadd.f32 %v3830_v27, %v3787_v11  ;;  %vm474_vm6 = vcmp.eq.f32.partialorder %v3815_v23, inf }
  0x1f   : > { %3121 = vrsqrt.f32 %v3820_v24  ;;  %vm476_vm7 = vcmp.eq.f32.partialorder %v3815_v23, 0.0  ;;  %v477_v34 = vand.u32 2147483648, %v3815_v23  ;;  %vm504_vm9 = vcmp.eq.f32.partialorder %v3820_v24, 0.0 }
  0x20   : > { %3123 = vrsqrt.f32 %v3825_v25  ;;  %v3063_v35 = vadd.f32 -2.0, %v402_v1  ;;  %v3066_v36 = vadd.f32 -3.0, %v403_v6  ;;  %v505_v37 = vand.u32 2147483648, %v3820_v24 }
  0x21   : > { %3125 = vrsqrt.f32 %v3846_v31  ;;  %vm495_vm10 = vcmp.eq.f32.partialorder %v3825_v25, inf  ;;  %v3065_v38 = vadd.f32 -3.0, %v402_v1  ;;  %vm497_vm11 = vcmp.eq.f32.partialorder %v3825_v25, 0.0 }
  0x22   : > { %3127 = vrsqrt.f32 %v3850_v32  ;;  %v498_v40 = vand.u32 2147483648, %v3825_v25  ;;  %v3863_v41 = vmul.f32 %v3064_v33, %v3064_v33  ;;  %vm516_vm12 = vcmp.eq.f32.partialorder %v3846_v31, inf }
  0x23   : > { %v519_v46 = vand.u32 2147483648, %v3846_v31  ;;  %v512_v47 = vand.u32 2147483648, %v3850_v32  ;;  %vm518_vm13 = vcmp.eq.f32.partialorder %v3846_v31, 0.0  ;;  %vm509_vm14 = vcmp.eq.f32.partialorder %v3850_v32, inf }
  0x24   : > { %v3880_v50 = vadd.f32 %v3863_v41, %v3793_v14  ;;  %v3882_v51 = vmul.f32 %v3063_v35, %v3063_v35  ;;  %v3884_v52 = vmul.f32 %v3066_v36, %v3066_v36  ;;  %vm511_vm15 = vcmp.eq.f32.partialorder %v3850_v32, 0.0 }
  0x25   : > { %v3114_v39 = vpop.eup %3113  ;;  %v3891_v56 = vmul.f32 %v3065_v38, %v3065_v38 }
  0x26   : > { %v3116_v44 = vpop.eup %3115  ;;  %v480_v45 = vmul.f32 %v3114_v39, %v3803_v18  ;;  %3129 = vrsqrt.f32 %v3880_v50 }
  0x27   : > { %v3118_v48 = vpop.eup %3117  ;;  %v466_v49 = vmul.f32 %v3116_v44, %v3807_v19  ;;  %v3931_v44 = vadd.f32 %v3882_v51, %v3787_v11 }
  0x28   : > { %v3120_v53 = vpop.eup %3119  ;;  %v482_v54 = vsel %vm481_vm0, %v3803_v18, %v480_v45  ;;  %v487_v55 = vmul.f32 %v3118_v48, %v3811_v22  ;;  %vm530_vm0 = vcmp.eq.f32.partialorder %v3880_v50, inf }
  0x29   : > { %v3122_v58 = vpop.eup %3121  ;;  %v485_v59 = vsel %vm483_vm1, %v484_v28, %v482_v54  ;;  %v468_v60 = vsel %vm467_vm2, %v3807_v19, %v466_v49  ;;  %v473_v61 = vmul.f32 %v3120_v53, %v3815_v23  ;;  %vm532_vm1 = vcmp.eq.f32.partialorder %v3880_v50, 0.0 }
  0x2a   : > { %v3124_v62 = vpop.eup %3123  ;;  %v553_v63 = vmul.f32 -4.0, %v485_v59  ;;  %v471_v1 = vsel %vm469_vm3, %v470_v29, %v468_v60  ;;  %v489_v3 = vsel %vm488_vm4, %v3811_v22, %v487_v55  ;;  %v501_v4 = vmul.f32 %v3122_v58, %v3820_v24 }
  0x2b   : > { %v551_v5 = vmul.f32 -4.0, %v471_v1  ;;  %v492_v6 = vsel %vm490_vm5, %v491_v30, %v489_v3  ;;  %v475_v7 = vsel %vm474_vm6, %v3815_v23, %v473_v61  ;;  %v494_v8 = vmul.f32 %v3124_v62, %v3825_v25  ;;  %v3126_v21 = vpop.eup %3125 }
  0x2c   : > { %v571_v9 = vmul.f32 1.442695, %v553_v63  ;;  %v554_v18 = vmul.f32 -4.0, %v492_v6  ;;  %v478_v19 = vsel %vm476_vm7, %v477_v34, %v475_v7  ;;  %v503_v20 = vsel %vm502_vm8, %v3820_v24, %v501_v4  ;;  %v3128_v33 = vpop.eup %3127  ;;  %v3977_v63 = vld [vmem:[%s3773_s9 + $0x10] sm:$0x3f] }
  0x2d   : > { %v567_v28 = vmul.f32 1.442695, %v551_v5  ;;  %v552_v29 = vmul.f32 -4.0, %v478_v19  ;;  %v506_v22 = vsel %vm504_vm9, %v505_v37, %v503_v20  ;;  %v496_v30 = vsel %vm495_vm10, %v3825_v25, %v494_v8  ;;  %v3986_v5 = vld [vmem:[%s3950_s12 + $0x8] sm:$0xff] }
  0x2e   : > { %3131 = vpow2.f32 %v571_v9  ;;  %v573_v35 = vmul.f32 1.442695, %v554_v18  ;;  %v556_v36 = vmul.f32 -4.0, %v506_v22  ;;  %v499_v23 = vsel %vm497_vm11, %v498_v40, %v496_v30 }
  0x2f   : > { %3133 = vpow2.f32 %v567_v28  ;;  %v569_v34 = vmul.f32 1.442695, %v552_v29  ;;  %v555_v38 = vmul.f32 -4.0, %v499_v23  ;;  %v515_v39 = vmul.f32 %v3126_v21, %v3846_v31 }
  0x30   : > { %3135 = vpow2.f32 %v573_v35  ;;  %v577_v24 = vmul.f32 1.442695, %v556_v36  ;;  %v508_v37 = vmul.f32 %v3128_v33, %v3850_v32  ;;  %v3938_v40 = vadd.f32 %v3884_v52, %v3793_v14  ;;  %v3130_v53 = vpop.eup %3129 }
  0x31   : > { %3137 = vpow2.f32 %v569_v34  ;;  %v575_v45 = vmul.f32 1.442695, %v555_v38  ;;  %v517_v25 = vsel %vm516_vm12, %v3846_v31, %v515_v39  ;;  %v529_v58 = vmul.f32 %v3130_v53, %v3880_v50 }
  0x32   : > { %3139 = vpow2.f32 %v577_v24  ;;  %v520_v48 = vsel %vm518_vm13, %v519_v46, %v517_v25  ;;  %v510_v49 = vsel %vm509_vm14, %v3850_v32, %v508_v37  ;;  %v533_v46 = vand.u32 2147483648, %v3880_v50 }
  0x33   : > { %3141 = vpow2.f32 %v575_v45  ;;  %v558_v54 = vmul.f32 -4.0, %v520_v48  ;;  %v513_v31 = vsel %vm511_vm15, %v512_v47, %v510_v49  ;;  %v3963_v60 = vadd.f32 %v3891_v56, %v3787_v11  ;;  %v3970_v47 = vld [vmem:[%s3950_s12] sm:$0xff] }
  0x34   : > { %v557_v55 = vmul.f32 -4.0, %v513_v31  ;;  %3143 = vrsqrt.f32 %v3931_v44  ;;  %v3967_v32 = vmul.f32 %v3869_v43, %v3869_v43  ;;  %v531_v62 = vsel %vm530_vm0, %v3880_v50, %v529_v58 }
  0x35   : > { %v581_v59 = vmul.f32 1.442695, %v558_v54  ;;  %3145 = vrsqrt.f32 %v3938_v40  ;;  %vm523_vm2 = vcmp.eq.f32.partialorder %v3931_v44, inf  ;;  %v3981_v1 = vmul.f32 %v3894_v57, %v3894_v57 }
  0x36   : > { %v579_v61 = vmul.f32 1.442695, %v557_v55  ;;  %v534_v3 = vsel %vm532_vm1, %v533_v46, %v531_v62  ;;  %vm525_vm3 = vcmp.eq.f32.partialorder %v3931_v44, 0.0  ;;  %v526_v43 = vand.u32 2147483648, %v3931_v44 }
  0x37   : > { %3147 = vpow2.f32 %v581_v59  ;;  %v560_v6 = vmul.f32 -4.0, %v534_v3  ;;  %vm544_vm4 = vcmp.eq.f32.partialorder %v3938_v40, inf  ;;  %vm546_vm5 = vcmp.eq.f32.partialorder %v3938_v40, 0.0 }
  0x38   : > { %v3132_v4 = vpop.eup %3131  ;;  %3149 = vpow2.f32 %v579_v61  ;;  %v3071_v57 = vadd.f32 2.0, %v3977_v63  ;;  %v3995_v8 = vadd.f32 %v3967_v32, %v3797_v16  ;;  %v3067_v20 = vadd.f32 2.0, %v3776_v0 }
  0x39   : > { %v3134_v50 = vpop.eup %3133  ;;  %v595_v7 = vmul.f32 %v3132_v4, %v3970_v47  ;;  %3151 = vrsqrt.f32 %v3963_v60  ;;  %v585_v19 = vmul.f32 1.442695, %v560_v6  ;;  %v3072_v21 = vadd.f32 1.0, %v3977_v63 }
  0x3a   : > { %v3136_v9 = vpop.eup %3135  ;;  %v593_v18 = vmul.f32 %v3134_v50, %v3970_v47  ;;  %v547_v22 = vand.u32 2147483648, %v3938_v40  ;;  %v4003_v30 = vmul.f32 %v3071_v57, %v3071_v57  ;;  %3153 = vrsqrt.f32 %v3995_v8 }
  0x3b   : > { %v3138_v28 = vpop.eup %3137  ;;  %619 = vrot.lane.b32.xlu1 %v595_v7, %s3703_s13  ;;  %v596_v29 = vmul.f32 %v3136_v9, %v3986_v5  ;;  %3155 = vpow2.f32 %v585_v19  ;;  %vm537_vm6 = vcmp.eq.f32.partialorder %v3963_v60, inf  ;;  %vm539_vm7 = vcmp.eq.f32.partialorder %v3963_v60, 0.0 }
  0x3c   : > { %v3140_v33 = vpop.eup %3139  ;;  %609 = vrot.lane.b32.xlu0 %v593_v18, %s3704_s14  ;;  %v594_v35 = vmul.f32 %v3138_v28, %v3986_v5  ;;  %v540_v23 = vand.u32 2147483648, %v3963_v60  ;;  %v4013_v34 = vadd.f32 %v4003_v30, %v3981_v1  ;;  %v4015_v38 = vmul.f32 %v3067_v20, %v3067_v20 }
  0x3d   : > { %v3142_v36 = vpop.eup %3141  ;;  %v4017_v39 = vmul.f32 %v3072_v21, %v3072_v21  ;;  %vm737_vm8 = vcmp.eq.f32.partialorder %v3995_v8, inf  ;;  %vm739_vm9 = vcmp.eq.f32.partialorder %v3995_v8, 0.0  ;;  %v740_v37 = vand.u32 2147483648, %v3995_v8 }
  0x3e   : > { %v3144_v24 = vpop.eup %3143  ;;  %v4024_v45 = vadd.f32 %v3967_v32, %v3795_v15  ;;  %v598_v48 = vmul.f32 %v3140_v33, %v3986_v5  ;;  %v597_v49 = vmul.f32 %v3142_v36, %v3970_v47  ;;  %3157 = vrsqrt.f32 %v4013_v34 }
  0x3f   : > { %v3146_v25 = vpop.eup %3145  ;;  %621 = vrot.lane.b32.xlu1 %v596_v29, %s3703_s13  ;;  %v522_v53 = vmul.f32 %v3144_v24, %v3931_v44  ;;  %v4035_v31 = vadd.f32 %v4015_v38, %v3791_v13  ;;  %v4039_v46 = vmul.f32 %v3977_v63, %v3977_v63  ;;  %v4043_v55 = vadd.f32 %v3967_v32, %v3785_v10 }
  0x40   : > { %611 = vrot.lane.b32.xlu0 %v594_v35, %s3704_s14  ;;  %v543_v54 = vmul.f32 %v3146_v25, %v3938_v40  ;;  %vm744_vm10 = vcmp.eq.f32.partialorder %v4013_v34, inf  ;;  %v4051_v61 = vadd.f32 %v4017_v39, %v3981_v1  ;;  %3159 = vrsqrt.f32 %v4024_v45 }
  0x41   : > { %v3148_v58 = vpop.eup %3147  ;;  %v524_v59 = vsel %vm523_vm2, %v3931_v44, %v522_v53  ;;  %vm746_vm11 = vcmp.eq.f32.partialorder %v4013_v34, 0.0  ;;  %3161 = vrsqrt.f32 %v4035_v31  ;;  %v747_v44 = vand.u32 2147483648, %v4013_v34 }
  0x42   : > { %v3150_v62 = vpop.eup %3149  ;;  %v527_v3 = vsel %vm525_vm3, %v526_v43, %v524_v59  ;;  %v545_v4 = vsel %vm544_vm4, %v3938_v40, %v543_v54  ;;  %v600_v50 = vmul.f32 %v3148_v58, %v3986_v5  ;;  %vm758_vm12 = vcmp.eq.f32.partialorder %v4024_v45, inf }
  0x43   : > { %v3152_v6 = vpop.eup %3151  ;;  %631 = vrot.lane.b32.xlu1 %v598_v48, %s3705_s15  ;;  %v559_v7 = vmul.f32 -4.0, %v527_v3  ;;  %v548_v57 = vsel %vm546_vm5, %v547_v22, %v545_v4  ;;  %v599_v43 = vmul.f32 %v3150_v62, %v3970_v47  ;;  %vm730_vm13 = vcmp.eq.f32.partialorder %v4035_v31, inf }
  0x44   : > { %629 = vrot.lane.b32.xlu0 %v597_v49, %s3705_s15  ;;  %v562_v9 = vmul.f32 -4.0, %v548_v57  ;;  %v536_v18 = vmul.f32 %v3152_v6, %v3963_v60  ;;  %v3154_v19 = vpop.eup %3153  ;;  %vm760_vm14 = vcmp.eq.f32.partialorder %v4024_v45, 0.0  ;;  %3163 = vrsqrt.f32 %v4051_v61 }
  0x45   : > { %v583_v20 = vmul.f32 1.442695, %v559_v7  ;;  %v3156_v40 = vpop.eup %3155  ;;  %v736_v29 = vmul.f32 %v3154_v19, %v3995_v8  ;;  %vm732_vm15 = vcmp.eq.f32.partialorder %v4035_v31, 0.0  ;;  %v733_v35 = vand.u32 2147483648, %v4035_v31 }
  0x46   : > { %v589_v21 = vmul.f32 1.442695, %v562_v9  ;;  %v538_v28 = vsel %vm537_vm6, %v3963_v60, %v536_v18  ;;  %v602_v22 = vmul.f32 %v3156_v40, %v3986_v5  ;;  %v4089_v25 = vadd.f32 %v4015_v38, %v3789_v12 }
  0x47   : > { %641 = vrot.lane.b32.xlu1 %v600_v50, %s3706_s16  ;;  %3165 = vpow2.f32 %v583_v20  ;;  %v541_v33 = vsel %vm539_vm7, %v540_v23, %v538_v28  ;;  %v738_v24 = vsel %vm737_vm8, %v3995_v8, %v736_v29  ;;  %v761_v60 = vand.u32 2147483648, %v4024_v45 }
  0x48   : > { %639 = vrot.lane.b32.xlu0 %v599_v43, %s3706_s16  ;;  %3167 = vpow2.f32 %v589_v21  ;;  %v561_v36 = vmul.f32 -4.0, %v541_v33  ;;  %v3158_v48 = vpop.eup %3157  ;;  %v741_v49 = vsel %vm739_vm9, %v740_v37, %v738_v24  ;;  %v4096_v23 = vadd.f32 %v4039_v46, %v3981_v1 }
  0x49   : > { %3169 = vrsqrt.f32 %v4043_v55  ;;  %v743_v54 = vmul.f32 %v3158_v48, %v4013_v34  ;;  %v858_v58 = vmul.f32 -4.0, %v741_v49  ;;  %vm765_vm0 = vcmp.eq.f32.partialorder %v4051_v61, inf }
  0x4a   : > { %v587_v53 = vmul.f32 1.442695, %v561_v36  ;;  %3171 = vrsqrt.f32 %v4089_v25  ;;  %v3160_v59 = vpop.eup %3159  ;;  %vm767_vm1 = vcmp.eq.f32.partialorder %v4051_v61, 0.0  ;;  %v768_v8 = vand.u32 2147483648, %v4051_v61 }
  0x4b   : > { %651 = vrot.lane.b32.xlu1 %v602_v22, %s3707_s17  ;;  %vm779_vm2 = vcmp.eq.f32.partialorder %v4043_v55, inf  ;;  %v3162_v37 = vpop.eup %3161  ;;  %v745_v62 = vsel %vm744_vm10, %v4013_v34, %v743_v54  ;;  %v883_v3 = vmul.f32 1.442695, %v858_v58  ;;  %v757_v4 = vmul.f32 %v3160_v59, %v4024_v45 }
  0x4c   : > { %3173 = vpow2.f32 %v587_v53  ;;  %v748_v6 = vsel %vm746_vm11, %v747_v44, %v745_v62  ;;  %v729_v50 = vmul.f32 %v3162_v37, %v4035_v31  ;;  %vm751_vm3 = vcmp.eq.f32.partialorder %v4089_v25, inf }
  0x4d   : > { %3175 = vrsqrt.f32 %v4096_v23  ;;  %v859_v7 = vmul.f32 -4.0, %v748_v6  ;;  %v759_v57 = vsel %vm758_vm12, %v4024_v45, %v757_v4  ;;  %vm753_vm4 = vcmp.eq.f32.partialorder %v4089_v25, 0.0 }
  0x4e   : > { %3177 = vpow2.f32 %v883_v3  ;;  %v3164_v43 = vpop.eup %3163  ;;  %v731_v34 = vsel %vm730_vm13, %v4035_v31, %v729_v50  ;;  %v762_v44 = vsel %vm760_vm14, %v761_v60, %v759_v57  ;;  %v754_v9 = vand.u32 2147483648, %v4089_v25 }
  0x4f   : > { %v782_v18 = vand.u32 2147483648, %v4043_v55  ;;  %v885_v19 = vmul.f32 1.442695, %v859_v7  ;;  %v734_v20 = vsel %vm732_vm15, %v733_v35, %v731_v34  ;;  %v764_v40 = vmul.f32 %v3164_v43, %v4051_v61 }
  0x50   : > { %v861_v21 = vmul.f32 -4.0, %v762_v44  ;;  %v857_v29 = vmul.f32 -4.0, %v734_v20  ;;  %v4131_v22 = vadd.f32 %v4015_v38, %v3799_v17  ;;  %v3073_v45 = vadd.f32 -1.0, %v3977_v63 }
  0x51   : > { %v3166_v28 = vpop.eup %3165  ;;  %v4136_v33 = vadd.f32 %v3967_v32, %v3828_v26  ;;  %3179 = vpow2.f32 %v885_v19  ;;  %v766_v31 = vsel %vm765_vm0, %v4051_v61, %v764_v40  ;;  %vm781_vm5 = vcmp.eq.f32.partialorder %v4043_v55, 0.0 }
  0x52   : > { %v3168_v36 = vpop.eup %3167  ;;  %v601_v24 = vmul.f32 %v3166_v28, %v3970_v47  ;;  %v889_v35 = vmul.f32 1.442695, %v861_v21  ;;  %v881_v60 = vmul.f32 1.442695, %v857_v29  ;;  %v769_v53 = vsel %vm767_vm1, %v768_v8, %v766_v31 }
  0x53   : > { %v3170_v48 = vpop.eup %3169  ;;  %v604_v49 = vmul.f32 %v3168_v36, %v3986_v5  ;;  %3181 = vrsqrt.f32 %v4131_v22  ;;  %v862_v58 = vmul.f32 -4.0, %v769_v53  ;;  %vm786_vm6 = vcmp.eq.f32.partialorder %v4096_v23, inf }
  0x54   : > { %v3172_v54 = vpop.eup %3171  ;;  %649 = vrot.lane.b32.xlu0 %v601_v24, %s3707_s17  ;;  %3183 = vpow2.f32 %v889_v35  ;;  %v778_v59 = vmul.f32 %v3170_v48, %v4043_v55  ;;  %vm788_vm7 = vcmp.eq.f32.partialorder %v4096_v23, 0.0  ;;  %v4156_v3 = vmul.f32 %v3073_v45, %v3073_v45 }
  0x55   : > { %661 = vrot.lane.b32.xlu1 %v604_v49, %s3708_s18  ;;  %3185 = vpow2.f32 %v881_v60  ;;  %v750_v37 = vmul.f32 %v3172_v54, %v4089_v25  ;;  %v891_v8 = vmul.f32 1.442695, %v862_v58  ;;  %v789_v57 = vand.u32 2147483648, %v4096_v23 }
  0x56   : > { %v3174_v61 = vpop.eup %3173  ;;  %v780_v62 = vsel %vm779_vm2, %v4043_v55, %v778_v59  ;;  %3187 = vrsqrt.f32 %v4136_v33  ;;  %v4171_v40 = vadd.f32 %v4156_v3, %v3981_v1  ;;  %vm941_vm8 = vcmask 1046528  }
  0x57   : > { %v3176_v4 = vpop.eup %3175  ;;  %v603_v6 = vmul.f32 %v3174_v61, %v3970_v47  ;;  %v752_v50 = vsel %vm751_vm3, %v4089_v25, %v750_v37  ;;  %v783_v7 = vsel %vm781_vm5, %v782_v18, %v780_v62  ;;  %3189 = vpow2.f32 %v891_v8  ;;  %v4174_v18 = vld [vmem:[%s3950_s12 + $0x10] sm:$0x3f] }
  0x58   : > { %v3178_v43 = vpop.eup %3177  ;;  %v755_v55 = vsel %vm753_vm4, %v754_v9, %v752_v50  ;;  %v785_v34 = vmul.f32 %v3176_v4, %v4096_v23  ;;  %v864_v44 = vmul.f32 -4.0, %v783_v7  ;;  %v4181_v21 = vadd.f32 %v4015_v38, %v3830_v27 }
  0x59   : > { %659 = vrot.lane.b32.xlu0 %v603_v6, %s3708_s18  ;;  %v921_v19 = vmul.f32 %v3178_v43, %v3986_v5  ;;  %v860_v20 = vmul.f32 -4.0, %v755_v55  ;;  %vm772_vm9 = vcmp.eq.f32.partialorder %v4131_v22, inf  ;;  %3191 = vrsqrt.f32 %v4171_v40 }
  0x5a   : > { %v787_v25 = vsel %vm786_vm6, %v4096_v23, %v785_v34  ;;  %v895_v9 = vmul.f32 1.442695, %v864_v44  ;;  %vm774_vm10 = vcmp.eq.f32.partialorder %v4131_v22, 0.0  ;;  %v775_v24 = vand.u32 2147483648, %v4131_v22 }
  0x5b   : > { %v887_v28 = vmul.f32 1.442695, %v860_v20  ;;  %v790_v29 = vsel %vm788_vm7, %v789_v57, %v787_v25  ;;  %v3180_v45 = vpop.eup %3179  ;;  %v955_v48 = vrot.slane %v921_v19, 1  ;;  %vm800_vm11 = vcmp.eq.f32.partialorder %v4136_v33, inf }
  0x5c   : > { %v865_v36 = vmul.f32 -4.0, %v790_v29  ;;  %3193 = vpow2.f32 %v895_v9  ;;  %v922_v35 = vmul.f32 %v3180_v45, %v4174_v18  ;;  %vm802_vm12 = vcmp.eq.f32.partialorder %v4136_v33, 0.0 }
  0x5d   : > { %v3182_v31 = vpop.eup %3181  ;;  %3195 = vpow2.f32 %v887_v28  ;;  %v803_v59 = vand.u32 2147483648, %v4136_v33  ;;  %v3074_v37 = vadd.f32 -2.0, %v3977_v63  ;;  %v4205_v4 = vadd.f32 %v3967_v32, %v3863_v41 }
  0x5e   : > { %v3184_v23 = vpop.eup %3183  ;;  %v897_v49 = vmul.f32 1.442695, %v865_v36  ;;  %v771_v60 = vmul.f32 %v3182_v31, %v4131_v22  ;;  %3197 = vrsqrt.f32 %v4181_v21  ;;  %v957_v54 = vrot.slane %v922_v35, 1 }
  0x5f   : > { %v3186_v53 = vpop.eup %3185  ;;  %v4195_v58 = vmul.f32 %v3184_v23, %v3986_v5  ;;  %vm807_vm13 = vcmp.eq.f32.partialorder %v4171_v40, inf  ;;  %v4213_v34 = vmul.f32 %v3074_v37, %v3074_v37  ;;  %vm809_vm14 = vcmp.eq.f32.partialorder %v4171_v40, 0.0 }
  0x60   : > { %v3188_v61 = vpop.eup %3187  ;;  %v920_v8 = vmul.f32 %v3186_v53, %v3970_v47  ;;  %3199 = vpow2.f32 %v897_v49  ;;  %v773_v62 = vsel %vm772_vm9, %v4131_v22, %v771_v60  ;;  %v958_v6 = vsel %vm941_vm8, %v955_v48, %v957_v54 }
  0x61   : > { %v776_v50 = vsel %vm774_vm10, %v775_v24, %v773_v62  ;;  %v799_v7 = vmul.f32 %v3188_v61, %v4136_v33  ;;  %v3190_v57 = vpop.eup %3189  ;;  %961 = vrot.lane.b32.xlu1 %v958_v6, %s3704_s14  ;;  %3201 = vrsqrt.f32 %v4205_v4  ;;  %v971_v19 = vrot.slane %v4195_v58, 1 }
  0x62   : > { %v954_v43 = vrot.slane %v920_v8, 1  ;;  %v863_v55 = vmul.f32 -4.0, %v776_v50  ;;  %v925_v44 = vmul.f32 %v3190_v57, %v4174_v18  ;;  %v4227_v28 = vadd.f32 %v4213_v34, %v3981_v1 }
  0x63   : > { %v801_v22 = vsel %vm800_vm11, %v4136_v33, %v799_v7  ;;  %v3192_v29 = vpop.eup %3191  ;;  %v810_v36 = vand.u32 2147483648, %v4171_v40  ;;  %v4233_v31 = vadd.f32 %v4015_v38, %v3882_v51  ;;  %vm793_vm15 = vcmp.eq.f32.partialorder %v4181_v21, inf }
  0x64   : > { %v956_v20 = vsel %vm941_vm8, %v954_v43, %v955_v48  ;;  %v893_v25 = vmul.f32 1.442695, %v863_v55  ;;  %v804_v9 = vsel %vm802_vm12, %v803_v59, %v801_v22  ;;  %v973_v45 = vrot.slane %v925_v44, 1 }
  0x65   : > { %959 = vrot.lane.b32.xlu0 %v956_v20, %s3704_s14  ;;  %v867_v24 = vmul.f32 -4.0, %v804_v9  ;;  %v806_v33 = vmul.f32 %v3192_v29, %v4171_v40  ;;  %vm795_vm0 = vcmp.eq.f32.partialorder %v4181_v21, 0.0  ;;  %v796_v59 = vand.u32 2147483648, %v4181_v21 }
  0x66   : > { %v3194_v35 = vpop.eup %3193  ;;  %3203 = vpow2.f32 %v893_v25  ;;  %v974_v23 = vsel %vm941_vm8, %v971_v19, %v973_v45  ;;  %vm821_vm1 = vcmp.eq.f32.partialorder %v4205_v4, inf  ;;  %vm823_vm2 = vcmp.eq.f32.partialorder %v4205_v4, 0.0 }
  0x67   : > { %v3196_v48 = vpop.eup %3195  ;;  %v4240_v49 = vmul.f32 %v3194_v35, %v3986_v5  ;;  %v901_v60 = vmul.f32 1.442695, %v867_v24  ;;  %3205 = vrsqrt.f32 %v4227_v28  ;;  %977 = vrot.lane.b32.xlu1 %v974_v23, %s3703_s13  ;;  %v808_v58 = vsel %vm807_vm13, %v4171_v40, %v806_v33 }
  0x68   : > { %v3198_v53 = vpop.eup %3197  ;;  %v923_v54 = vmul.f32 %v3196_v48, %v3970_v47  ;;  %3207 = vrsqrt.f32 %v4233_v31  ;;  %v811_v37 = vsel %vm809_vm14, %v810_v36, %v808_v58  ;;  %v824_v50 = vand.u32 2147483648, %v4205_v4 }
  0x69   : > { %3209 = vpow2.f32 %v901_v60  ;;  %v792_v61 = vmul.f32 %v3198_v53, %v4181_v21  ;;  %v868_v6 = vmul.f32 -4.0, %v811_v37  ;;  %v987_v57 = vrot.slane %v4240_v49, 1 }
  0x6a   : > { %v3200_v8 = vpop.eup %3199  ;;  %v970_v62 = vrot.slane %v923_v54, 1  ;;  %v3075_v43 = vadd.f32 -3.0, %v3977_v63  ;;  %v4267_v25 = vadd.f32 %v3967_v32, %v3884_v52  ;;  %vm828_vm3 = vcmp.eq.f32.partialorder %v4227_v28, inf }
  0x6b   : > { %v928_v7 = vmul.f32 %v3200_v8, %v4174_v18  ;;  %v794_v40 = vsel %vm793_vm15, %v4181_v21, %v792_v61  ;;  %v3202_v55 = vpop.eup %3201  ;;  %v903_v22 = vmul.f32 1.442695, %v868_v6  ;;  %vm830_vm4 = vcmp.eq.f32.partialorder %v4227_v28, 0.0 }
  0x6c   : > { %v972_v44 = vsel %vm941_vm8, %v970_v62, %v971_v19  ;;  %v797_v20 = vsel %vm795_vm0, %v796_v59, %v794_v40  ;;  %v820_v45 = vmul.f32 %v3202_v55, %v4205_v4  ;;  %v4271_v36 = vmul.f32 %v3075_v43, %v3075_v43 }
  0x6d   : > { %975 = vrot.lane.b32.xlu0 %v972_v44, %s3703_s13  ;;  %v989_v9 = vrot.slane %v928_v7, 1  ;;  %v866_v29 = vmul.f32 -4.0, %v797_v20  ;;  %3211 = vpow2.f32 %v903_v22  ;;  %v831_v48 = vand.u32 2147483648, %v4227_v28 }
  0x6e   : > { %v822_v19 = vsel %vm821_vm1, %v4205_v4, %v820_v45  ;;  %v4281_v24 = vadd.f32 %v4271_v36, %v3981_v1  ;;  %3213 = vrsqrt.f32 %v4267_v25  ;;  %v4290_v23 = vadd.f32 %v4015_v38, %v3891_v56 }
  0x6f   : > { %v990_v63 = vsel %vm941_vm8, %v987_v57, %v989_v9  ;;  %v899_v21 = vmul.f32 1.442695, %v866_v29  ;;  %v825_v33 = vsel %vm823_vm2, %v824_v50, %v822_v19  ;;  %vm814_vm5 = vcmp.eq.f32.partialorder %v4233_v31, inf }
  0x70   : > { %v3204_v35 = vpop.eup %3203  ;;  %993 = vrot.lane.b32.xlu1 %v990_v63, %s3705_s15  ;;  %v870_v53 = vmul.f32 -4.0, %v825_v33  ;;  %vm816_vm6 = vcmp.eq.f32.partialorder %v4233_v31, 0.0  ;;  %v817_v4 = vand.u32 2147483648, %v4233_v31  ;;  %vm842_vm7 = vcmp.eq.f32.partialorder %v4267_v25, inf }
  0x71   : > { %v3206_v49 = vpop.eup %3205  ;;  %v926_v60 = vmul.f32 %v3204_v35, %v3970_v47  ;;  %3215 = vpow2.f32 %v899_v21  ;;  %vm844_vm9 = vcmp.eq.f32.partialorder %v4267_v25, 0.0  ;;  %v3076_v22 = vadd.f32 1.0, %v3776_v0 }
  0x72   : > { %v3208_v54 = vpop.eup %3207  ;;  %v827_v58 = vmul.f32 %v3206_v49, %v4227_v28  ;;  %3217 = vrsqrt.f32 %v4281_v24  ;;  %v907_v61 = vmul.f32 1.442695, %v870_v53  ;;  %v845_v45 = vand.u32 2147483648, %v4267_v25 }
  0x73   : > { %v3210_v59 = vpop.eup %3209  ;;  %v986_v37 = vrot.slane %v926_v60, 1  ;;  %v813_v8 = vmul.f32 %v3208_v54, %v4233_v31  ;;  %3219 = vrsqrt.f32 %v4290_v23  ;;  %vm849_vm10 = vcmp.eq.f32.partialorder %v4281_v24, inf }
  0x74   : > { %v930_v62 = vmul.f32 %v3210_v59, %v3986_v5  ;;  %v829_v6 = vsel %vm828_vm3, %v4227_v28, %v827_v58  ;;  %3221 = vpow2.f32 %v907_v61  ;;  %v3078_v28 = vadd.f32 1.0, %v3866_v42 }
  0x75   : > { %v988_v50 = vsel %vm941_vm8, %v986_v37, %v987_v57  ;;  %v832_v7 = vsel %vm830_vm4, %v831_v48, %v829_v6  ;;  %v815_v40 = vsel %vm814_vm5, %v4233_v31, %v813_v8  ;;  %v3077_v57 = vadd.f32 1.0, %v3780_v2 }
  0x76   : > { %991 = vrot.lane.b32.xlu0 %v988_v50, %s3705_s15  ;;  %v871_v43 = vmul.f32 -4.0, %v832_v7  ;;  %v818_v55 = vsel %vm816_vm6, %v817_v4, %v815_v40  ;;  %v1003_v9 = vrot.slane %v930_v62, 1  ;;  %v4323_v19 = vmul.f32 %v3078_v28, %v3078_v28 }
  0x77   : > { %v869_v44 = vmul.f32 -4.0, %v818_v55  ;;  %v3212_v20 = vpop.eup %3211  ;;  %v4321_v21 = vmul.f32 %v3077_v57, %v3077_v57  ;;  %vm851_vm11 = vcmp.eq.f32.partialorder %v4281_v24, 0.0  ;;  %v852_v0 = vand.u32 2147483648, %v4281_v24 }
  0x78   : > { %v909_v29 = vmul.f32 1.442695, %v871_v43  ;;  %v931_v31 = vmul.f32 %v3212_v20, %v4174_v18  ;;  %v3214_v35 = vpop.eup %3213  ;;  %v4327_v2 = vmul.f32 %v3076_v22, %v3076_v22  ;;  %vm835_vm12 = vcmp.eq.f32.partialorder %v4290_v23, inf }
  0x79   : > { %v905_v63 = vmul.f32 1.442695, %v869_v44  ;;  %v841_v49 = vmul.f32 %v3214_v35, %v4267_v25  ;;  %v4332_v60 = vadd.f32 %v4321_v21, %v3797_v16  ;;  %v838_v58 = vand.u32 2147483648, %v4290_v23 }
  0x7a   : > { %3223 = vpow2.f32 %v909_v29  ;;  %v1005_v48 = vrot.slane %v931_v31, 1  ;;  %v4339_v4 = vadd.f32 %v4323_v19, %v4003_v30  ;;  %vm837_vm13 = vcmp.eq.f32.partialorder %v4290_v23, 0.0  ;;  %v3673_v31 = vld [vmem:[%s3767_s29 + $0x8] sm:$0xff] }
  0x7b   : > { %v3216_v33 = vpop.eup %3215  ;;  %3225 = vpow2.f32 %v905_v63  ;;  %v843_v61 = vsel %vm842_vm7, %v4267_v25, %v841_v49  ;;  %v4357_v55 = vadd.f32 %v4327_v2, %v3791_v13  ;;  %v4373_v63 = vmul.f32 %v3673_v31, %v3673_v31 }
  0x7c   : > { %v3218_v53 = vpop.eup %3217  ;;  %v929_v54 = vmul.f32 %v3216_v33, %v3970_v47  ;;  %v1006_v37 = vsel %vm941_vm8, %v1003_v9, %v1005_v48  ;;  %3227 = vrsqrt.f32 %v4332_v60  ;;  %v846_v6 = vsel %vm844_vm9, %v845_v45, %v843_v61 }
  0x7d   : > { %v3220_v59 = vpop.eup %3219  ;;  %v848_v8 = vmul.f32 %v3218_v53, %v4281_v24  ;;  %1009 = vrot.lane.b32.xlu1 %v1006_v37, %s3706_s16  ;;  %v873_v43 = vmul.f32 -4.0, %v846_v6  ;;  %3229 = vrsqrt.f32 %v4339_v4  ;;  %vm1104_vm14 = vcmp.eq.f32.partialorder %v4332_v60, inf }
  0x7e   : > { %v1002_v62 = vrot.slane %v929_v54, 1  ;;  %v834_v50 = vmul.f32 %v3220_v59, %v4290_v23  ;;  %v3222_v7 = vpop.eup %3221  ;;  %vm1106_vm15 = vcmp.eq.f32.partialorder %v4332_v60, 0.0  ;;  %v1107_v48 = vand.u32 2147483648, %v4332_v60 }
  0x7f   : > { %v850_v40 = vsel %vm849_vm10, %v4281_v24, %v848_v8  ;;  %v933_v25 = vmul.f32 %v3222_v7, %v3986_v5  ;;  %v913_v20 = vmul.f32 1.442695, %v873_v43  ;;  %v4377_v24 = vmul.f32 %v3866_v42, %v3866_v42 }
  0x80   : > { %v1004_v44 = vsel %vm941_vm8, %v1002_v62, %v1003_v9  ;;  %v853_v57 = vsel %vm851_vm11, %v852_v0, %v850_v40  ;;  %v836_v28 = vsel %vm835_vm12, %v4290_v23, %v834_v50  ;;  %v4370_v9 = vadd.f32 %v4321_v21, %v3795_v15 }
  0x81   : > { %1007 = vrot.lane.b32.xlu0 %v1004_v44, %s3706_s16  ;;  %v874_v22 = vmul.f32 -4.0, %v853_v57  ;;  %v839_v29 = vsel %vm837_vm13, %v838_v58, %v836_v28  ;;  %3231 = vpow2.f32 %v913_v20  ;;  %v1019_v0 = vrot.slane %v933_v25, 1 }
  0x82   : > { %v872_v45 = vmul.f32 -4.0, %v839_v29  ;;  %3233 = vrsqrt.f32 %v4357_v55  ;;  %vm1111_vm0 = vcmp.eq.f32.partialorder %v4339_v4, inf  ;;  %v4387_v42 = vadd.f32 %v4323_v19, %v4017_v39 }
  0x83   : > { %v915_v23 = vmul.f32 1.442695, %v874_v22  ;;  %vm1113_vm1 = vcmp.eq.f32.partialorder %v4339_v4, 0.0  ;;  %v1114_v58 = vand.u32 2147483648, %v4339_v4  ;;  %vm1097_vm2 = vcmp.eq.f32.partialorder %v4357_v55, inf }
  0x84   : > { %v3224_v35 = vpop.eup %3223  ;;  %v911_v33 = vmul.f32 1.442695, %v872_v45  ;;  %vm1099_vm3 = vcmp.eq.f32.partialorder %v4357_v55, 0.0  ;;  %v1100_v62 = vand.u32 2147483648, %v4357_v55  ;;  %vm1125_vm4 = vcmp.eq.f32.partialorder %v4370_v9, inf }
  0x85   : > { %v3226_v49 = vpop.eup %3225  ;;  %v934_v53 = vmul.f32 %v3224_v35, %v4174_v18  ;;  %3235 = vpow2.f32 %v915_v23  ;;  %v4402_v50 = vadd.f32 %v4327_v2, %v3789_v12  ;;  %v4406_v7 = vadd.f32 %v4321_v21, %v3785_v10 }
  0x86   : > { %v932_v54 = vmul.f32 %v3226_v49, %v3970_v47  ;;  %3237 = vpow2.f32 %v911_v33  ;;  %v3228_v59 = vpop.eup %3227  ;;  %v4410_v40 = vadd.f32 %v4323_v19, %v4039_v46  ;;  %vm1127_vm5 = vcmp.eq.f32.partialorder %v4370_v9, 0.0 }
  0x87   : > { %v1021_v37 = vrot.slane %v934_v53, 1  ;;  %3239 = vrsqrt.f32 %v4370_v9  ;;  %v1103_v8 = vmul.f32 %v3228_v59, %v4332_v60  ;;  %v1128_v25 = vand.u32 2147483648, %v4370_v9  ;;  %v3230_v57 = vpop.eup %3229 }
  0x88   : > { %v1018_v61 = vrot.slane %v932_v54, 1  ;;  %3241 = vrsqrt.f32 %v4387_v42  ;;  %vm1132_vm6 = vcmp.eq.f32.partialorder %v4387_v42, inf  ;;  %vm1134_vm7 = vcmp.eq.f32.partialorder %v4387_v42, 0.0 }
  0x89   : > { %v1022_v6 = vsel %vm941_vm8, %v1019_v0, %v1021_v37  ;;  %v1105_v44 = vsel %vm1104_vm14, %v4332_v60, %v1103_v8  ;;  %v1135_v22 = vand.u32 2147483648, %v4387_v42  ;;  %3243 = vrsqrt.f32 %v4402_v50 }
  0x8a   : > { %1025 = vrot.lane.b32.xlu1 %v1022_v6, %s3707_s17  ;;  %v1020_v43 = vsel %vm941_vm8, %v1018_v61, %v1019_v0  ;;  %v1108_v28 = vsel %vm1106_vm15, %v1107_v48, %v1105_v44  ;;  %v1110_v20 = vmul.f32 %v3230_v57, %v4339_v4  ;;  %3245 = vrsqrt.f32 %v4406_v7 }
  0x8b   : > { %1023 = vrot.lane.b32.xlu0 %v1020_v43, %s3707_s17  ;;  %v1225_v29 = vmul.f32 -4.0, %v1108_v28  ;;  %v4430_v45 = vadd.f32 %v4327_v2, %v3799_v17  ;;  %v3232_v31 = vpop.eup %3231  ;;  %vm1118_vm9 = vcmp.eq.f32.partialorder %v4402_v50, inf  ;;  %v1121_v60 = vand.u32 2147483648, %v4402_v50 }
  0x8c   : > { %3247 = vrsqrt.f32 %v4410_v40  ;;  %v4437_v23 = vadd.f32 %v4321_v21, %v3828_v26  ;;  %v3234_v35 = vpop.eup %3233  ;;  %v936_v0 = vmul.f32 %v3232_v31, %v3986_v5  ;;  %v1112_v33 = vsel %vm1111_vm0, %v4339_v4, %v1110_v20 }
  0x8d   : > { %v1250_v48 = vmul.f32 1.442695, %v1225_v29  ;;  %vm1120_vm10 = vcmp.eq.f32.partialorder %v4402_v50, 0.0  ;;  %vm1146_vm11 = vcmp.eq.f32.partialorder %v4406_v7, inf  ;;  %v1115_v53 = vsel %vm1113_vm1, %v1114_v58, %v1112_v33 }
  0x8e   : > { %v1096_v54 = vmul.f32 %v3234_v35, %v4357_v55  ;;  %vm1148_vm12 = vcmp.eq.f32.partialorder %v4406_v7, 0.0  ;;  %v1149_v59 = vand.u32 2147483648, %v4406_v7  ;;  %v1035_v8 = vrot.slane %v936_v0, 1 }
  0x8f   : > { %v3236_v49 = vpop.eup %3235  ;;  %v1226_v6 = vmul.f32 -4.0, %v1115_v53  ;;  %3249 = vpow2.f32 %v1250_v48  ;;  %vm1153_vm13 = vcmp.eq.f32.partialorder %v4410_v40, inf  ;;  %vm1155_vm14 = vcmp.eq.f32.partialorder %v4410_v40, 0.0 }
  0x90   : > { %v3238_v37 = vpop.eup %3237  ;;  %v937_v61 = vmul.f32 %v3236_v49, %v4174_v18  ;;  %v1098_v4 = vsel %vm1097_vm2, %v4357_v55, %v1096_v54  ;;  %3251 = vrsqrt.f32 %v4430_v45  ;;  %v1156_v48 = vand.u32 2147483648, %v4410_v40 }
  0x91   : > { %v3240_v43 = vpop.eup %3239  ;;  %v935_v44 = vmul.f32 %v3238_v37, %v3970_v47  ;;  %v1252_v28 = vmul.f32 1.442695, %v1226_v6  ;;  %v1101_v20 = vsel %vm1099_vm3, %v1100_v62, %v1098_v4  ;;  %vm1139_vm15 = vcmp.eq.f32.partialorder %v4430_v45, inf }
  0x92   : > { %v3242_v58 = vpop.eup %3241  ;;  %v1037_v57 = vrot.slane %v937_v61, 1  ;;  %v1124_v29 = vmul.f32 %v3240_v43, %v4370_v9  ;;  %v1224_v35 = vmul.f32 -4.0, %v1101_v20  ;;  %vm382_vm0 = vcmask 1045504  }
  0x93   : > { %v1034_v31 = vrot.slane %v935_v44, 1  ;;  %v1131_v47 = vmul.f32 %v3242_v58, %v4387_v42  ;;  %3253 = vpow2.f32 %v1252_v28  ;;  %v3244_v49 = vpop.eup %3243  ;;  %v4493_v20 = vadd.f32 %v4323_v19, %v4156_v3 }
  0x94   : > { %v1038_v0 = vsel %vm941_vm8, %v1035_v8, %v1037_v57  ;;  %v1126_v33 = vsel %vm1125_vm4, %v4370_v9, %v1124_v29  ;;  %v1248_v62 = vmul.f32 1.442695, %v1224_v35  ;;  %v3246_v37 = vpop.eup %3245  ;;  %v1117_v43 = vmul.f32 %v3244_v49, %v4402_v50 }
  0x95   : > { %1041 = vrot.lane.b32.xlu1 %v1038_v0, %s3708_s18  ;;  %v1036_v55 = vsel %vm941_vm8, %v1034_v31, %v1035_v8  ;;  %v1129_v53 = vsel %vm1127_vm5, %v1128_v25, %v1126_v33  ;;  %v1133_v54 = vsel %vm1132_vm6, %v4387_v42, %v1131_v47  ;;  %v1145_v9 = vmul.f32 %v3246_v37, %v4406_v7 }
  0x96   : > { %1039 = vrot.lane.b32.xlu0 %v1036_v55, %s3708_s18  ;;  %v1136_v61 = vsel %vm1134_vm7, %v1135_v22, %v1133_v54  ;;  %v1228_v6 = vmul.f32 -4.0, %v1129_v53  ;;  %v3248_v8 = vpop.eup %3247  ;;  %3255 = vpow2.f32 %v1248_v62  ;;  %v1142_v25 = vand.u32 2147483648, %v4430_v45 }
  0x97   : > { %v1229_v44 = vmul.f32 -4.0, %v1136_v61  ;;  %v1119_v58 = vsel %vm1118_vm9, %v4402_v50, %v1117_v43  ;;  %v1152_v42 = vmul.f32 %v3248_v8, %v4410_v40  ;;  %3257 = vrsqrt.f32 %v4437_v23 }
  0x98   : > { %v1256_v4 = vmul.f32 1.442695, %v1228_v6  ;;  %v1122_v57 = vsel %vm1120_vm10, %v1121_v60, %v1119_v58  ;;  %v1147_v28 = vsel %vm1146_vm11, %v4406_v7, %v1145_v9  ;;  %vm1141_vm1 = vcmp.eq.f32.partialorder %v4430_v45, 0.0 }
  0x99   : > { %v1258_v22 = vmul.f32 1.442695, %v1229_v44  ;;  %v3250_v29 = vpop.eup %3249  ;;  %v1227_v31 = vmul.f32 -4.0, %v1122_v57  ;;  %v1150_v35 = vsel %vm1148_vm12, %v1149_v59, %v1147_v28  ;;  %v1154_v47 = vsel %vm1153_vm13, %v4410_v40, %v1152_v42 }
  0x9a   : > { %3259 = vpow2.f32 %v1256_v4  ;;  %v3252_v50 = vpop.eup %3251  ;;  %v1288_v60 = vmul.f32 %v3250_v29, %v3986_v5  ;;  %v1157_v0 = vsel %vm1155_vm14, %v1156_v48, %v1154_v47  ;;  %v1231_v33 = vmul.f32 -4.0, %v1150_v35 }
  0x9b   : > { %3261 = vpow2.f32 %v1258_v22  ;;  %v1254_v49 = vmul.f32 1.442695, %v1227_v31  ;;  %v1232_v55 = vmul.f32 -4.0, %v1157_v0  ;;  %v1138_v62 = vmul.f32 %v3252_v50, %v4430_v45  ;;  %v4553_v0 = vld [vmem:[%s3950_s12 + $0x8] sm:$0xff] }
  0x9c   : > { %v1262_v7 = vmul.f32 1.442695, %v1231_v33  ;;  %3263 = vrsqrt.f32 %v4493_v20  ;;  %v4508_v59 = vadd.f32 %v4373_v63, %v3797_v16  ;;  %v4512_v5 = vadd.f32 %v4377_v24, %v4003_v30 }
  0x9d   : > { %v3254_v40 = vpop.eup %3253  ;;  %3265 = vpow2.f32 %v1254_v49  ;;  %v1264_v48 = vmul.f32 1.442695, %v1232_v55  ;;  %v1140_v53 = vsel %vm1139_vm15, %v4430_v45, %v1138_v62  ;;  %vm1167_vm2 = vcmp.eq.f32.partialorder %v4437_v23, inf }
  0x9e   : > { %v1289_v54 = vmul.f32 %v3254_v40, %v4174_v18  ;;  %v1321_v37 = vrot.slane %v1288_v60, 2  ;;  %3267 = vpow2.f32 %v1262_v7  ;;  %v1143_v61 = vsel %vm1141_vm1, %v1142_v25, %v1140_v53  ;;  %v4531_v25 = vld [vmem:[%s3950_s12] sm:$0xff] }
  0x9f   : > { %3269 = vpow2.f32 %v1264_v48  ;;  %v1230_v6 = vmul.f32 -4.0, %v1143_v61  ;;  %vm1169_vm3 = vcmp.eq.f32.partialorder %v4437_v23, 0.0  ;;  %v4522_v43 = vadd.f32 %v4327_v2, %v3830_v27 }
  0xa0   : > { %v3256_v8 = vpop.eup %3255  ;;  %v1323_v44 = vrot.slane %v1289_v54, 2  ;;  %v1170_v45 = vand.u32 2147483648, %v4437_v23  ;;  %vm1174_vm4 = vcmp.eq.f32.partialorder %v4493_v20, inf  ;;  %v4528_v9 = vadd.f32 %v4321_v21, %v3863_v41 }
  0xa1   : > { %v3258_v4 = vpop.eup %3257  ;;  %v1287_v58 = vmul.f32 %v4531_v25, %v3256_v8  ;;  %v1260_v42 = vmul.f32 1.442695, %v1230_v6  ;;  %3271 = vrsqrt.f32 %v4522_v43  ;;  %v4537_v22 = vadd.f32 %v4323_v19, %v4213_v34 }
  0xa2   : > { %v1324_v57 = vsel %vm382_vm0, %v1321_v37, %v1323_v44  ;;  %v1166_v28 = vmul.f32 %v3258_v4, %v4437_v23  ;;  %vm1176_vm5 = vcmp.eq.f32.partialorder %v4493_v20, 0.0  ;;  %v1177_v29 = vand.u32 2147483648, %v4493_v20 }
  0xa3   : > { %1327 = vrot.lane.b32.xlu1 %v1324_v57, %s3704_s14  ;;  %v1320_v35 = vrot.slane %v1287_v58, 2  ;;  %3273 = vpow2.f32 %v1260_v42  ;;  %v4546_v47 = vadd.f32 %v4327_v2, %v3882_v51  ;;  %v4550_v50 = vadd.f32 %v4321_v21, %v3884_v52 }
  0xa4   : > { %v3260_v31 = vpop.eup %3259  ;;  %v1168_v49 = vsel %vm1167_vm2, %v4437_v23, %v1166_v28  ;;  %vm1160_vm6 = vcmp.eq.f32.partialorder %v4522_v43, inf  ;;  %3275 = vrsqrt.f32 %v4528_v9  ;;  %vm1162_vm7 = vcmp.eq.f32.partialorder %v4522_v43, 0.0 }
  0xa5   : > { %v3262_v60 = vpop.eup %3261  ;;  %v1291_v33 = vmul.f32 %v4553_v0, %v3260_v31  ;;  %v1322_v55 = vsel %vm382_vm0, %v1320_v35, %v1321_v37  ;;  %v1171_v7 = vsel %vm1169_vm3, %v1170_v45, %v1168_v49  ;;  %3277 = vrsqrt.f32 %v4537_v22 }
  0xa6   : > { %v1292_v62 = vmul.f32 %v3262_v60, %v4174_v18  ;;  %v3264_v40 = vpop.eup %3263  ;;  %1325 = vrot.lane.b32.xlu0 %v1322_v55, %s3704_s14  ;;  %v1234_v53 = vmul.f32 -4.0, %v1171_v7  ;;  %v1163_v54 = vand.u32 2147483648, %v4522_v43  ;;  %vm1188_vm9 = vcmp.eq.f32.partialorder %v4528_v9, inf }
  0xa7   : > { %v1337_v48 = vrot.slane %v1291_v33, 2  ;;  %v3266_v61 = vpop.eup %3265  ;;  %v1173_v37 = vmul.f32 %v3264_v40, %v4493_v20  ;;  %3279 = vrsqrt.f32 %v4546_v47  ;;  %vm1190_vm10 = vcmp.eq.f32.partialorder %v4528_v9, 0.0 }
  0xa8   : > { %v1339_v6 = vrot.slane %v1292_v62, 2  ;;  %v3268_v23 = vpop.eup %3267  ;;  %v1290_v8 = vmul.f32 %v4531_v25, %v3266_v61  ;;  %v1268_v44 = vmul.f32 1.442695, %v1234_v53  ;;  %v1191_v45 = vand.u32 2147483648, %v4528_v9 }
  0xa9   : > { %v3270_v4 = vpop.eup %3269  ;;  %v1294_v42 = vmul.f32 %v4553_v0, %v3268_v23  ;;  %v1175_v57 = vsel %vm1174_vm4, %v4493_v20, %v1173_v37  ;;  %vm1195_vm11 = vcmp.eq.f32.partialorder %v4537_v22, inf  ;;  %v4587_v55 = vadd.f32 %v4323_v19, %v4271_v36 }
  0xaa   : > { %v1340_v58 = vsel %vm382_vm0, %v1337_v48, %v1339_v6  ;;  %v1336_v28 = vrot.slane %v1290_v8, 2  ;;  %v1295_v31 = vmul.f32 %v3270_v4, %v4174_v18  ;;  %v1178_v35 = vsel %vm1176_vm5, %v1177_v29, %v1175_v57 }
  0xab   : > { %1343 = vrot.lane.b32.xlu1 %v1340_v58, %s3703_s13  ;;  %3281 = vpow2.f32 %v1268_v44  ;;  %v3272_v60 = vpop.eup %3271  ;;  %v1353_v33 = vrot.slane %v1294_v42, 2  ;;  %v1235_v49 = vmul.f32 -4.0, %v1178_v35  ;;  %vm1197_vm12 = vcmp.eq.f32.partialorder %v4537_v22, 0.0 }
  0xac   : > { %3283 = vrsqrt.f32 %v4550_v50  ;;  %v1338_v62 = vsel %vm382_vm0, %v1336_v28, %v1337_v48  ;;  %v1355_v7 = vrot.slane %v1295_v31, 2  ;;  %v1159_v40 = vmul.f32 %v3272_v60, %v4522_v43 }
  0xad   : > { %v3274_v53 = vpop.eup %3273  ;;  %1341 = vrot.lane.b32.xlu0 %v1338_v62, %s3703_s13  ;;  %v1270_v20 = vmul.f32 1.442695, %v1235_v49  ;;  %v1198_v29 = vand.u32 2147483648, %v4537_v22  ;;  %vm1181_vm13 = vcmp.eq.f32.partialorder %v4546_v47, inf  ;;  %3285 = vrsqrt.f32 %v4587_v55 }
  0xae   : > { %v3276_v61 = vpop.eup %3275  ;;  %v1356_v6 = vsel %vm382_vm0, %v1353_v33, %v1355_v7  ;;  %v1293_v48 = vmul.f32 %v4531_v25, %v3274_v53  ;;  %v1161_v37 = vsel %vm1160_vm6, %v4522_v43, %v1159_v40  ;;  %vm1183_vm14 = vcmp.eq.f32.partialorder %v4546_v47, 0.0 }
  0xaf   : > { %v3278_v23 = vpop.eup %3277  ;;  %1359 = vrot.lane.b32.xlu1 %v1356_v6, %s3705_s15  ;;  %3287 = vpow2.f32 %v1270_v20  ;;  %v1164_v8 = vsel %vm1162_vm7, %v1163_v54, %v1161_v37  ;;  %v1187_v44 = vmul.f32 %v3276_v61, %v4528_v9  ;;  %v1184_v4 = vand.u32 2147483648, %v4546_v47 }
  0xb0   : > { %v1352_v58 = vrot.slane %v1293_v48, 2  ;;  %v1233_v42 = vmul.f32 -4.0, %v1164_v8  ;;  %v1194_v57 = vmul.f32 %v3278_v23, %v4537_v22  ;;  %vm1209_vm15 = vcmp.eq.f32.partialorder %v4550_v50, inf }
  0xb1   : > { %v3280_v28 = vpop.eup %3279  ;;  %v1189_v31 = vsel %vm1188_vm9, %v4528_v9, %v1187_v44  ;;  %vm1211_vm1 = vcmp.eq.f32.partialorder %v4550_v50, 0.0  ;;  %v4616_v43 = vadd.f32 %v4327_v2, %v3891_v56  ;;  %3289 = vrsqrt.f32 %v4508_v59 }
  0xb2   : > { %v1354_v54 = vsel %vm382_vm0, %v1352_v58, %v1353_v33  ;;  %v1266_v35 = vmul.f32 1.442695, %v1233_v42  ;;  %v1192_v60 = vsel %vm1190_vm10, %v1191_v45, %v1189_v31  ;;  %v1196_v49 = vsel %vm1195_vm11, %v4537_v22, %v1194_v57 }
  0xb3   : > { %1357 = vrot.lane.b32.xlu0 %v1354_v54, %s3705_s15  ;;  %v1199_v62 = vsel %vm1197_vm12, %v1198_v29, %v1196_v49  ;;  %v1237_v7 = vmul.f32 -4.0, %v1192_v60  ;;  %v1180_v40 = vmul.f32 %v3280_v28, %v4546_v47  ;;  %3291 = vrsqrt.f32 %v4616_v43 }
  0xb4   : > { %3293 = vpow2.f32 %v1266_v35  ;;  %v1238_v33 = vmul.f32 -4.0, %v1199_v62  ;;  %v1212_v9 = vand.u32 2147483648, %v4550_v50  ;;  %vm1216_vm2 = vcmp.eq.f32.partialorder %v4587_v55, inf  ;;  %v4662_v62 = vld [vmem:[%s3767_s29] sm:$0xff] }
  0xb5   : > { %v3282_v53 = vpop.eup %3281  ;;  %v1274_v61 = vmul.f32 1.442695, %v1237_v7  ;;  %v1182_v22 = vsel %vm1181_vm13, %v4546_v47, %v1180_v40  ;;  %vm1218_vm3 = vcmp.eq.f32.partialorder %v4587_v55, 0.0  ;;  %v1219_v37 = vand.u32 2147483648, %v4587_v55 }
  0xb6   : > { %v3284_v45 = vpop.eup %3283  ;;  %v4633_v20 = vmul.f32 %v4553_v0, %v3282_v53  ;;  %v1276_v29 = vmul.f32 1.442695, %v1238_v33  ;;  %v1185_v6 = vsel %vm1183_vm14, %v1184_v4, %v1182_v22  ;;  %vm1202_vm4 = vcmp.eq.f32.partialorder %v4616_v43, inf }
  0xb7   : > { %v1208_v48 = vmul.f32 %v3284_v45, %v4550_v50  ;;  %v3286_v23 = vpop.eup %3285  ;;  %3295 = vpow2.f32 %v1274_v61  ;;  %v1236_v8 = vmul.f32 -4.0, %v1185_v6  ;;  %vm1467_vm5 = vcmp.eq.f32.partialorder %v4508_v59, inf }
  0xb8   : > { %3297 = vpow2.f32 %v1276_v29  ;;  %v1215_v47 = vmul.f32 %v3286_v23, %v4587_v55  ;;  %vm1204_vm6 = vcmp.eq.f32.partialorder %v4616_v43, 0.0  ;;  %v1369_v58 = vrot.slane %v4633_v20, 2 }
  0xb9   : > { %v1210_v44 = vsel %vm1209_vm15, %v4550_v50, %v1208_v48  ;;  %v3288_v4 = vpop.eup %3287  ;;  %v1272_v42 = vmul.f32 1.442695, %v1236_v8  ;;  %3299 = vrsqrt.f32 %v4512_v5  ;;  %v1470_v35 = vand.u32 2147483648, %v4508_v59 }
  0xba   : > { %v1213_v57 = vsel %vm1211_vm1, %v1212_v9, %v1210_v44  ;;  %v1298_v28 = vmul.f32 %v3288_v4, %v4174_v18  ;;  %v1217_v31 = vsel %vm1216_vm2, %v4587_v55, %v1215_v47  ;;  %v4666_v50 = vmul.f32 %v4662_v62, %v4662_v62 }
  0xbb   : > { %v1240_v54 = vmul.f32 -4.0, %v1213_v57  ;;  %v3290_v60 = vpop.eup %3289  ;;  %3301 = vpow2.f32 %v1272_v42  ;;  %v1220_v49 = vsel %vm1218_vm3, %v1219_v37, %v1217_v31  ;;  %v4670_v7 = vadd.f32 %v4373_v63, %v3795_v15 }
  0xbc   : > { %6393 = vst [vmem:[#allocation2_spill] sm:$0xff] %v4666_v50  ;;  %v1371_v40 = vrot.slane %v1298_v28, 2  ;;  %v1241_v53 = vmul.f32 -4.0, %v1220_v49  ;;  %v1466_v9 = vmul.f32 %v3290_v60, %v4508_v59  ;;  %v1205_v20 = vand.u32 2147483648, %v4616_v43 }
  0xbd   : > { %v1280_v33 = vmul.f32 1.442695, %v1240_v54  ;;  %v3292_v45 = vpop.eup %3291  ;;  %vm1469_vm7 = vcmp.eq.f32.partialorder %v4508_v59, 0.0  ;;  %v4677_v55 = vadd.f32 %v4666_v50, %v3791_v13  ;;  %3303 = vrsqrt.f32 %v4670_v7 }
  0xbe   : > { %v3294_v61 = vpop.eup %3293  ;;  %v1372_v22 = vsel %vm382_vm0, %v1369_v58, %v1371_v40  ;;  %v1282_v29 = vmul.f32 1.442695, %v1241_v53  ;;  %v1201_v6 = vmul.f32 %v3292_v45, %v4616_v43  ;;  %v1468_v37 = vsel %vm1467_vm5, %v4508_v59, %v1466_v9 }
  0xbf   : > { %3305 = vpow2.f32 %v1280_v33  ;;  %1375 = vrot.lane.b32.xlu1 %v1372_v22, %s3706_s16  ;;  %v1296_v48 = vmul.f32 %v4531_v25, %v3294_v61  ;;  %v4690_v23 = vadd.f32 %v4377_v24, %v4017_v39  ;;  %v1471_v44 = vsel %vm1469_vm7, %v1470_v35, %v1468_v37 }
  0xc0   : > { %3307 = vrsqrt.f32 %v4677_v55  ;;  %v1203_v8 = vsel %vm1202_vm4, %v4616_v43, %v1201_v6  ;;  %vm1474_vm9 = vcmp.eq.f32.partialorder %v4512_v5, inf  ;;  %vm1476_vm10 = vcmp.eq.f32.partialorder %v4512_v5, 0.0 }
  0xc1   : > { %3309 = vpow2.f32 %v1282_v29  ;;  %v3296_v47 = vpop.eup %3295  ;;  %v1368_v4 = vrot.slane %v1296_v48, 2  ;;  %v1206_v42 = vsel %vm1204_vm6, %v1205_v20, %v1203_v8  ;;  %v1588_v59 = vmul.f32 -4.0, %v1471_v44 }
  0xc2   : > { %v3298_v57 = vpop.eup %3297  ;;  %v1300_v28 = vmul.f32 %v4553_v0, %v3296_v47  ;;  %v1239_v31 = vmul.f32 -4.0, %v1206_v42  ;;  %v1477_v54 = vand.u32 2147483648, %v4512_v5  ;;  %vm1488_vm11 = vcmp.eq.f32.partialorder %v4670_v7, inf }
  0xc3   : > { %v3300_v60 = vpop.eup %3299  ;;  %v1370_v35 = vsel %vm382_vm0, %v1368_v4, %v1369_v58  ;;  %v1301_v49 = vmul.f32 %v3298_v57, %v4174_v18  ;;  %v1613_v40 = vmul.f32 1.442695, %v1588_v59  ;;  %3311 = vrsqrt.f32 %v4690_v23 }
  0xc4   : > { %1373 = vrot.lane.b32.xlu0 %v1370_v35, %s3706_s16  ;;  %v1385_v43 = vrot.slane %v1300_v28, 2  ;;  %v1278_v53 = vmul.f32 1.442695, %v1239_v31  ;;  %v1473_v33 = vmul.f32 %v3300_v60, %v4512_v5  ;;  %vm1460_vm12 = vcmp.eq.f32.partialorder %v4677_v55, inf  ;;  %v4743_v35 = vld [vmem:[%s3950_s12 + $0x10] sm:$0x3f] }
  0xc5   : > { %v3302_v9 = vpop.eup %3301  ;;  %v1387_v45 = vrot.slane %v1301_v49, 2  ;;  %3313 = vpow2.f32 %v1613_v40  ;;  %vm1462_vm13 = vcmp.eq.f32.partialorder %v4677_v55, 0.0  ;;  %vm1490_vm14 = vcmp.eq.f32.partialorder %v4670_v7, 0.0 }
  0xc6   : > { %v1299_v18 = vmul.f32 %v4531_v25, %v3302_v9  ;;  %3315 = vpow2.f32 %v1278_v53  ;;  %v1475_v58 = vsel %vm1474_vm9, %v4512_v5, %v1473_v33  ;;  %v4716_v20 = vadd.f32 %v4666_v50, %v3789_v12 }
  0xc7   : > { %v3304_v61 = vpop.eup %3303  ;;  %v1388_v22 = vsel %vm382_vm0, %v1385_v43, %v1387_v45  ;;  %v1478_v29 = vsel %vm1476_vm10, %v1477_v54, %v1475_v58  ;;  %v1491_v6 = vand.u32 2147483648, %v4670_v7  ;;  %v4724_v48 = vadd.f32 %v4373_v63, %v3785_v10 }
  0xc8   : > { %1391 = vrot.lane.b32.xlu1 %v1388_v22, %s3707_s17  ;;  %v1384_v8 = vrot.slane %v1299_v18, 2  ;;  %v1589_v44 = vmul.f32 -4.0, %v1478_v29  ;;  %v1487_v47 = vmul.f32 %v3304_v61, %v4670_v7  ;;  %3317 = vrsqrt.f32 %v4716_v20 }
  0xc9   : > { %v3306_v37 = vpop.eup %3305  ;;  %v1463_v42 = vand.u32 2147483648, %v4677_v55  ;;  %vm1495_vm15 = vcmp.eq.f32.partialorder %v4690_v23, inf  ;;  %v4734_v59 = vadd.f32 %v4377_v24, %v4039_v46  ;;  %3319 = vrsqrt.f32 %v4724_v48 }
  0xca   : > { %v3308_v4 = vpop.eup %3307  ;;  %v1303_v5 = vmul.f32 %v4553_v0, %v3306_v37  ;;  %v1386_v28 = vsel %vm382_vm0, %v1384_v8, %v1385_v43  ;;  %v1615_v31 = vmul.f32 1.442695, %v1589_v44  ;;  %v1489_v60 = vsel %vm1488_vm11, %v4670_v7, %v1487_v47 }
  0xcb   : > { %v3310_v57 = vpop.eup %3309  ;;  %v1459_v54 = vmul.f32 %v3308_v4, %v4677_v55  ;;  %1389 = vrot.lane.b32.xlu0 %v1386_v28, %s3707_s17  ;;  %v1492_v53 = vsel %vm1490_vm14, %v1491_v6, %v1489_v60  ;;  %vm1497_vm1 = vcmp.eq.f32.partialorder %v4690_v23, 0.0  ;;  %v1498_v58 = vand.u32 2147483648, %v4690_v23 }
  0xcc   : > { %v1304_v49 = vmul.f32 %v4743_v35, %v3310_v57  ;;  %v1401_v40 = vrot.slane %v1303_v5, 2  ;;  %3321 = vpow2.f32 %v1615_v31  ;;  %v1591_v33 = vmul.f32 -4.0, %v1492_v53 }
  0xcd   : > { %v1461_v43 = vsel %vm1460_vm12, %v4677_v55, %v1459_v54  ;;  %v3312_v9 = vpop.eup %3311  ;;  %vm1481_vm2 = vcmp.eq.f32.partialorder %v4716_v20, inf  ;;  %3323 = vrsqrt.f32 %v4734_v59  ;;  %vm1483_vm3 = vcmp.eq.f32.partialorder %v4716_v20, 0.0 }
  0xce   : > { %v1403_v45 = vrot.slane %v1304_v49, 2  ;;  %v1464_v18 = vsel %vm1462_vm13, %v1463_v42, %v1461_v43  ;;  %v1494_v61 = vmul.f32 %v3312_v9, %v4690_v23  ;;  %v1619_v22 = vmul.f32 1.442695, %v1591_v33 }
  0xcf   : > { %v1587_v7 = vmul.f32 -4.0, %v1464_v18  ;;  %v3314_v29 = vpop.eup %3313  ;;  %v1484_v37 = vand.u32 2147483648, %v4716_v20  ;;  %vm1509_vm4 = vcmp.eq.f32.partialorder %v4724_v48, inf  ;;  %vm1671_vm5 = vcmask 1044480  }
  0xd0   : > { %v1404_v6 = vsel %vm382_vm0, %v1401_v40, %v1403_v45  ;;  %v3316_v55 = vpop.eup %3315  ;;  %v4765_v8 = vmul.f32 %v4553_v0, %v3314_v29  ;;  %v1496_v47 = vsel %vm1495_vm15, %v4690_v23, %v1494_v61  ;;  %3325 = vpow2.f32 %v1619_v22 }
  0xd1   : > { %1407 = vrot.lane.b32.xlu1 %v1404_v6, %s3708_s18  ;;  %v1611_v44 = vmul.f32 1.442695, %v1587_v7  ;;  %v1302_v4 = vmul.f32 %v4531_v25, %v3316_v55  ;;  %v1499_v5 = vsel %vm1497_vm1, %v1498_v58, %v1496_v47  ;;  %v4775_v42 = vadd.f32 %v4666_v50, %v3799_v17 }
  0xd2   : > { %v4779_v57 = vadd.f32 %v4373_v63, %v3828_v26  ;;  %v3318_v28 = vpop.eup %3317  ;;  %v1592_v31 = vmul.f32 -4.0, %v1499_v5  ;;  %vm1511_vm6 = vcmp.eq.f32.partialorder %v4724_v48, 0.0  ;;  %v1512_v54 = vand.u32 2147483648, %v4724_v48 }
  0xd3   : > { %3327 = vpow2.f32 %v1611_v44  ;;  %v1400_v60 = vrot.slane %v1302_v4, 2  ;;  %v1480_v49 = vmul.f32 %v3318_v28, %v4716_v20  ;;  %v4787_v23 = vadd.f32 %v4377_v24, %v4156_v3  ;;  %v3320_v43 = vpop.eup %3319 }
  0xd4   : > { %3329 = vrsqrt.f32 %v4775_v42  ;;  %v1621_v53 = vmul.f32 1.442695, %v1592_v31  ;;  %vm1516_vm7 = vcmp.eq.f32.partialorder %v4734_v59, inf  ;;  %vm1518_vm9 = vcmp.eq.f32.partialorder %v4734_v59, 0.0 }
  0xd5   : > { %3331 = vrsqrt.f32 %v4779_v57  ;;  %v1402_v33 = vsel %vm382_vm0, %v1400_v60, %v1401_v40  ;;  %v1685_v9 = vrot.slane %v4765_v8, 3  ;;  %v1482_v45 = vsel %vm1481_vm2, %v4716_v20, %v1480_v49 }
  0xd6   : > { %v1519_v18 = vand.u32 2147483648, %v4734_v59  ;;  %v3322_v58 = vpop.eup %3321  ;;  %1405 = vrot.lane.b32.xlu0 %v1402_v33, %s3708_s18  ;;  %3333 = vpow2.f32 %v1621_v53  ;;  %v1485_v7 = vsel %vm1483_vm3, %v1484_v37, %v1482_v45  ;;  %v1508_v61 = vmul.f32 %v3320_v43, %v4724_v48 }
  0xd7   : > { %vm1502_vm10 = vcmp.eq.f32.partialorder %v4775_v42, inf  ;;  %v1652_v40 = vmul.f32 %v4743_v35, %v3322_v58  ;;  %v1590_v22 = vmul.f32 -4.0, %v1485_v7  ;;  %vm1504_vm11 = vcmp.eq.f32.partialorder %v4775_v42, 0.0  ;;  %v3324_v29 = vpop.eup %3323 }
  0xd8   : > { %3335 = vrsqrt.f32 %v4787_v23  ;;  %v1510_v6 = vsel %vm1509_vm4, %v4724_v48, %v1508_v61  ;;  %v1505_v55 = vand.u32 2147483648, %v4775_v42  ;;  %vm1530_vm12 = vcmp.eq.f32.partialorder %v4779_v57, inf }
  0xd9   : > { %v4813_v20 = vadd.f32 %v4666_v50, %v3830_v27  ;;  %v1687_v37 = vrot.slane %v1652_v40, 3  ;;  %v1617_v8 = vmul.f32 1.442695, %v1590_v22  ;;  %v1513_v44 = vsel %vm1511_vm6, %v1512_v54, %v1510_v6 }
  0xda   : > { %v1515_v47 = vmul.f32 %v3324_v29, %v4734_v59  ;;  %v3326_v4 = vpop.eup %3325  ;;  %v1594_v5 = vmul.f32 -4.0, %v1513_v44  ;;  %vm1532_vm13 = vcmp.eq.f32.partialorder %v4779_v57, 0.0  ;;  %v1533_v28 = vand.u32 2147483648, %v4779_v57 }
  0xdb   : > { %3337 = vrsqrt.f32 %v4813_v20  ;;  %v1688_v31 = vsel %vm1671_vm5, %v1685_v9, %v1687_v37  ;;  %vm1537_vm14 = vcmp.eq.f32.partialorder %v4787_v23, inf  ;;  %v4828_v54 = vmul.f32 %v4553_v0, %v3326_v4 }
  0xdc   : > { %3339 = vpow2.f32 %v1617_v8  ;;  %v1517_v60 = vsel %vm1516_vm7, %v4734_v59, %v1515_v47  ;;  %1691 = vrot.lane.b32.xlu1 %v1688_v31, %s3704_s14  ;;  %v1625_v53 = vmul.f32 1.442695, %v1594_v5  ;;  %v4834_v43 = vadd.f32 %v4373_v63, %v3863_v41 }
  0xdd   : > { %v3328_v48 = vpop.eup %3327  ;;  %v1520_v49 = vsel %vm1518_vm9, %v1519_v18, %v1517_v60  ;;  %vm1539_vm15 = vcmp.eq.f32.partialorder %v4787_v23, 0.0  ;;  %v4840_v7 = vadd.f32 %v4377_v24, %v4213_v34  ;;  %v1540_v18 = vand.u32 2147483648, %v4787_v23 }
  0xde   : > { %v3330_v33 = vpop.eup %3329  ;;  %v1650_v45 = vmul.f32 %v4531_v25, %v3328_v48  ;;  %v1595_v58 = vmul.f32 -4.0, %v1520_v49  ;;  %3341 = vpow2.f32 %v1625_v53  ;;  %vm1523_vm1 = vcmp.eq.f32.partialorder %v4813_v20, inf }
  0xdf   : > { %v3332_v61 = vpop.eup %3331  ;;  %v1501_v59 = vmul.f32 %v3330_v33, %v4775_v42  ;;  %3343 = vrsqrt.f32 %v4834_v43  ;;  %v1701_v37 = vrot.slane %v4828_v54, 3  ;;  %vm1525_vm2 = vcmp.eq.f32.partialorder %v4813_v20, 0.0 }
  0xe0   : > { %v1684_v40 = vrot.slane %v1650_v45, 3  ;;  %v1627_v22 = vmul.f32 1.442695, %v1595_v58  ;;  %v1529_v29 = vmul.f32 %v3332_v61, %v4779_v57  ;;  %v3334_v6 = vpop.eup %3333  ;;  %3345 = vrsqrt.f32 %v4840_v7 }
  0xe1   : > { %v1503_v8 = vsel %vm1502_vm10, %v4775_v42, %v1501_v59  ;;  %v1655_v4 = vmul.f32 %v4743_v35, %v3334_v6  ;;  %v1526_v54 = vand.u32 2147483648, %v4813_v20  ;;  %vm1551_vm3 = vcmp.eq.f32.partialorder %v4834_v43, inf }
  0xe2   : > { %v3336_v44 = vpop.eup %3335  ;;  %v1686_v47 = vsel %vm1671_vm5, %v1684_v40, %v1685_v9  ;;  %3347 = vpow2.f32 %v1627_v22  ;;  %v1506_v5 = vsel %vm1504_vm11, %v1505_v55, %v1503_v8  ;;  %v1531_v60 = vsel %vm1530_vm12, %v4779_v57, %v1529_v29 }
  0xe3   : > { %1689 = vrot.lane.b32.xlu0 %v1686_v47, %s3704_s14  ;;  %v1593_v31 = vmul.f32 -4.0, %v1506_v5  ;;  %v1536_v48 = vmul.f32 %v3336_v44, %v4787_v23  ;;  %v1703_v49 = vrot.slane %v1655_v4, 3  ;;  %v1534_v9 = vsel %vm1532_vm13, %v1533_v28, %v1531_v60 }
  0xe4   : > { %v4868_v42 = vadd.f32 %v4666_v50, %v3882_v51  ;;  %v1597_v45 = vmul.f32 -4.0, %v1534_v9  ;;  %v4875_v58 = vadd.f32 %v4373_v63, %v3884_v52  ;;  %vm1553_vm4 = vcmp.eq.f32.partialorder %v4834_v43, 0.0 }
  0xe5   : > { %v3338_v55 = vpop.eup %3337  ;;  %v1623_v53 = vmul.f32 1.442695, %v1593_v31  ;;  %v1538_v33 = vsel %vm1537_vm14, %v4787_v23, %v1536_v48  ;;  %v1704_v57 = vsel %vm1671_vm5, %v1701_v37, %v1703_v49  ;;  %v1554_v23 = vand.u32 2147483648, %v4834_v43 }
  0xe6   : > { %v3340_v61 = vpop.eup %3339  ;;  %v1541_v28 = vsel %vm1539_vm15, %v1540_v18, %v1538_v33  ;;  %v1522_v59 = vmul.f32 %v3338_v55, %v4813_v20  ;;  %3349 = vrsqrt.f32 %v4868_v42  ;;  %1707 = vrot.lane.b32.xlu1 %v1704_v57, %s3703_s13  ;;  %v1631_v29 = vmul.f32 1.442695, %v1597_v45 }
  0xe7   : > { %v1653_v40 = vmul.f32 %v4531_v25, %v3340_v61  ;;  %3351 = vpow2.f32 %v1623_v53  ;;  %v1598_v22 = vmul.f32 -4.0, %v1541_v28  ;;  %vm1558_vm6 = vcmp.eq.f32.partialorder %v4840_v7, inf }
  0xe8   : > { %v1524_v6 = vsel %vm1523_vm1, %v4813_v20, %v1522_v59  ;;  %v3342_v18 = vpop.eup %3341  ;;  %3353 = vpow2.f32 %v1631_v29  ;;  %v4895_v60 = vadd.f32 %v4377_v24, %v4271_v36  ;;  %v1561_v55 = vand.u32 2147483648, %v4840_v7 }
  0xe9   : > { %v1700_v8 = vrot.slane %v1653_v40, 3  ;;  %v1633_v44 = vmul.f32 1.442695, %v1598_v22  ;;  %v1527_v47 = vsel %vm1525_vm2, %v1526_v54, %v1524_v6  ;;  %v3344_v4 = vpop.eup %3343  ;;  %v1657_v5 = vmul.f32 %v4553_v0, %v3342_v18 }
  0xea   : > { %v1596_v31 = vmul.f32 -4.0, %v1527_v47  ;;  %3355 = vrsqrt.f32 %v4875_v58  ;;  %v3346_v48 = vpop.eup %3345  ;;  %v1550_v9 = vmul.f32 %v3344_v4, %v4834_v43  ;;  %vm1560_vm7 = vcmp.eq.f32.partialorder %v4840_v7, 0.0  ;;  %v4929_v4 = vld [vmem:[%s3767_s29 + $0x10] sm:$0x3f] }
  0xeb   : > { %v1702_v49 = vsel %vm1671_vm5, %v1700_v8, %v1701_v37  ;;  %3357 = vpow2.f32 %v1633_v44  ;;  %v1557_v53 = vmul.f32 %v3346_v48, %v4840_v7  ;;  %vm1544_vm9 = vcmp.eq.f32.partialorder %v4868_v42, inf }
  0xec   : > { %v3348_v20 = vpop.eup %3347  ;;  %1705 = vrot.lane.b32.xlu0 %v1702_v49, %s3703_s13  ;;  %v1629_v54 = vmul.f32 1.442695, %v1596_v31  ;;  %v1717_v45 = vrot.slane %v1657_v5, 3  ;;  %v1552_v37 = vsel %vm1551_vm3, %v4834_v43, %v1550_v9  ;;  %3359 = vrsqrt.f32 %v4895_v60 }
  0xed   : > { %v1658_v33 = vmul.f32 %v4743_v35, %v3348_v20  ;;  %v1555_v61 = vsel %vm1553_vm4, %v1554_v23, %v1552_v37  ;;  %v1559_v57 = vsel %vm1558_vm6, %v4840_v7, %v1557_v53  ;;  %vm1546_vm10 = vcmp.eq.f32.partialorder %v4868_v42, 0.0  ;;  %v4923_v23 = vld [vmem:[%s3767_s29 + $0x8] sm:$0xff] }
  0xee   : > { %3361 = vpow2.f32 %v1629_v54  ;;  %v1562_v59 = vsel %vm1560_vm7, %v1561_v55, %v1559_v57  ;;  %v1600_v40 = vmul.f32 -4.0, %v1555_v61  ;;  %v1547_v22 = vand.u32 2147483648, %v4868_v42 }
  0xef   : > { %v1719_v28 = vrot.slane %v1658_v33, 3  ;;  %v1601_v6 = vmul.f32 -4.0, %v1562_v59  ;;  %vm1572_vm11 = vcmp.eq.f32.partialorder %v4875_v58, inf  ;;  %v4920_v43 = vadd.f32 %v4666_v50, %v3891_v56 }
  0xf0   : > { %v3350_v29 = vpop.eup %3349  ;;  %v3080_v7 = vadd.f32 -1.0, %v4923_v23  ;;  %v1637_v44 = vmul.f32 1.442695, %v1600_v40  ;;  %v3081_v5 = vadd.f32 -1.0, %v4929_v4  ;;  %vm1574_vm12 = vcmp.eq.f32.partialorder %v4875_v58, 0.0 }
  0xf1   : > { %v3352_v18 = vpop.eup %3351  ;;  %v1720_v8 = vsel %vm1671_vm5, %v1717_v45, %v1719_v28  ;;  %v1543_v47 = vmul.f32 %v3350_v29, %v4868_v42  ;;  %v1639_v48 = vmul.f32 1.442695, %v1601_v6  ;;  %3363 = vrsqrt.f32 %v4920_v43 }
  0xf2   : > { %1723 = vrot.lane.b32.xlu1 %v1720_v8, %s3705_s15  ;;  %v1656_v31 = vmul.f32 %v4531_v25, %v3352_v18  ;;  %v3354_v49 = vpop.eup %3353  ;;  %3365 = vpow2.f32 %v1637_v44  ;;  %v1575_v55 = vand.u32 2147483648, %v4875_v58  ;;  %vm1579_vm13 = vcmp.eq.f32.partialorder %v4895_v60, inf }
  0xf3   : > { %v1545_v9 = vsel %vm1544_vm9, %v4868_v42, %v1543_v47  ;;  %v1660_v53 = vmul.f32 %v4553_v0, %v3354_v49  ;;  %3367 = vpow2.f32 %v1639_v48  ;;  %v4945_v28 = vmul.f32 %v3080_v7, %v3080_v7 }
  0xf4   : > { %v3356_v20 = vpop.eup %3355  ;;  %v1716_v54 = vrot.slane %v1656_v31, 3  ;;  %v1548_v33 = vsel %vm1546_vm10, %v1547_v22, %v1545_v9  ;;  %v4947_v59 = vmul.f32 %v3081_v5, %v3081_v5  ;;  %vm1581_vm14 = vcmp.eq.f32.partialorder %v4895_v60, 0.0 }
  0xf5   : > { %v3358_v37 = vpop.eup %3357  ;;  %v1599_v61 = vmul.f32 -4.0, %v1548_v33  ;;  %v1571_v57 = vmul.f32 %v3356_v20, %v4875_v58  ;;  %6394 = vst [vmem:[#allocation3_spill] sm:$0xff] %v4945_v28  ;;  %v1733_v6 = vrot.slane %v1660_v53, 3  ;;  %v1582_v7 = vand.u32 2147483648, %v4895_v60 }
  0xf6   : > { %6395 = vst [vmem:[#allocation4_spill] sm:$0xff] %v4947_v59  ;;  %v1718_v40 = vsel %vm1671_vm5, %v1716_v54, %v1717_v45  ;;  %v1661_v29 = vmul.f32 %v4743_v35, %v3358_v37  ;;  %v3360_v18 = vpop.eup %3359  ;;  %v4959_v8 = vadd.f32 %v4945_v28, %v3797_v16  ;;  %v4966_v31 = vadd.f32 %v4947_v59, %v4003_v30 }
  0xf7   : > { %1721 = vrot.lane.b32.xlu0 %v1718_v40, %s3705_s15  ;;  %v1635_v42 = vmul.f32 1.442695, %v1599_v61  ;;  %v1573_v22 = vsel %vm1572_vm11, %v4875_v58, %v1571_v57  ;;  %v1578_v5 = vmul.f32 %v3360_v18, %v4895_v60  ;;  %v3079_v58 = vadd.f32 -1.0, %v4662_v62 }
  0xf8   : > { %v3362_v45 = vpop.eup %3361  ;;  %v1735_v44 = vrot.slane %v1661_v29, 3  ;;  %v1576_v47 = vsel %vm1574_vm12, %v1575_v55, %v1573_v22  ;;  %vm1565_vm15 = vcmp.eq.f32.partialorder %v4920_v43, inf  ;;  %vm1567_vm1 = vcmp.eq.f32.partialorder %v4920_v43, 0.0 }
  0xf9   : > { %v1659_v48 = vmul.f32 %v4531_v25, %v3362_v45  ;;  %3369 = vpow2.f32 %v1635_v42  ;;  %v1603_v49 = vmul.f32 -4.0, %v1576_v47  ;;  %v1580_v20 = vsel %vm1579_vm13, %v4895_v60, %v1578_v5 }
  0xfa   : > { %v1736_v9 = vsel %vm1671_vm5, %v1733_v6, %v1735_v44  ;;  %3371 = vrsqrt.f32 %v4959_v8  ;;  %v1583_v54 = vsel %vm1581_vm14, %v1582_v7, %v1580_v20  ;;  %v1568_v61 = vand.u32 2147483648, %v4920_v43 }
  0xfb   : > { %1739 = vrot.lane.b32.xlu1 %v1736_v9, %s3706_s16  ;;  %v1732_v55 = vrot.slane %v1659_v48, 3  ;;  %v1643_v53 = vmul.f32 1.442695, %v1603_v49  ;;  %v3364_v33 = vpop.eup %3363  ;;  %v1604_v37 = vmul.f32 -4.0, %v1583_v54  ;;  %3373 = vrsqrt.f32 %v4966_v31 }
  0xfc   : > { %v3366_v57 = vpop.eup %3365  ;;  %v1564_v40 = vmul.f32 %v3364_v33, %v4920_v43  ;;  %vm1834_vm2 = vcmp.eq.f32.partialorder %v4959_v8, inf  ;;  %v4987_v42 = vmul.f32 %v3079_v58, %v3079_v58  ;;  %v4991_v22 = vadd.f32 %v4945_v28, %v3795_v15 }
  0xfd   : > { %v1734_v62 = vsel %vm1671_vm5, %v1732_v55, %v1733_v6  ;;  %3375 = vpow2.f32 %v1643_v53  ;;  %v3368_v60 = vpop.eup %3367  ;;  %v1663_v29 = vmul.f32 %v4553_v0, %v3366_v57  ;;  %v1645_v18 = vmul.f32 1.442695, %v1604_v37 }
  0xfe   : > { %1737 = vrot.lane.b32.xlu0 %v1734_v62, %s3706_s16  ;;  %6396 = vst [vmem:[#allocation5_spill] sm:$0xff] %v4987_v42  ;;  %v1664_v7 = vmul.f32 %v4743_v35, %v3368_v60  ;;  %v1566_v6 = vsel %vm1565_vm15, %v4920_v43, %v1564_v40  ;;  %vm1836_vm3 = vcmp.eq.f32.partialorder %v4959_v8, 0.0  ;;  %v5000_v45 = vadd.f32 %v4947_v59, %v4017_v39 }
  0xff   : > { %v1749_v44 = vrot.slane %v1663_v29, 3  ;;  %3377 = vpow2.f32 %v1645_v18  ;;  %v1569_v47 = vsel %vm1567_vm1, %v1568_v61, %v1566_v6  ;;  %v5006_v5 = vadd.f32 %v4987_v42, %v3791_v13 }
 0x100   : > { %v1751_v48 = vrot.slane %v1664_v7, 3  ;;  %v1602_v49 = vmul.f32 -4.0, %v1569_v47  ;;  %v1837_v9 = vand.u32 2147483648, %v4959_v8  ;;  %3379 = vrsqrt.f32 %v4991_v22 }
 0x101   : > { %vm1841_vm4 = vcmp.eq.f32.partialorder %v4966_v31, inf  ;;  %vm1843_vm6 = vcmp.eq.f32.partialorder %v4966_v31, 0.0  ;;  %3381 = vrsqrt.f32 %v5006_v5  ;;  %v5015_v43 = vadd.f32 %v4945_v28, %v3785_v10 }
 0x102   : > { %v1752_v58 = vsel %vm1671_vm5, %v1749_v44, %v1751_v48  ;;  %v1641_v55 = vmul.f32 1.442695, %v1602_v49  ;;  %v1844_v54 = vand.u32 2147483648, %v4966_v31  ;;  %vm1855_vm7 = vcmp.eq.f32.partialorder %v4991_v22, inf }
 0x103   : > { %v3370_v20 = vpop.eup %3369  ;;  %1755 = vrot.lane.b32.xlu1 %v1752_v58, %s3707_s17  ;;  %vm1827_vm9 = vcmp.eq.f32.partialorder %v5006_v5, inf  ;;  %v1830_v37 = vand.u32 2147483648, %v5006_v5  ;;  %3383 = vrsqrt.f32 %v5000_v45  ;;  %vm1829_vm10 = vcmp.eq.f32.partialorder %v5006_v5, 0.0 }
 0x104   : > { %v3372_v53 = vpop.eup %3371  ;;  %v1662_v33 = vmul.f32 %v4531_v25, %v3370_v20  ;;  %3385 = vpow2.f32 %v1641_v55  ;;  %vm1857_vm11 = vcmp.eq.f32.partialorder %v4991_v22, 0.0  ;;  %v5030_v57 = vadd.f32 %v4987_v42, %v3789_v12 }
 0x105   : > { %v1833_v61 = vmul.f32 %v3372_v53, %v4959_v8  ;;  %v3374_v62 = vpop.eup %3373  ;;  %v1858_v25 = vand.u32 2147483648, %v4991_v22  ;;  %v5035_v60 = vadd.f32 %v4947_v59, %v4039_v46  ;;  %3387 = vrsqrt.f32 %v5015_v43 }
 0x106   : > { %v1748_v40 = vrot.slane %v1662_v33, 3  ;;  %v1840_v7 = vmul.f32 %v3374_v62, %v4966_v31  ;;  %vm1862_vm12 = vcmp.eq.f32.partialorder %v5000_v45, inf  ;;  %3389 = vrsqrt.f32 %v5030_v57 }
 0x107   : > { %v3376_v29 = vpop.eup %3375  ;;  %v1835_v18 = vsel %vm1834_vm2, %v4959_v8, %v1833_v61  ;;  %vm1864_vm13 = vcmp.eq.f32.partialorder %v5000_v45, 0.0  ;;  %v1865_v49 = vand.u32 2147483648, %v5000_v45  ;;  %vm1848_vm14 = vcmp.eq.f32.partialorder %v5030_v57, inf }
 0x108   : > { %v1750_v6 = vsel %vm1671_vm5, %v1748_v40, %v1749_v44  ;;  %v1666_v47 = vmul.f32 %v4553_v0, %v3376_v29  ;;  %v1838_v48 = vsel %vm1836_vm3, %v1837_v9, %v1835_v18  ;;  %v1842_v20 = vsel %vm1841_vm4, %v4966_v31, %v1840_v7 }
 0x109   : > { %1753 = vrot.lane.b32.xlu0 %v1750_v6, %s3707_s17  ;;  %v1955_v58 = vmul.f32 -4.0, %v1838_v48  ;;  %vm1876_vm15 = vcmp.eq.f32.partialorder %v5015_v43, inf  ;;  %v3378_v44 = vpop.eup %3377  ;;  %v1845_v0 = vsel %vm1843_vm6, %v1844_v54, %v1842_v20  ;;  %vm1850_vm1 = vcmp.eq.f32.partialorder %v5030_v57, 0.0 }
 0x10a   : > { %v1851_v8 = vand.u32 2147483648, %v5030_v57  ;;  %3391 = vrsqrt.f32 %v5035_v60  ;;  %v3380_v9 = vpop.eup %3379  ;;  %v1667_v55 = vmul.f32 %v4743_v35, %v3378_v44  ;;  %v1765_v53 = vrot.slane %v1666_v47, 3 }
 0x10b   : > { %v1956_v33 = vmul.f32 -4.0, %v1845_v0  ;;  %v1980_v61 = vmul.f32 1.442695, %v1955_v58  ;;  %v3382_v62 = vpop.eup %3381  ;;  %v1854_v40 = vmul.f32 %v3380_v9, %v4991_v22  ;;  %vm1878_vm2 = vcmp.eq.f32.partialorder %v5015_v43, 0.0  ;;  %v5084_v9 = vld [vmem:[%s3950_s12] sm:$0xff] }
 0x10c   : > { %v1879_v31 = vand.u32 2147483648, %v5015_v43  ;;  %v5067_v54 = vadd.f32 %v4987_v42, %v3799_v17  ;;  %v1767_v29 = vrot.slane %v1667_v55, 3  ;;  %v1826_v7 = vmul.f32 %v3382_v62, %v5006_v5 }
 0x10d   : > { %3393 = vpow2.f32 %v1980_v61  ;;  %v1982_v18 = vmul.f32 1.442695, %v1956_v33  ;;  %v3384_v6 = vpop.eup %3383  ;;  %v1856_v47 = vsel %vm1855_vm7, %v4991_v22, %v1854_v40  ;;  %vm1883_vm3 = vcmp.eq.f32.partialorder %v5035_v60, inf }
 0x10e   : > { %vm1885_vm4 = vcmp.eq.f32.partialorder %v5035_v60, 0.0  ;;  %3395 = vrsqrt.f32 %v5067_v54  ;;  %v3386_v48 = vpop.eup %3385  ;;  %v1768_v20 = vsel %vm1671_vm5, %v1765_v53, %v1767_v29  ;;  %v1828_v58 = vsel %vm1827_vm9, %v5006_v5, %v1826_v7 }
 0x10f   : > { %3397 = vpow2.f32 %v1982_v18  ;;  %v1859_v44 = vsel %vm1857_vm11, %v1858_v25, %v1856_v47  ;;  %v3388_v0 = vpop.eup %3387  ;;  %1771 = vrot.lane.b32.xlu1 %v1768_v20, %s3708_s18  ;;  %v1665_v55 = vmul.f32 %v5084_v9, %v3386_v48  ;;  %v1831_v33 = vsel %vm1829_vm10, %v1830_v37, %v1828_v58 }
 0x110   : > { %v1861_v61 = vmul.f32 %v3384_v6, %v5000_v45  ;;  %v1958_v62 = vmul.f32 -4.0, %v1859_v44  ;;  %v3390_v40 = vpop.eup %3389  ;;  %v1954_v29 = vmul.f32 -4.0, %v1831_v33  ;;  %v1875_v18 = vmul.f32 %v3388_v0, %v5015_v43 }
 0x111   : > { %v1886_v22 = vand.u32 2147483648, %v5035_v60  ;;  %v5094_v25 = vadd.f32 %v4945_v28, %v3828_v26  ;;  %v1764_v7 = vrot.slane %v1665_v55, 3  ;;  %v1847_v37 = vmul.f32 %v3390_v40, %v5030_v57 }
 0x112   : > { %v1863_v47 = vsel %vm1862_vm12, %v5000_v45, %v1861_v61  ;;  %v1986_v5 = vmul.f32 1.442695, %v1958_v62  ;;  %v1978_v6 = vmul.f32 1.442695, %v1954_v29  ;;  %v1877_v20 = vsel %vm1876_vm15, %v5015_v43, %v1875_v18 }
 0x113   : > { %v1866_v48 = vsel %vm1864_vm13, %v1865_v49, %v1863_v47  ;;  %v5107_v58 = vadd.f32 %v4947_v59, %v4156_v3  ;;  %v1766_v0 = vsel %vm1671_vm5, %v1764_v7, %v1765_v53  ;;  %v1849_v33 = vsel %vm1848_vm14, %v5030_v57, %v1847_v37 }
 0x114   : > { %v3392_v44 = vpop.eup %3391  ;;  %v1959_v55 = vmul.f32 -4.0, %v1866_v48  ;;  %3399 = vpow2.f32 %v1986_v5  ;;  %1769 = vrot.lane.b32.xlu0 %v1766_v0, %s3708_s18  ;;  %v1852_v45 = vsel %vm1850_vm1, %v1851_v8, %v1849_v33  ;;  %v1880_v49 = vsel %vm1878_vm2, %v1879_v31, %v1877_v20  ;;  %v5127_v8 = vld [vmem:[%s3950_s12 + $0x8] sm:$0xff] }
 0x115   : > { %3401 = vpow2.f32 %v1978_v6  ;;  %v1882_v61 = vmul.f32 %v3392_v44, %v5035_v60  ;;  %v1957_v53 = vmul.f32 -4.0, %v1852_v45  ;;  %v1961_v40 = vmul.f32 -4.0, %v1880_v49 }
 0x116   : > { %v1988_v62 = vmul.f32 1.442695, %v1959_v55  ;;  %3403 = vrsqrt.f32 %v5094_v25  ;;  %vm1869_vm6 = vcmp.eq.f32.partialorder %v5067_v54, inf  ;;  %vm1871_vm7 = vcmp.eq.f32.partialorder %v5067_v54, 0.0 }
 0x117   : > { %v3394_v29 = vpop.eup %3393  ;;  %v1884_v18 = vsel %vm1883_vm3, %v5035_v60, %v1882_v61  ;;  %v1872_v57 = vand.u32 2147483648, %v5067_v54  ;;  %v1984_v7 = vmul.f32 1.442695, %v1957_v53  ;;  %v1992_v6 = vmul.f32 1.442695, %v1961_v40  ;;  %v3682_v60 = vld [vmem:[%s3773_s9 + $0x8] sm:$0xff] }
 0x118   : > { %v3396_v43 = vpop.eup %3395  ;;  %v2018_v31 = vmul.f32 %v5127_v8, %v3394_v29  ;;  %3405 = vpow2.f32 %v1988_v62  ;;  %v1887_v47 = vsel %vm1885_vm4, %v1886_v22, %v1884_v18  ;;  %vm2038_vm9 = vcmask 1043456  }
 0x119   : > { %v3398_v5 = vpop.eup %3397  ;;  %v1962_v37 = vmul.f32 -4.0, %v1887_v47  ;;  %v1868_v48 = vmul.f32 %v3396_v43, %v5067_v54  ;;  %3407 = vrsqrt.f32 %v5107_v58  ;;  %v5139_v22 = vadd.f32 3.0, %v3682_v60 }
 0x11a   : > { %v2019_v20 = vmul.f32 %v4743_v35, %v3398_v5  ;;  %v2052_v44 = vrot.slane %v2018_v31, 4  ;;  %3409 = vpow2.f32 %v1984_v7  ;;  %v5145_v49 = vadd.f32 %v4987_v42, %v3830_v27 }
 0x11b   : > { %3411 = vpow2.f32 %v1992_v6  ;;  %v1994_v0 = vmul.f32 1.442695, %v1962_v37  ;;  %v1870_v55 = vsel %vm1869_vm6, %v5067_v54, %v1868_v48  ;;  %vm1897_vm10 = vcmp.eq.f32.partialorder %v5094_v25, inf }
 0x11c   : > { %v2054_v33 = vrot.slane %v2019_v20, 4  ;;  %v1873_v45 = vsel %vm1871_vm7, %v1872_v57, %v1870_v55  ;;  %v5150_v62 = vadd.f32 %v4945_v28, %v3863_v41  ;;  %vm1899_vm11 = vcmp.eq.f32.partialorder %v5094_v25, 0.0 }
 0x11d   : > { %3413 = vpow2.f32 %v1994_v0  ;;  %v1960_v61 = vmul.f32 -4.0, %v1873_v45  ;;  %v5157_v54 = vadd.f32 %v4947_v59, %v4213_v34  ;;  %v1900_v43 = vand.u32 2147483648, %v5094_v25 }
 0x11e   : > { %v3400_v53 = vpop.eup %3399  ;;  %v2055_v40 = vsel %vm2038_vm9, %v2052_v44, %v2054_v33  ;;  %3415 = vrsqrt.f32 %v5145_v49  ;;  %vm1904_vm12 = vcmp.eq.f32.partialorder %v5107_v58, inf  ;;  %vm1906_vm13 = vcmp.eq.f32.partialorder %v5107_v58, 0.0 }
 0x11f   : > { %v3402_v29 = vpop.eup %3401  ;;  %2058 = vrot.lane.b32.xlu1 %v2055_v40, %s3704_s14  ;;  %v2021_v18 = vmul.f32 %v5127_v8, %v3400_v53  ;;  %v1990_v57 = vmul.f32 1.442695, %v1960_v61  ;;  %3417 = vrsqrt.f32 %v5150_v62  ;;  %v1907_v47 = vand.u32 2147483648, %v5107_v58 }
 0x120   : > { %v3404_v31 = vpop.eup %3403  ;;  %v2017_v7 = vmul.f32 %v5084_v9, %v3402_v29  ;;  %vm1890_vm14 = vcmp.eq.f32.partialorder %v5145_v49, inf  ;;  %vm1892_vm15 = vcmp.eq.f32.partialorder %v5145_v49, 0.0  ;;  %v1893_v48 = vand.u32 2147483648, %v5145_v49  ;;  %v3683_v29 = vld [vmem:[%s3773_s9] sm:$0xff] }
 0x121   : > { %3419 = vpow2.f32 %v1990_v57  ;;  %v1896_v5 = vmul.f32 %v3404_v31, %v5094_v25  ;;  %vm1918_vm1 = vcmp.eq.f32.partialorder %v5150_v62, inf  ;;  %v2068_v55 = vrot.slane %v2021_v18, 4 }
 0x122   : > { %v3406_v37 = vpop.eup %3405  ;;  %v2051_v6 = vrot.slane %v2017_v7, 4  ;;  %3421 = vrsqrt.f32 %v5157_v54  ;;  %vm1920_vm2 = vcmp.eq.f32.partialorder %v5150_v62, 0.0  ;;  %v5180_v33 = vadd.f32 %v4987_v42, %v3882_v51 }
 0x123   : > { %v3408_v20 = vpop.eup %3407  ;;  %v2022_v0 = vmul.f32 %v4743_v35, %v3406_v37  ;;  %v1898_v60 = vsel %vm1897_vm10, %v5094_v25, %v1896_v5  ;;  %v3055_v18 = vadd.f32 3.0, %v3683_v29  ;;  %vm1925_vm3 = vcmp.eq.f32.partialorder %v5157_v54, inf }
 0x124   : > { %v3410_v45 = vpop.eup %3409  ;;  %v2053_v61 = vsel %vm2038_vm9, %v2051_v6, %v2052_v44  ;;  %v1901_v53 = vsel %vm1899_vm11, %v1900_v43, %v1898_v60  ;;  %v1903_v40 = vmul.f32 %v3408_v20, %v5107_v58  ;;  %3423 = vrsqrt.f32 %v5180_v33 }
 0x125   : > { %v3412_v57 = vpop.eup %3411  ;;  %2056 = vrot.lane.b32.xlu0 %v2053_v61, %s3704_s14  ;;  %v2070_v31 = vrot.slane %v2022_v0, 4  ;;  %v2020_v7 = vmul.f32 %v5084_v9, %v3410_v45  ;;  %v1964_v5 = vmul.f32 -4.0, %v1901_v53  ;;  %v1921_v44 = vand.u32 2147483648, %v5150_v62 }
 0x126   : > { %v2024_v37 = vmul.f32 %v5127_v8, %v3412_v57  ;;  %v1905_v25 = vsel %vm1904_vm12, %v5107_v58, %v1903_v40  ;;  %v5197_v43 = vadd.f32 %v4945_v28, %v3884_v52  ;;  %vm1927_vm4 = vcmp.eq.f32.partialorder %v5157_v54, 0.0 }
 0x127   : > { %v3414_v6 = vpop.eup %3413  ;;  %v2071_v20 = vsel %vm2038_vm9, %v2068_v55, %v2070_v31  ;;  %v2067_v0 = vrot.slane %v2020_v7, 4  ;;  %v1908_v60 = vsel %vm1906_vm13, %v1907_v47, %v1905_v25  ;;  %v1998_v45 = vmul.f32 1.442695, %v1964_v5 }
 0x128   : > { %v3416_v61 = vpop.eup %3415  ;;  %2074 = vrot.lane.b32.xlu1 %v2071_v20, %s3703_s13  ;;  %v2025_v53 = vmul.f32 %v4743_v35, %v3414_v6  ;;  %v2084_v40 = vrot.slane %v2024_v37, 4  ;;  %v1965_v29 = vmul.f32 -4.0, %v1908_v60  ;;  %v5207_v7 = vmul.f32 %v3055_v18, %v3055_v18 }
 0x129   : > { %v3418_v57 = vpop.eup %3417  ;;  %v2069_v28 = vsel %vm2038_vm9, %v2067_v0, %v2068_v55  ;;  %3425 = vpow2.f32 %v1998_v45  ;;  %v1889_v31 = vmul.f32 %v3416_v61, %v5145_v49  ;;  %v1928_v55 = vand.u32 2147483648, %v5157_v54 }
 0x12a   : > { %2072 = vrot.lane.b32.xlu0 %v2069_v28, %s3703_s13  ;;  %v2086_v58 = vrot.slane %v2025_v53, 4  ;;  %v2000_v47 = vmul.f32 1.442695, %v1965_v29  ;;  %v1917_v5 = vmul.f32 %v3418_v57, %v5150_v62  ;;  %v5218_v6 = vadd.f32 %v5207_v7, %v3787_v11 }
 0x12b   : > { %v3420_v37 = vpop.eup %3419  ;;  %v1891_v25 = vsel %vm1890_vm14, %v5145_v49, %v1889_v31  ;;  %3427 = vrsqrt.f32 %v5197_v43  ;;  %vm1911_vm6 = vcmp.eq.f32.partialorder %v5180_v33, inf  ;;  %v5236_v49 = vadd.f32 %v4947_v59, %v4271_v36 }
 0x12c   : > { %v3422_v28 = vpop.eup %3421  ;;  %v2087_v18 = vsel %vm2038_vm9, %v2084_v40, %v2086_v58  ;;  %v2023_v20 = vmul.f32 %v5084_v9, %v3420_v37  ;;  %3429 = vpow2.f32 %v2000_v47  ;;  %v1894_v0 = vsel %vm1892_vm15, %v1893_v48, %v1891_v25 }
 0x12d   : > { %2090 = vrot.lane.b32.xlu1 %v2087_v18, %s3705_s15  ;;  %v1963_v60 = vmul.f32 -4.0, %v1894_v0  ;;  %v1919_v45 = vsel %vm1918_vm1, %v5150_v62, %v1917_v5  ;;  %v1924_v11 = vmul.f32 %v3422_v28, %v5157_v54  ;;  %3431 = vrsqrt.f32 %v5218_v6 }
 0x12e   : > { %v2083_v61 = vrot.slane %v2023_v20, 4  ;;  %v1922_v53 = vsel %vm1920_vm2, %v1921_v44, %v1919_v45  ;;  %v3424_v48 = vpop.eup %3423  ;;  %v1914_v58 = vand.u32 2147483648, %v5180_v33  ;;  %vm1913_vm7 = vcmp.eq.f32.partialorder %v5180_v33, 0.0 }
 0x12f   : > { %v1996_v29 = vmul.f32 1.442695, %v1963_v60  ;;  %v1926_v57 = vsel %vm1925_vm3, %v5157_v54, %v1924_v11  ;;  %v1967_v31 = vmul.f32 -4.0, %v1922_v53  ;;  %v1910_v44 = vmul.f32 %v3424_v48, %v5180_v33 }
 0x130   : > { %v2085_v47 = vsel %vm2038_vm9, %v2083_v61, %v2084_v40  ;;  %v1929_v62 = vsel %vm1927_vm4, %v1928_v55, %v1926_v57  ;;  %v5249_v5 = vmul.f32 %v5139_v22, %v5139_v22  ;;  %vm453_vm10 = vcmp.eq.f32.partialorder %v5218_v6, inf }
 0x131   : > { %2088 = vrot.lane.b32.xlu0 %v2085_v47, %s3705_s15  ;;  %3433 = vpow2.f32 %v1996_v29  ;;  %v1968_v37 = vmul.f32 -4.0, %v1929_v62  ;;  %v2004_v25 = vmul.f32 1.442695, %v1967_v31  ;;  %v1912_v40 = vsel %vm1911_vm6, %v5180_v33, %v1910_v44 }
 0x132   : > { %vm1939_vm11 = vcmp.eq.f32.partialorder %v5197_v43, inf  ;;  %3435 = vrsqrt.f32 %v5236_v49  ;;  %v1915_v22 = vsel %vm1913_vm7, %v1914_v58, %v1912_v40  ;;  %vm455_vm12 = vcmp.eq.f32.partialorder %v5218_v6, 0.0 }
 0x133   : > { %v3426_v54 = vpop.eup %3425  ;;  %3437 = vpow2.f32 %v2004_v25  ;;  %v2006_v55 = vmul.f32 1.442695, %v1968_v37  ;;  %v1966_v18 = vmul.f32 -4.0, %v1915_v22  ;;  %v456_v20 = vand.u32 2147483648, %v5218_v6 }
 0x134   : > { %v2027_v28 = vmul.f32 %v5127_v8, %v3426_v54  ;;  %v5263_v33 = vadd.f32 %v4987_v42, %v3891_v56  ;;  %vm1941_vm13 = vcmp.eq.f32.partialorder %v5197_v43, 0.0  ;;  %v1942_v60 = vand.u32 2147483648, %v5197_v43 }
 0x135   : > { %v3428_v0 = vpop.eup %3427  ;;  %3439 = vpow2.f32 %v2006_v55  ;;  %v5269_v45 = vadd.f32 %v5249_v5, %v3793_v14  ;;  %v2002_v61 = vmul.f32 1.442695, %v1966_v18  ;;  %v3083_v48 = vadd.f32 -2.0, %v4923_v23  ;;  %v5298_v55 = vld [vmem:[%s3767_s29] sm:$0xff] }
 0x136   : > { %v3430_v11 = vpop.eup %3429  ;;  %v1938_v53 = vmul.f32 %v3428_v0, %v5197_v43  ;;  %3441 = vrsqrt.f32 %v5263_v33  ;;  %v2100_v31 = vrot.slane %v2027_v28, 4  ;;  %vm1946_vm14 = vcmp.eq.f32.partialorder %v5236_v49, inf }
 0x137   : > { %v3432_v29 = vpop.eup %3431  ;;  %v2028_v57 = vmul.f32 %v4743_v35, %v3430_v11  ;;  %v3084_v58 = vadd.f32 -2.0, %v4929_v4  ;;  %3443 = vpow2.f32 %v2002_v61  ;;  %vm1948_vm15 = vcmp.eq.f32.partialorder %v5236_v49, 0.0 }
 0x138   : > { %v452_v14 = vmul.f32 %v3432_v29, %v5218_v6  ;;  %v1940_v47 = vsel %vm1939_vm11, %v5197_v43, %v1938_v53  ;;  %v1949_v35 = vand.u32 2147483648, %v5236_v49  ;;  %3445 = vrsqrt.f32 %v5269_v45 }
 0x139   : > { %v2102_v62 = vrot.slane %v2028_v57, 4  ;;  %v1943_v23 = vsel %vm1941_vm13, %v1942_v60, %v1940_v47  ;;  %vm1932_vm1 = vcmp.eq.f32.partialorder %v5263_v33, inf  ;;  %v5290_v37 = vmul.f32 %v3083_v48, %v3083_v48 }
 0x13a   : > { %v454_v4 = vsel %vm453_vm10, %v5218_v6, %v452_v14  ;;  %v1970_v44 = vmul.f32 -4.0, %v1943_v23  ;;  %v5295_v54 = vmul.f32 %v3084_v58, %v3084_v58  ;;  %v3082_v22 = vadd.f32 -2.0, %v5298_v55  ;;  %v5315_v58 = vpop.permute.xlu0 %609 }
 0x13b   : > { %v3434_v25 = vpop.eup %3433  ;;  %v2103_v40 = vsel %vm2038_vm9, %v2100_v31, %v2102_v62  ;;  %v457_v43 = vsel %vm455_vm12, %v456_v20, %v454_v4  ;;  %v5305_v11 = vadd.f32 %v5290_v37, %v3797_v16  ;;  %vm1934_vm2 = vcmp.eq.f32.partialorder %v5263_v33, 0.0 }
 0x13c   : > { %v3436_v28 = vpop.eup %3435  ;;  %2106 = vrot.lane.b32.xlu1 %v2103_v40, %s3706_s16  ;;  %v2026_v18 = vmul.f32 %v5084_v9, %v3434_v25  ;;  %v549_v0 = vmul.f32 -4.0, %v457_v43  ;;  %v2010_v60 = vmul.f32 1.442695, %v1970_v44  ;;  %v1935_v20 = vand.u32 2147483648, %v5263_v33  ;;  %v5326_v44 = vld [vmem:[%s3950_s12 + $0x10] sm:$0x3f] }
 0x13d   : > { %v3438_v61 = vpop.eup %3437  ;;  %v1945_v6 = vmul.f32 %v3436_v28, %v5236_v49  ;;  %v5312_v53 = vadd.f32 %v5295_v54, %v4003_v30  ;;  %vm460_vm3 = vcmp.eq.f32.partialorder %v5269_v45, inf  ;;  %v5322_v62 = vmul.f32 %v3082_v22, %v3082_v22 }
 0x13e   : > { %v2099_v48 = vrot.slane %v2026_v18, 4  ;;  %v2030_v29 = vmul.f32 %v5127_v8, %v3438_v61  ;;  %v563_v57 = vmul.f32 1.442695, %v549_v0  ;;  %3447 = vpow2.f32 %v2010_v60 }
 0x13f   : > { %v3440_v14 = vpop.eup %3439  ;;  %v1947_v47 = vsel %vm1946_vm14, %v5236_v49, %v1945_v6  ;;  %3449 = vrsqrt.f32 %v5305_v11  ;;  %vm462_vm4 = vcmp.eq.f32.partialorder %v5269_v45, 0.0  ;;  %v463_v0 = vand.u32 2147483648, %v5269_v45 }
 0x140   : > { %v3442_v23 = vpop.eup %3441  ;;  %v2101_v4 = vsel %vm2038_vm9, %v2099_v48, %v2100_v31  ;;  %v2031_v25 = vmul.f32 %v5326_v44, %v3440_v14  ;;  %v2116_v40 = vrot.slane %v2030_v29, 4  ;;  %3451 = vpow2.f32 %v563_v57 }
 0x141   : > { %2104 = vrot.lane.b32.xlu0 %v2101_v4, %s3706_s16  ;;  %v1950_v43 = vsel %vm1948_vm15, %v1949_v35, %v1947_v47  ;;  %v1931_v28 = vmul.f32 %v3442_v23, %v5263_v33  ;;  %3453 = vrsqrt.f32 %v5312_v53  ;;  %v3444_v22 = vpop.eup %3443  ;;  %v5338_v60 = vadd.f32 %v5290_v37, %v3795_v15  ;;  %v5353_v47 = vpop.permute.xlu0 %611 }
 0x142   : > { %v2118_v18 = vrot.slane %v2031_v25, 4  ;;  %v1971_v31 = vmul.f32 -4.0, %v1950_v43  ;;  %v3446_v61 = vpop.eup %3445  ;;  %v2029_v6 = vmul.f32 %v5084_v9, %v3444_v22  ;;  %vm2201_vm6 = vcmp.eq.f32.partialorder %v5305_v11, inf }
 0x143   : > { %v1933_v49 = vsel %vm1932_vm1, %v5263_v33, %v1931_v28  ;;  %v5347_v35 = vadd.f32 %v5322_v62, %v3791_v13  ;;  %v459_v14 = vmul.f32 %v3446_v61, %v5269_v45  ;;  %vm2203_vm7 = vcmp.eq.f32.partialorder %v5305_v11, 0.0 }
 0x144   : > { %v2119_v48 = vsel %vm2038_vm9, %v2116_v40, %v2118_v18  ;;  %v2012_v29 = vmul.f32 1.442695, %v1971_v31  ;;  %v1936_v57 = vsel %vm1934_vm2, %v1935_v20, %v1933_v49  ;;  %v2115_v23 = vrot.slane %v2029_v6, 4 }
 0x145   : > { %2122 = vrot.lane.b32.xlu1 %v2119_v48, %s3707_s17  ;;  %v1969_v4 = vmul.f32 -4.0, %v1936_v57  ;;  %3455 = vrsqrt.f32 %v5347_v35  ;;  %v461_v25 = vsel %vm460_vm3, %v5269_v45, %v459_v14  ;;  %v2204_v33 = vand.u32 2147483648, %v5305_v11  ;;  %v630_v57 = vpop.permute.xlu0 %629 }
 0x146   : > { %3457 = vpow2.f32 %v2012_v29  ;;  %vm2208_vm10 = vcmp.eq.f32.partialorder %v5312_v53, inf  ;;  %v2117_v20 = vsel %vm2038_vm9, %v2115_v23, %v2116_v40  ;;  %v464_v28 = vsel %vm462_vm4, %v463_v0, %v461_v25  ;;  %v620_v0 = vpop.permute.xlu1 %619 }
 0x147   : > { %v2008_v43 = vmul.f32 1.442695, %v1969_v4  ;;  %v5368_v22 = vadd.f32 %v5295_v54, %v4017_v39  ;;  %2120 = vrot.lane.b32.xlu0 %v2117_v20, %s3707_s17  ;;  %v550_v31 = vmul.f32 -4.0, %v464_v28  ;;  %vm2210_vm11 = vcmp.eq.f32.partialorder %v5312_v53, 0.0 }
 0x148   : > { %v3448_v18 = vpop.eup %3447  ;;  %v2211_v61 = vand.u32 2147483648, %v5312_v53  ;;  %3459 = vrsqrt.f32 %v5338_v60  ;;  %vm2194_vm12 = vcmp.eq.f32.partialorder %v5347_v35, inf  ;;  %vm2196_vm13 = vcmp.eq.f32.partialorder %v5347_v35, 0.0 }
 0x149   : > { %v3450_v6 = vpop.eup %3449  ;;  %3461 = vpow2.f32 %v2008_v43  ;;  %v2197_v45 = vand.u32 2147483648, %v5347_v35  ;;  %v5378_v49 = vmul.f32 %v5127_v8, %v3448_v18  ;;  %v565_v48 = vmul.f32 1.442695, %v550_v31 }
 0x14a   : > { %v3452_v40 = vpop.eup %3451  ;;  %v2200_v29 = vmul.f32 %v3450_v6, %v5305_v11  ;;  %vm2222_vm14 = vcmp.eq.f32.partialorder %v5338_v60, inf  ;;  %3463 = vrsqrt.f32 %v5368_v22  ;;  %vm2224_vm15 = vcmp.eq.f32.partialorder %v5338_v60, 0.0 }
 0x14b   : > { %v3454_v14 = vpop.eup %3453  ;;  %v591_v23 = vmul.f32 %v5084_v9, %v3452_v40  ;;  %v2225_v4 = vand.u32 2147483648, %v5338_v60  ;;  %v5388_v25 = vadd.f32 %v5322_v62, %v3789_v12  ;;  %3465 = vpow2.f32 %v565_v48 }
 0x14c   : > { %v2202_v20 = vsel %vm2201_vm6, %v5305_v11, %v2200_v29  ;;  %v2207_v43 = vmul.f32 %v3454_v14, %v5312_v53  ;;  %v5396_v28 = vadd.f32 %v5290_v37, %v3785_v10  ;;  %vm2229_vm1 = vcmp.eq.f32.partialorder %v5368_v22, inf }
 0x14d   : > { %v615_v18 = vadd.f32 %v5315_v58, %v591_v23  ;;  %v2205_v31 = vsel %vm2203_vm7, %v2204_v33, %v2202_v20  ;;  %3467 = vrsqrt.f32 %v5388_v25  ;;  %v2132_v6 = vrot.slane %v5378_v49, 4  ;;  %v622_v23 = vpop.permute.xlu1 %621 }
 0x14e   : > { %v2209_v40 = vsel %vm2208_vm10, %v5312_v53, %v2207_v43  ;;  %v2322_v48 = vmul.f32 -4.0, %v2205_v31  ;;  %vm2231_vm2 = vcmp.eq.f32.partialorder %v5368_v22, 0.0  ;;  %v2232_v11 = vand.u32 2147483648, %v5368_v22  ;;  %v640_v43 = vpop.permute.xlu0 %639 }
 0x14f   : > { %v3456_v29 = vpop.eup %3455  ;;  %v625_v14 = vadd.f32 %v620_v0, %v615_v18  ;;  %v2212_v58 = vsel %vm2210_vm11, %v2211_v61, %v2209_v40  ;;  %3469 = vrsqrt.f32 %v5396_v28  ;;  %vm2215_vm3 = vcmp.eq.f32.partialorder %v5388_v25, inf }
 0x150   : > { %v3458_v33 = vpop.eup %3457  ;;  %v2323_v20 = vmul.f32 -4.0, %v2212_v58  ;;  %v2347_v49 = vmul.f32 1.442695, %v2322_v48  ;;  %v2193_v42 = vmul.f32 %v3456_v29, %v5347_v35  ;;  %vm2217_vm4 = vcmp.eq.f32.partialorder %v5388_v25, 0.0 }
 0x151   : > { %v2034_v31 = vmul.f32 %v5326_v44, %v3458_v33  ;;  %v635_v59 = vadd.f32 %v630_v57, %v625_v14  ;;  %v5418_v53 = vadd.f32 %v5295_v54, %v4039_v46  ;;  %v2218_v40 = vand.u32 2147483648, %v5388_v25 }
 0x152   : > { %v3460_v61 = vpop.eup %3459  ;;  %3471 = vpow2.f32 %v2347_v49  ;;  %v2349_v0 = vmul.f32 1.442695, %v2323_v20  ;;  %v2195_v18 = vsel %vm2194_vm12, %v5347_v35, %v2193_v42  ;;  %vm2243_vm6 = vcmp.eq.f32.partialorder %v5396_v28, inf }
 0x153   : > { %v3462_v48 = vpop.eup %3461  ;;  %v2134_v29 = vrot.slane %v2034_v31, 4  ;;  %v2198_v57 = vsel %vm2196_vm13, %v2197_v45, %v2195_v18  ;;  %v2221_v14 = vmul.f32 %v3460_v61, %v5338_v60  ;;  %v5427_v58 = vadd.f32 %v640_v43, %v635_v59  ;;  %v632_v31 = vpop.permute.xlu1 %631 }
 0x154   : > { %v3464_v33 = vpop.eup %3463  ;;  %v2032_v50 = vmul.f32 %v5084_v9, %v3462_v48  ;;  %3473 = vpow2.f32 %v2349_v0  ;;  %v2321_v20 = vmul.f32 -4.0, %v2198_v57  ;;  %v2246_v0 = vand.u32 2147483648, %v5396_v28 }
 0x155   : > { %v2135_v42 = vsel %vm2038_vm9, %v2132_v6, %v2134_v29  ;;  %v2223_v49 = vsel %vm2222_vm14, %v5338_v60, %v2221_v14  ;;  %v2228_v35 = vmul.f32 %v3464_v33, %v5368_v22  ;;  %3475 = vrsqrt.f32 %v5418_v53  ;;  %v3466_v45 = vpop.eup %3465 }
 0x156   : > { %2138 = vrot.lane.b32.xlu1 %v2135_v42, %s3708_s18  ;;  %v2131_v59 = vrot.slane %v2032_v50, 4  ;;  %v2345_v43 = vmul.f32 1.442695, %v2321_v20  ;;  %v2226_v61 = vsel %vm2224_vm15, %v2225_v4, %v2223_v49  ;;  %v592_v48 = vmul.f32 %v5127_v8, %v3466_v45 }
 0x157   : > { %v3468_v18 = vpop.eup %3467  ;;  %v2230_v29 = vsel %vm2229_vm1, %v5368_v22, %v2228_v35  ;;  %v2325_v57 = vmul.f32 -4.0, %v2226_v61  ;;  %v5447_v14 = vadd.f32 %v5322_v62, %v3799_v17  ;;  %v5458_v35 = vadd.f32 %v3967_v32, %v5249_v5  ;;  %v642_v61 = vpop.permute.xlu1 %641 }
 0x158   : > { %v2133_v50 = vsel %vm2038_vm9, %v2131_v59, %v2132_v6  ;;  %3477 = vpow2.f32 %v2345_v43  ;;  %v2233_v60 = vsel %vm2231_vm2, %v2232_v11, %v2230_v29  ;;  %v2214_v4 = vmul.f32 %v3468_v18, %v5388_v25 }
 0x159   : > { %v3470_v33 = vpop.eup %3469  ;;  %2136 = vrot.lane.b32.xlu0 %v2133_v50, %s3708_s18  ;;  %v616_v20 = vadd.f32 %v5353_v47, %v592_v48  ;;  %v2326_v42 = vmul.f32 -4.0, %v2233_v60  ;;  %v2353_v49 = vmul.f32 1.442695, %v2325_v57  ;;  %3479 = vrsqrt.f32 %v5447_v14 }
 0x15a   : > { %v2216_v22 = vsel %vm2215_vm3, %v5388_v25, %v2214_v4  ;;  %v2242_v6 = vmul.f32 %v3470_v33, %v5396_v28  ;;  %vm2245_vm7 = vcmp.eq.f32.partialorder %v5396_v28, 0.0  ;;  %vm2405_vm10 = vcmask 1042432  }
 0x15b   : > { %v626_v11 = vadd.f32 %v622_v23, %v616_v20  ;;  %3481 = vpow2.f32 %v2353_v49  ;;  %v2355_v45 = vmul.f32 1.442695, %v2326_v42  ;;  %v2219_v47 = vsel %vm2217_vm4, %v2218_v40, %v2216_v22  ;;  %v650_v49 = vpop.permute.xlu0 %649 }
 0x15c   : > { %v3472_v59 = vpop.eup %3471  ;;  %v2324_v43 = vmul.f32 -4.0, %v2219_v47  ;;  %v2244_v32 = vsel %vm2243_vm6, %v5396_v28, %v2242_v6  ;;  %vm2250_vm11 = vcmp.eq.f32.partialorder %v5418_v53, inf  ;;  %v2253_v25 = vand.u32 2147483648, %v5418_v53  ;;  %v652_v47 = vpop.permute.xlu1 %651 }
 0x15d   : > { %v2385_v18 = vmul.f32 %v5127_v8, %v3472_v59  ;;  %v636_v48 = vadd.f32 %v632_v31, %v626_v11  ;;  %3483 = vpow2.f32 %v2355_v45  ;;  %v2247_v23 = vsel %vm2245_vm7, %v2246_v0, %v2244_v32 }
 0x15e   : > { %v3474_v29 = vpop.eup %3473  ;;  %v2351_v57 = vmul.f32 1.442695, %v2324_v43  ;;  %v2328_v40 = vmul.f32 -4.0, %v2247_v23  ;;  %v5475_v50 = vadd.f32 %v5290_v37, %v3828_v26  ;;  %v5480_v20 = vadd.f32 %v5295_v54, %v4156_v3 }
 0x15f   : > { %v3476_v60 = vpop.eup %3475  ;;  %v2386_v4 = vmul.f32 %v5326_v44, %v3474_v29  ;;  %v2419_v28 = vrot.slane %v2385_v18, 5  ;;  %v646_v33 = vadd.f32 %v642_v61, %v636_v48  ;;  %vm2252_vm12 = vcmp.eq.f32.partialorder %v5418_v53, 0.0 }
 0x160   : > { %3485 = vpow2.f32 %v2351_v57  ;;  %v2249_v31 = vmul.f32 %v3476_v60, %v5418_v53  ;;  %v2359_v0 = vmul.f32 1.442695, %v2328_v40  ;;  %vm2236_vm13 = vcmp.eq.f32.partialorder %v5447_v14, inf }
 0x161   : > { %v2421_v42 = vrot.slane %v2386_v4, 5  ;;  %3487 = vrsqrt.f32 %v5475_v50  ;;  %v5488_v22 = vadd.f32 %v5322_v62, %v3830_v27  ;;  %vm2238_vm14 = vcmp.eq.f32.partialorder %v5447_v14, 0.0 }
 0x162   : > { %v3478_v6 = vpop.eup %3477  ;;  %v2251_v11 = vsel %vm2250_vm11, %v5418_v53, %v2249_v31  ;;  %3489 = vpow2.f32 %v2359_v0  ;;  %v2239_v45 = vand.u32 2147483648, %v5447_v14  ;;  %v655_v23 = vadd.f32 %v650_v49, %v5427_v58 }
 0x163   : > { %v3480_v59 = vpop.eup %3479  ;;  %v2422_v43 = vsel %vm2405_vm10, %v2419_v28, %v2421_v42  ;;  %v2384_v61 = vmul.f32 %v5084_v9, %v3478_v6  ;;  %v2254_v32 = vsel %vm2252_vm12, %v2253_v25, %v2251_v11  ;;  %3491 = vrsqrt.f32 %v5480_v20 }
 0x164   : > { %2425 = vrot.lane.b32.xlu1 %v2422_v43, %s3704_s14  ;;  %v2329_v18 = vmul.f32 -4.0, %v2254_v32  ;;  %v2235_v48 = vmul.f32 %v3480_v59, %v5447_v14  ;;  %vm2264_vm15 = vcmp.eq.f32.partialorder %v5475_v50, inf  ;;  %v656_v40 = vadd.f32 %v652_v47, %v646_v33  ;;  %v3686_v33 = vld [vmem:[%s3773_s9 + $0x10] sm:$0x3f] }
 0x165   : > { %v3482_v29 = vpop.eup %3481  ;;  %v2418_v57 = vrot.slane %v2384_v61, 5  ;;  %vm2266_vm1 = vcmp.eq.f32.partialorder %v5475_v50, 0.0  ;;  %3493 = vrsqrt.f32 %v5488_v22  ;;  %v2267_v4 = vand.u32 2147483648, %v5475_v50 }
 0x166   : > { %v2388_v53 = vmul.f32 %v5127_v8, %v3482_v29  ;;  %v2361_v25 = vmul.f32 1.442695, %v2329_v18  ;;  %v2237_v60 = vsel %vm2236_vm13, %v5447_v14, %v2235_v48  ;;  %v3070_v42 = vadd.f32 3.0, %v3686_v33  ;;  %v662_v48 = vpop.permute.xlu1 %661 }
 0x167   : > { %v3484_v31 = vpop.eup %3483  ;;  %v2420_v58 = vsel %vm2405_vm10, %v2418_v57, %v2419_v28  ;;  %v2240_v0 = vsel %vm2238_vm14, %v2239_v45, %v2237_v60  ;;  %3495 = vrsqrt.f32 %v5458_v35  ;;  %vm2271_vm2 = vcmp.eq.f32.partialorder %v5480_v20, inf }
 0x168   : > { %2423 = vrot.lane.b32.xlu0 %v2420_v58, %s3704_s14  ;;  %v2389_v49 = vmul.f32 %v5326_v44, %v3484_v31  ;;  %v2435_v6 = vrot.slane %v2388_v53, 5  ;;  %3497 = vpow2.f32 %v2361_v25  ;;  %v2327_v11 = vmul.f32 -4.0, %v2240_v0 }
 0x169   : > { %vm2273_vm3 = vcmp.eq.f32.partialorder %v5480_v20, 0.0  ;;  %v2274_v28 = vand.u32 2147483648, %v5480_v20  ;;  %v5521_v47 = vmul.f32 %v3070_v42, %v3070_v42  ;;  %vm2257_vm4 = vcmp.eq.f32.partialorder %v5488_v22, inf }
 0x16a   : > { %v3486_v14 = vpop.eup %3485  ;;  %v2437_v45 = vrot.slane %v2389_v49, 5  ;;  %v2357_v59 = vmul.f32 1.442695, %v2327_v11  ;;  %vm2259_vm6 = vcmp.eq.f32.partialorder %v5488_v22, 0.0  ;;  %v2260_v32 = vand.u32 2147483648, %v5488_v22 }
 0x16b   : > { %v3488_v43 = vpop.eup %3487  ;;  %v2387_v61 = vmul.f32 %v5084_v9, %v3486_v14  ;;  %v5529_v18 = vadd.f32 %v5521_v47, %v3981_v1  ;;  %v5533_v29 = vadd.f32 %v4015_v38, %v5207_v7  ;;  %vm716_vm7 = vcmp.eq.f32.partialorder %v5458_v35, inf  ;;  %v660_v1 = vpop.permute.xlu0 %659 }
 0x16c   : > { %v3490_v57 = vpop.eup %3489  ;;  %v2438_v53 = vsel %vm2405_vm10, %v2435_v6, %v2437_v45  ;;  %3499 = vpow2.f32 %v2357_v59  ;;  %v2263_v25 = vmul.f32 %v3488_v43, %v5475_v50  ;;  %vm718_vm11 = vcmp.eq.f32.partialorder %v5458_v35, 0.0 }
 0x16d   : > { %v3492_v60 = vpop.eup %3491  ;;  %2441 = vrot.lane.b32.xlu1 %v2438_v53, %s3703_s13  ;;  %v2434_v31 = vrot.slane %v2387_v61, 5  ;;  %3501 = vrsqrt.f32 %v5529_v18  ;;  %v5543_v38 = vadd.f32 %v5290_v37, %v3863_v41  ;;  %v719_v33 = vand.u32 2147483648, %v5458_v35 }
 0x16e   : > { %v2265_v58 = vsel %vm2264_vm15, %v5475_v50, %v2263_v25  ;;  %v2270_v0 = vmul.f32 %v3492_v60, %v5480_v20  ;;  %v5550_v42 = vadd.f32 %v662_v48, %v656_v40  ;;  %v2391_v14 = vmul.f32 %v5127_v8, %v3490_v57 }
 0x16f   : > { %v3494_v49 = vpop.eup %3493  ;;  %v2436_v11 = vsel %vm2405_vm10, %v2434_v31, %v2435_v6  ;;  %v2268_v45 = vsel %vm2266_vm1, %v2267_v4, %v2265_v58  ;;  %3503 = vrsqrt.f32 %v5533_v29  ;;  %v5562_v61 = vadd.f32 %v660_v1, %v655_v23 }
 0x170   : > { %2439 = vrot.lane.b32.xlu0 %v2436_v11, %s3703_s13  ;;  %v2272_v59 = vsel %vm2271_vm2, %v5480_v20, %v2270_v0  ;;  %v2331_v43 = vmul.f32 -4.0, %v2268_v45  ;;  %v2256_v40 = vmul.f32 %v3494_v49, %v5488_v22  ;;  %vm723_vm12 = vcmp.eq.f32.partialorder %v5529_v18, inf }
 0x171   : > { %v3496_v48 = vpop.eup %3495  ;;  %v2275_v6 = vsel %vm2273_vm3, %v2274_v28, %v2272_v59  ;;  %vm709_vm13 = vcmp.eq.f32.partialorder %v5533_v29, inf  ;;  %v5570_v50 = vadd.f32 %v5295_v54, %v4213_v34  ;;  %3505 = vrsqrt.f32 %v5543_v38 }
 0x172   : > { %v3498_v4 = vpop.eup %3497  ;;  %v2332_v57 = vmul.f32 -4.0, %v2275_v6  ;;  %v2365_v53 = vmul.f32 1.442695, %v2331_v43  ;;  %v2258_v23 = vsel %vm2257_vm4, %v5488_v22, %v2256_v40  ;;  %v715_v20 = vmul.f32 %v3496_v48, %v5458_v35 }
 0x173   : > { %v2392_v28 = vmul.f32 %v5326_v44, %v3498_v4  ;;  %v2451_v25 = vrot.slane %v2391_v14, 5  ;;  %v2261_v60 = vsel %vm2259_vm6, %v2260_v32, %v2258_v23  ;;  %vm725_vm14 = vcmp.eq.f32.partialorder %v5529_v18, 0.0 }
 0x174   : > { %3507 = vpow2.f32 %v2365_v53  ;;  %v2367_v31 = vmul.f32 1.442695, %v2332_v57  ;;  %v2330_v1 = vmul.f32 -4.0, %v2261_v60  ;;  %v717_v58 = vsel %vm716_vm7, %v5458_v35, %v715_v20 }
 0x175   : > { %v2453_v0 = vrot.slane %v2392_v28, 5  ;;  %v720_v49 = vsel %vm718_vm11, %v719_v33, %v717_v58  ;;  %v726_v11 = vand.u32 2147483648, %v5529_v18  ;;  %3509 = vrsqrt.f32 %v5570_v50 }
 0x176   : > { %v3500_v14 = vpop.eup %3499  ;;  %3511 = vpow2.f32 %v2367_v31  ;;  %v2363_v22 = vmul.f32 1.442695, %v2330_v1  ;;  %v855_v32 = vmul.f32 -4.0, %v720_v49  ;;  %vm711_vm15 = vcmp.eq.f32.partialorder %v5533_v29, 0.0 }
 0x177   : > { %v3502_v45 = vpop.eup %3501  ;;  %v2454_v59 = vsel %vm2405_vm10, %v2451_v25, %v2453_v0  ;;  %v2390_v43 = vmul.f32 %v5084_v9, %v3500_v14  ;;  %v712_v40 = vand.u32 2147483648, %v5533_v29  ;;  %vm2285_vm1 = vcmp.eq.f32.partialorder %v5543_v38, inf }
 0x178   : > { %2457 = vrot.lane.b32.xlu1 %v2454_v59, %s3705_s15  ;;  %3513 = vpow2.f32 %v2363_v22  ;;  %v722_v35 = vmul.f32 %v3502_v45, %v5529_v18  ;;  %v877_v33 = vmul.f32 1.442695, %v855_v32  ;;  %v5597_v48 = vadd.f32 %v5322_v62, %v3882_v51 }
 0x179   : > { %v3504_v6 = vpop.eup %3503  ;;  %v2450_v4 = vrot.slane %v2390_v43, 5  ;;  %vm2287_vm2 = vcmp.eq.f32.partialorder %v5543_v38, 0.0  ;;  %v2288_v9 = vand.u32 2147483648, %v5543_v38  ;;  %v5603_v57 = vadd.f32 %v5290_v37, %v3884_v52 }
 0x17a   : > { %v724_v53 = vsel %vm723_vm12, %v5529_v18, %v722_v35  ;;  %3515 = vpow2.f32 %v877_v33  ;;  %v708_v23 = vmul.f32 %v3504_v6, %v5533_v29  ;;  %vm2292_vm3 = vcmp.eq.f32.partialorder %v5570_v50, inf }
 0x17b   : > { %v3506_v20 = vpop.eup %3505  ;;  %v2452_v28 = vsel %vm2405_vm10, %v2450_v4, %v2451_v25  ;;  %v727_v60 = vsel %vm725_vm14, %v726_v11, %v724_v53  ;;  %3517 = vrsqrt.f32 %v5597_v48  ;;  %v5616_v31 = vadd.f32 %v5295_v54, %v4271_v36 }
 0x17c   : > { %2455 = vrot.lane.b32.xlu0 %v2452_v28, %s3705_s15  ;;  %v856_v1 = vmul.f32 -4.0, %v727_v60  ;;  %v710_v58 = vsel %vm709_vm13, %v5533_v29, %v708_v23  ;;  %v2284_v0 = vmul.f32 %v3506_v20, %v5543_v38  ;;  %vm2294_vm4 = vcmp.eq.f32.partialorder %v5570_v50, 0.0  ;;  %v5650_v20 = vld [vmem:[%s3950_s12] sm:$0xff] }
 0x17d   : > { %v713_v18 = vsel %vm711_vm15, %v712_v40, %v710_v58  ;;  %v2295_v25 = vand.u32 2147483648, %v5570_v50  ;;  %3519 = vrsqrt.f32 %v5603_v57  ;;  %v5630_v49 = vadd.f32 %v5322_v62, %v3891_v56 }
 0x17e   : > { %v3508_v11 = vpop.eup %3507  ;;  %v879_v14 = vmul.f32 1.442695, %v856_v1  ;;  %v854_v22 = vmul.f32 -4.0, %v713_v18  ;;  %v2286_v32 = vsel %vm2285_vm1, %v5543_v38, %v2284_v0  ;;  %vm2278_vm6 = vcmp.eq.f32.partialorder %v5597_v48, inf }
 0x17f   : > { %v3510_v45 = vpop.eup %3509  ;;  %v2394_v29 = vmul.f32 %v5127_v8, %v3508_v11  ;;  %v2289_v59 = vsel %vm2287_vm2, %v2288_v9, %v2286_v32  ;;  %vm2280_vm7 = vcmp.eq.f32.partialorder %v5597_v48, 0.0  ;;  %3521 = vrsqrt.f32 %v5616_v31 }
 0x180   : > { %v3512_v43 = vpop.eup %3511  ;;  %3523 = vpow2.f32 %v879_v14  ;;  %v875_v40 = vmul.f32 1.442695, %v854_v22  ;;  %v2291_v35 = vmul.f32 %v3510_v45, %v5570_v50  ;;  %v2334_v33 = vmul.f32 -4.0, %v2289_v59  ;;  %v3688_v22 = vld [vmem:[%s3767_s29 + $0x8] sm:$0xff]  ;;  %v3690_v59 = vld [vmem:[%s3767_s29 + $0x10] sm:$0x3f] }
 0x181   : > { %v2395_v6 = vmul.f32 %v5326_v44, %v3512_v43  ;;  %v2467_v4 = vrot.slane %v2394_v29, 5  ;;  %v2281_v53 = vand.u32 2147483648, %v5597_v48  ;;  %vm2306_vm11 = vcmp.eq.f32.partialorder %v5603_v57, inf }
 0x182   : > { %v3514_v8 = vpop.eup %3513  ;;  %3525 = vpow2.f32 %v875_v40  ;;  %v2293_v38 = vsel %vm2292_vm3, %v5570_v50, %v2291_v35  ;;  %v2371_v9 = vmul.f32 1.442695, %v2334_v33  ;;  %vm2308_vm12 = vcmp.eq.f32.partialorder %v5603_v57, 0.0  ;;  %v5663_v50 = vld [vmem:[%s3950_s12 + $0x8] sm:$0xff] }
 0x183   : > { %v2469_v23 = vrot.slane %v2395_v6, 5  ;;  %v2393_v28 = vmul.f32 %v5650_v20, %v3514_v8  ;;  %v2296_v60 = vsel %vm2294_vm4, %v2295_v25, %v2293_v38  ;;  %3527 = vrsqrt.f32 %v5630_v49 }
 0x184   : > { %v3516_v1 = vpop.eup %3515  ;;  %v2335_v58 = vmul.f32 -4.0, %v2296_v60  ;;  %3529 = vpow2.f32 %v2371_v9  ;;  %v2309_v0 = vand.u32 2147483648, %v5603_v57  ;;  %vm2313_vm13 = vcmp.eq.f32.partialorder %v5616_v31, inf }
 0x185   : > { %v3518_v18 = vpop.eup %3517  ;;  %v2470_v11 = vsel %vm2405_vm10, %v2467_v4, %v2469_v23  ;;  %v2466_v14 = vrot.slane %v2393_v28, 5  ;;  %vm2315_vm14 = vcmp.eq.f32.partialorder %v5616_v31, 0.0  ;;  %v3086_v32 = vadd.f32 -3.0, %v3688_v22 }
 0x186   : > { %2473 = vrot.lane.b32.xlu1 %v2470_v11, %s3706_s16  ;;  %v918_v25 = vmul.f32 %v5663_v50, %v3516_v1  ;;  %v2373_v45 = vmul.f32 1.442695, %v2335_v58  ;;  %v2277_v29 = vmul.f32 %v3518_v18, %v5597_v48  ;;  %v3087_v43 = vadd.f32 -3.0, %v3690_v59 }
 0x187   : > { %v3520_v40 = vpop.eup %3519  ;;  %v2468_v35 = vsel %vm2405_vm10, %v2466_v14, %v2467_v4  ;;  %v2316_v33 = vand.u32 2147483648, %v5616_v31  ;;  %vm2299_vm15 = vcmp.eq.f32.partialorder %v5630_v49, inf  ;;  %v5671_v6 = vmul.f32 %v3086_v32, %v3086_v32 }
 0x188   : > { %2471 = vrot.lane.b32.xlu0 %v2468_v35, %s3706_s16  ;;  %3531 = vpow2.f32 %v2373_v45  ;;  %v2279_v8 = vsel %vm2278_vm6, %v5597_v48, %v2277_v29  ;;  %v2305_v38 = vmul.f32 %v3520_v40, %v5603_v57  ;;  %v5678_v9 = vmul.f32 %v3087_v43, %v3087_v43 }
 0x189   : > { %v3522_v23 = vpop.eup %3521  ;;  %v2282_v4 = vsel %vm2280_vm7, %v2281_v53, %v2279_v8  ;;  %vm2301_vm1 = vcmp.eq.f32.partialorder %v5630_v49, 0.0  ;;  %v5685_v28 = vadd.f32 %v5671_v6, %v3797_v16  ;;  %v3085_v60 = vadd.f32 -3.0, %v5298_v55 }
 0x18a   : > { %v3524_v1 = vpop.eup %3523  ;;  %v943_v58 = vrot.slane %v918_v25, 1  ;;  %v2333_v18 = vmul.f32 -4.0, %v2282_v4  ;;  %v2307_v11 = vsel %vm2306_vm11, %v5603_v57, %v2305_v38  ;;  %v2312_v14 = vmul.f32 %v3522_v23, %v5616_v31 }
 0x18b   : > { %v919_v48 = vmul.f32 %v5326_v44, %v3524_v1  ;;  %v2310_v53 = vsel %vm2308_vm12, %v2309_v0, %v2307_v11  ;;  %v5697_v16 = vadd.f32 %v5678_v9, %v4003_v30  ;;  %3533 = vrsqrt.f32 %v5685_v28  ;;  %v5712_v1 = vpop.permute.xlu1 %961 }
 0x18c   : > { %v3526_v55 = vpop.eup %3525  ;;  %v2369_v22 = vmul.f32 1.442695, %v2333_v18  ;;  %v2314_v32 = vsel %vm2313_vm13, %v5616_v31, %v2312_v14  ;;  %v2337_v25 = vmul.f32 -4.0, %v2310_v53  ;;  %v2302_v45 = vand.u32 2147483648, %v5630_v49 }
 0x18d   : > { %v3528_v29 = vpop.eup %3527  ;;  %v945_v59 = vrot.slane %v919_v48, 1  ;;  %v917_v57 = vmul.f32 %v5650_v20, %v3526_v55  ;;  %v2317_v0 = vsel %vm2315_vm14, %v2316_v33, %v2314_v32  ;;  %v5707_v30 = vmul.f32 %v3085_v60, %v3085_v60 }
 0x18e   : > { %v3530_v43 = vpop.eup %3529  ;;  %3535 = vpow2.f32 %v2369_v22  ;;  %v2338_v40 = vmul.f32 -4.0, %v2317_v0  ;;  %v2377_v35 = vmul.f32 1.442695, %v2337_v25  ;;  %v2298_v8 = vmul.f32 %v3528_v29, %v5630_v49  ;;  %v5728_v22 = vpop.permute.xlu0 %959 }
 0x18f   : > { %v946_v38 = vsel %vm941_vm8, %v943_v58, %v945_v59  ;;  %v942_v23 = vrot.slane %v917_v57, 1  ;;  %v2397_v4 = vmul.f32 %v5663_v50, %v3530_v43  ;;  %3537 = vrsqrt.f32 %v5697_v16 }
 0x190   : > { %v5716_v31 = vadd.f32 %v946_v38, %v5550_v42  ;;  %3539 = vpow2.f32 %v2377_v35  ;;  %v2379_v33 = vmul.f32 1.442695, %v2338_v40  ;;  %v2300_v60 = vsel %vm2299_vm15, %v5630_v49, %v2298_v8 }
 0x191   : > { %v944_v18 = vsel %vm941_vm8, %v942_v23, %v943_v58  ;;  %v2303_v11 = vsel %vm2301_vm1, %v2302_v45, %v2300_v60  ;;  %v2483_v55 = vrot.slane %v2397_v4, 5  ;;  %v5732_v32 = vadd.f32 %v5707_v30, %v3791_v13  ;;  %v5739_v45 = vpop.permute.xlu1 %977 }
 0x192   : > { %v3532_v14 = vpop.eup %3531  ;;  %v5725_v48 = vadd.f32 %v944_v18, %v5562_v61  ;;  %3541 = vpow2.f32 %v2379_v33  ;;  %v2336_v53 = vmul.f32 -4.0, %v2303_v11  ;;  %v5736_v58 = vadd.f32 %v5671_v6, %v3795_v15  ;;  %v5755_v40 = vpop.permute.xlu0 %975 }
 0x193   : > { %v2398_v42 = vmul.f32 %v5326_v44, %v3532_v14  ;;  %vm2568_vm8 = vcmp.eq.f32.partialorder %v5685_v28, inf  ;;  %v2571_v29 = vand.u32 2147483648, %v5685_v28  ;;  %3543 = vrsqrt.f32 %v5732_v32 }
 0x194   : > { %v2375_v49 = vmul.f32 1.442695, %v2336_v53  ;;  %v5745_v59 = vadd.f32 %v5678_v9, %v4017_v39  ;;  %vm2570_vm2 = vcmp.eq.f32.partialorder %v5685_v28, 0.0  ;;  %vm2575_vm3 = vcmp.eq.f32.partialorder %v5697_v16, inf }
 0x195   : > { %v3534_v61 = vpop.eup %3533  ;;  %v2485_v25 = vrot.slane %v2398_v42, 5  ;;  %v2578_v8 = vand.u32 2147483648, %v5697_v16  ;;  %vm2577_vm4 = vcmp.eq.f32.partialorder %v5697_v16, 0.0  ;;  %v5762_v60 = vpop.permute.xlu1 %993  ;;  %v5766_v18 = vadd.f32 %v5707_v30, %v3789_v12 }
 0x196   : > { %3545 = vpow2.f32 %v2375_v49  ;;  %v2567_v13 = vmul.f32 %v3534_v61, %v5685_v28  ;;  %v5773_v42 = vadd.f32 %v5671_v6, %v3785_v10  ;;  %vm2561_vm6 = vcmp.eq.f32.partialorder %v5732_v32, inf  ;;  %v5781_v10 = vpop.permute.xlu0 %991 }
 0x197   : > { %v2486_v15 = vsel %vm2405_vm10, %v2483_v55, %v2485_v25  ;;  %3547 = vrsqrt.f32 %v5736_v58  ;;  %vm2563_vm7 = vcmp.eq.f32.partialorder %v5732_v32, 0.0  ;;  %vm2589_vm11 = vcmp.eq.f32.partialorder %v5736_v58, inf }
 0x198   : > { %v3536_v57 = vpop.eup %3535  ;;  %2489 = vrot.lane.b32.xlu1 %v2486_v15, %s3707_s17  ;;  %v2569_v0 = vsel %vm2568_vm8, %v5685_v28, %v2567_v13  ;;  %3549 = vrsqrt.f32 %v5745_v59  ;;  %v2564_v15 = vand.u32 2147483648, %v5732_v32  ;;  %vm2591_vm12 = vcmp.eq.f32.partialorder %v5736_v58, 0.0 }
 0x199   : > { %v3538_v43 = vpop.eup %3537  ;;  %v2396_v39 = vmul.f32 %v5650_v20, %v3536_v57  ;;  %v2572_v35 = vsel %vm2570_vm2, %v2571_v29, %v2569_v0  ;;  %vm2596_vm13 = vcmp.eq.f32.partialorder %v5745_v59, inf  ;;  %vm2598_vm14 = vcmp.eq.f32.partialorder %v5745_v59, 0.0 }
 0x19a   : > { %v3540_v38 = vpop.eup %3539  ;;  %v2574_v23 = vmul.f32 %v3538_v43, %v5697_v16  ;;  %v2689_v4 = vmul.f32 -4.0, %v2572_v35  ;;  %vm2772_vm15 = vcmask 1041408   ;;  %vm2582_vm1 = vcmp.eq.f32.partialorder %v5766_v18, inf }
 0x19b   : > { %v2482_v33 = vrot.slane %v2396_v39, 5  ;;  %v2400_v28 = vmul.f32 %v5663_v50, %v3540_v38  ;;  %v5795_v38 = vpop.permute.xlu1 %1009  ;;  %vm2584_vm8 = vcmp.eq.f32.partialorder %v5766_v18, 0.0  ;;  %vm2610_vm2 = vcmp.eq.f32.partialorder %v5773_v42, inf }
 0x19c   : > { %v3542_v11 = vpop.eup %3541  ;;  %v2576_v14 = vsel %vm2575_vm3, %v5697_v16, %v2574_v23  ;;  %v2714_v53 = vmul.f32 1.442695, %v2689_v4  ;;  %vm2612_vm3 = vcmp.eq.f32.partialorder %v5773_v42, 0.0 }
 0x19d   : > { %v2484_v49 = vsel %vm2405_vm10, %v2482_v33, %v2483_v55  ;;  %v2401_v61 = vmul.f32 %v5326_v44, %v3542_v11  ;;  %v2499_v25 = vrot.slane %v2400_v28, 5  ;;  %v2579_v29 = vsel %vm2577_vm4, %v2578_v8, %v2576_v14  ;;  %v3544_v16 = vpop.eup %3543 }
 0x19e   : > { %2487 = vrot.lane.b32.xlu0 %v2484_v49, %s3707_s17  ;;  %v2690_v12 = vmul.f32 -4.0, %v2579_v29  ;;  %3551 = vpow2.f32 %v2714_v53  ;;  %v5786_v44 = vadd.f32 %v5678_v9, %v4039_v46  ;;  %v2560_v0 = vmul.f32 %v3544_v16, %v5732_v32 }
 0x19f   : > { %v2501_v13 = vrot.slane %v2401_v61, 5  ;;  %3553 = vrsqrt.f32 %v5766_v18  ;;  %v2592_v8 = vand.u32 2147483648, %v5736_v58  ;;  %v2599_v11 = vand.u32 2147483648, %v5745_v59 }
 0x1a0   : > { %v3546_v55 = vpop.eup %3545  ;;  %v2716_v57 = vmul.f32 1.442695, %v2690_v12  ;;  %3555 = vrsqrt.f32 %v5773_v42  ;;  %v2562_v46 = vsel %vm2561_vm6, %v5732_v32, %v2560_v0  ;;  %v5815_v32 = vpop.permute.xlu0 %1007  ;;  %v5819_v12 = vadd.f32 %v5707_v30, %v3799_v17 }
 0x1a1   : > { %v3548_v43 = vpop.eup %3547  ;;  %v2502_v39 = vsel %vm2405_vm10, %v2499_v25, %v2501_v13  ;;  %v2399_v35 = vmul.f32 %v5650_v20, %v3546_v55  ;;  %v2565_v28 = vsel %vm2563_vm7, %v2564_v15, %v2562_v46  ;;  %v5829_v17 = vpop.permute.xlu1 %1025  ;;  %vm2617_vm4 = vcmp.eq.f32.partialorder %v5786_v44, inf }
 0x1a2   : > { %2505 = vrot.lane.b32.xlu1 %v2502_v39, %s3708_s18  ;;  %3557 = vpow2.f32 %v2716_v57  ;;  %v2588_v23 = vmul.f32 %v3548_v43, %v5736_v58  ;;  %v3550_v4 = vpop.eup %3549  ;;  %v2688_v14 = vmul.f32 -4.0, %v2565_v28  ;;  %v5838_v39 = vadd.f32 %v5671_v6, %v3828_v26 }
 0x1a3   : > { %v2498_v33 = vrot.slane %v2399_v35, 5  ;;  %3559 = vrsqrt.f32 %v5786_v44  ;;  %v2595_v49 = vmul.f32 %v3550_v4, %v5745_v59  ;;  %v5842_v35 = vadd.f32 %v5678_v9, %v4156_v3 }
 0x1a4   : > { %v2590_v53 = vsel %vm2589_vm11, %v5736_v58, %v2588_v23  ;;  %v2712_v16 = vmul.f32 1.442695, %v2688_v14  ;;  %v2585_v58 = vand.u32 2147483648, %v5766_v18  ;;  %3561 = vrsqrt.f32 %v5819_v12  ;;  %v5849_v26 = vpop.permute.xlu0 %1023 }
 0x1a5   : > { %v2500_v61 = vsel %vm2405_vm10, %v2498_v33, %v2499_v25  ;;  %v2593_v29 = vsel %vm2591_vm12, %v2592_v8, %v2590_v53  ;;  %v2597_v13 = vsel %vm2596_vm13, %v5745_v59, %v2595_v49  ;;  %v2613_v4 = vand.u32 2147483648, %v5773_v42 }
 0x1a6   : > { %2503 = vrot.lane.b32.xlu0 %v2500_v61, %s3708_s18  ;;  %v2692_v15 = vmul.f32 -4.0, %v2593_v29  ;;  %v2600_v25 = vsel %vm2598_vm14, %v2599_v11, %v2597_v13  ;;  %3563 = vpow2.f32 %v2712_v16  ;;  %v2620_v28 = vand.u32 2147483648, %v5786_v44  ;;  %v5861_v61 = vld [vmem:[%s3950_s12 + $0x10] sm:$0x3f] }
 0x1a7   : > { %v2693_v57 = vmul.f32 -4.0, %v2600_v25  ;;  %v5858_v53 = vadd.f32 %v5707_v30, %v3830_v27  ;;  %vm2619_vm6 = vcmp.eq.f32.partialorder %v5786_v44, 0.0  ;;  %vm2603_vm7 = vcmp.eq.f32.partialorder %v5819_v12, inf }
 0x1a8   : > { %v3552_v55 = vpop.eup %3551  ;;  %v2720_v0 = vmul.f32 1.442695, %v2692_v15  ;;  %v5870_v15 = vpop.permute.xlu1 %1041  ;;  %vm2605_vm11 = vcmp.eq.f32.partialorder %v5819_v12, 0.0  ;;  %vm2631_vm12 = vcmp.eq.f32.partialorder %v5838_v39, inf  ;;  %vm2633_vm13 = vcmp.eq.f32.partialorder %v5838_v39, 0.0 }
 0x1a9   : > { %v3554_v43 = vpop.eup %3553  ;;  %v5833_v59 = vmul.f32 %v5663_v50, %v3552_v55  ;;  %v2722_v46 = vmul.f32 1.442695, %v2693_v57  ;;  %vm2638_vm14 = vcmp.eq.f32.partialorder %v5842_v35, inf }
 0x1aa   : > { %v3556_v8 = vpop.eup %3555  ;;  %3565 = vpow2.f32 %v2720_v0  ;;  %v2581_v23 = vmul.f32 %v3554_v43, %v5766_v18 }
 0x1ab   : > { %v2609_v33 = vmul.f32 %v3556_v8, %v5773_v42  ;;  %3567 = vrsqrt.f32 %v5838_v39  ;;  %v2786_v11 = vrot.slane %v5833_v59, 6 }
 0x1ac   : > { %v3558_v3 = vpop.eup %3557  ;;  %3569 = vpow2.f32 %v2722_v46  ;;  %v2583_v14 = vsel %vm2582_vm1, %v5766_v18, %v2581_v23  ;;  %v2606_v46 = vand.u32 2147483648, %v5819_v12  ;;  %v5883_v23 = vpop.permute.xlu0 %1039  ;;  %vm2640_vm1 = vcmp.eq.f32.partialorder %v5842_v35, 0.0 }
 0x1ad   : > { %v3560_v49 = vpop.eup %3559  ;;  %v2753_v29 = vmul.f32 %v5861_v61, %v3558_v3  ;;  %v2586_v16 = vsel %vm2584_vm8, %v2585_v58, %v2583_v14  ;;  %v2611_v13 = vsel %vm2610_vm2, %v5773_v42, %v2609_v33  ;;  %3571 = vrsqrt.f32 %v5842_v35  ;;  %v5889_v14 = vpop.permute.xlu1 %1327 }
 0x1ae   : > { %v2691_v25 = vmul.f32 -4.0, %v2586_v16  ;;  %v2614_v27 = vsel %vm2612_vm3, %v2613_v4, %v2611_v13  ;;  %v2616_v55 = vmul.f32 %v3560_v49, %v5786_v44  ;;  %3573 = vrsqrt.f32 %v5858_v53  ;;  %v3562_v43 = vpop.eup %3561 }
 0x1af   : > { %v2788_v57 = vrot.slane %v2753_v29, 6  ;;  %v2695_v0 = vmul.f32 -4.0, %v2614_v27  ;;  %vm2624_vm8 = vcmp.eq.f32.partialorder %v5858_v53, inf  ;;  %vm2626_vm2 = vcmp.eq.f32.partialorder %v5858_v53, 0.0 }
 0x1b0   : > { %v2718_v18 = vmul.f32 1.442695, %v2691_v25  ;;  %v2618_v58 = vsel %vm2617_vm4, %v5786_v44, %v2616_v55  ;;  %v3564_v4 = vpop.eup %3563  ;;  %v2602_v44 = vmul.f32 %v3562_v43, %v5819_v12  ;;  %v2634_v55 = vand.u32 2147483648, %v5838_v39 }
 0x1b1   : > { %v2789_v59 = vsel %vm2772_vm15, %v2786_v11, %v2788_v57  ;;  %v2621_v42 = vsel %vm2619_vm6, %v2620_v28, %v2618_v58  ;;  %v2726_v8 = vmul.f32 1.442695, %v2695_v0  ;;  %v2751_v3 = vmul.f32 %v5650_v20, %v3564_v4 }
 0x1b2   : > { %2792 = vrot.lane.b32.xlu1 %v2789_v59, %s3704_s14  ;;  %3575 = vpow2.f32 %v2718_v18  ;;  %v2696_v33 = vmul.f32 -4.0, %v2621_v42  ;;  %v2604_v29 = vsel %vm2603_vm7, %v5819_v12, %v2602_v44  ;;  %v2641_v42 = vand.u32 2147483648, %v5842_v35 }
 0x1b3   : > { %3577 = vpow2.f32 %v2726_v8  ;;  %v2785_v13 = vrot.slane %v2751_v3, 6  ;;  %v2607_v27 = vsel %vm2605_vm11, %v2606_v46, %v2604_v29  ;;  %v5903_v8 = vpop.permute.xlu0 %1325  ;;  %v5914_v3 = vpop.permute.xlu1 %1343 }
 0x1b4   : > { %v3566_v28 = vpop.eup %3565  ;;  %v2728_v49 = vmul.f32 1.442695, %v2696_v33  ;;  %v2694_v0 = vmul.f32 -4.0, %v2607_v27 }
 0x1b5   : > { %v3568_v16 = vpop.eup %3567  ;;  %v2755_v25 = vmul.f32 %v5663_v50, %v3566_v28  ;;  %v2787_v12 = vsel %vm2772_vm15, %v2785_v13, %v2786_v11 }
 0x1b6   : > { %v3570_v57 = vpop.eup %3569  ;;  %3579 = vpow2.f32 %v2728_v49  ;;  %v2630_v18 = vmul.f32 %v3568_v16, %v5838_v39  ;;  %2790 = vrot.lane.b32.xlu0 %v2787_v12, %s3704_s14  ;;  %v2724_v46 = vmul.f32 1.442695, %v2694_v0  ;;  %v2627_v16 = vand.u32 2147483648, %v5858_v53 }
 0x1b7   : > { %v3572_v58 = vpop.eup %3571  ;;  %v2756_v43 = vmul.f32 %v5861_v61, %v3570_v57  ;;  %v2802_v59 = vrot.slane %v2755_v25, 6 }
 0x1b8   : > { %v2632_v4 = vsel %vm2631_vm12, %v5838_v39, %v2630_v18  ;;  %v2637_v33 = vmul.f32 %v3572_v58, %v5842_v35  ;;  %v3574_v28 = vpop.eup %3573  ;;  %3581 = vpow2.f32 %v2724_v46  ;;  %v5928_v58 = vpop.permute.xlu0 %1341 }
 0x1b9   : > { %v2804_v44 = vrot.slane %v2756_v43, 6  ;;  %v2635_v11 = vsel %vm2633_vm13, %v2634_v55, %v2632_v4  ;;  %v2623_v27 = vmul.f32 %v3574_v28, %v5858_v53 }
 0x1ba   : > { %v2639_v49 = vsel %vm2638_vm14, %v5842_v35, %v2637_v33  ;;  %v2698_v29 = vmul.f32 -4.0, %v2635_v11  ;;  %v5933_v33 = vadd.f32 %v5671_v6, %v3863_v41  ;;  %v5947_v41 = vadd.f32 %v5707_v30, %v3882_v51 }
 0x1bb   : > { %v2805_v13 = vsel %vm2772_vm15, %v2802_v59, %v2804_v44  ;;  %v2642_v25 = vsel %vm2640_vm1, %v2641_v42, %v2639_v49  ;;  %v2625_v35 = vsel %vm2624_vm8, %v5858_v53, %v2623_v27  ;;  %v5935_v44 = vpop.permute.xlu1 %1359  ;;  %v5939_v53 = vadd.f32 %v5678_v9, %v4213_v34 }
 0x1bc   : > { %v3576_v39 = vpop.eup %3575  ;;  %2808 = vrot.lane.b32.xlu1 %v2805_v13, %s3703_s13  ;;  %v2699_v55 = vmul.f32 -4.0, %v2642_v25  ;;  %v2732_v57 = vmul.f32 1.442695, %v2698_v29  ;;  %v2628_v42 = vsel %vm2626_vm2, %v2627_v16, %v2625_v35  ;;  %v5949_v25 = vpop.permute.xlu0 %1357  ;;  %v5963_v51 = vadd.f32 %v4323_v19, %v5521_v47 }
 0x1bd   : > { %v3578_v0 = vpop.eup %3577  ;;  %v2754_v18 = vmul.f32 %v5650_v20, %v3576_v39  ;;  %v2697_v4 = vmul.f32 -4.0, %v2628_v42  ;;  %v5956_v39 = vadd.f32 %v4321_v21, %v5249_v5  ;;  %vm2652_vm3 = vcmp.eq.f32.partialorder %v5933_v33, inf }
 0x1be   : > { %v2758_v12 = vmul.f32 %v5663_v50, %v3578_v0  ;;  %3583 = vpow2.f32 %v2732_v57  ;;  %v2734_v43 = vmul.f32 1.442695, %v2699_v55  ;;  %vm2654_vm4 = vcmp.eq.f32.partialorder %v5933_v33, 0.0 }
 0x1bf   : > { %v2801_v46 = vrot.slane %v2754_v18, 6  ;;  %v2730_v16 = vmul.f32 1.442695, %v2697_v4  ;;  %v5958_v55 = vpop.permute.xlu1 %1375  ;;  %v5968_v18 = vadd.f32 %v5671_v6, %v3884_v52  ;;  %vm2659_vm6 = vcmp.eq.f32.partialorder %v5939_v53, inf }
 0x1c0   : > { %v3580_v11 = vpop.eup %3579  ;;  %3585 = vpow2.f32 %v2734_v43  ;;  %v2818_v29 = vrot.slane %v2758_v12, 6  ;;  %v5975_v12 = vadd.f32 %v5678_v9, %v4271_v36  ;;  %v5977_v19 = vpop.permute.xlu0 %1373  ;;  %v2655_v36 = vand.u32 2147483648, %v5933_v33 }
 0x1c1   : > { %v2803_v28 = vsel %vm2772_vm15, %v2801_v46, %v2802_v59  ;;  %v2759_v49 = vmul.f32 %v5861_v61, %v3580_v11  ;;  %3587 = vrsqrt.f32 %v5933_v33  ;;  %v5987_v11 = vadd.f32 %v4327_v2, %v5207_v7 }
 0x1c2   : > { %2806 = vrot.lane.b32.xlu0 %v2803_v28, %s3703_s13  ;;  %3589 = vpow2.f32 %v2730_v16  ;;  %v3582_v34 = vpop.eup %3581  ;;  %vm2661_vm7 = vcmp.eq.f32.partialorder %v5939_v53, 0.0  ;;  %v2662_v2 = vand.u32 2147483648, %v5939_v53  ;;  %vm2645_vm11 = vcmp.eq.f32.partialorder %v5947_v41, inf }
 0x1c3   : > { %v2820_v13 = vrot.slane %v2759_v49, 6  ;;  %3591 = vrsqrt.f32 %v5939_v53  ;;  %v2757_v27 = vmul.f32 %v5650_v20, %v3582_v34  ;;  %v5983_v46 = vpop.permute.xlu1 %1391  ;;  %v6000_v34 = vadd.f32 %v5707_v30, %v3891_v56 }
 0x1c4   : > { %3593 = vrsqrt.f32 %v5947_v41  ;;  %vm2647_vm12 = vcmp.eq.f32.partialorder %v5947_v41, 0.0  ;;  %vm2673_vm13 = vcmp.eq.f32.partialorder %v5968_v18, inf  ;;  %vm2675_vm14 = vcmp.eq.f32.partialorder %v5968_v18, 0.0 }
 0x1c5   : > { %v2821_v59 = vsel %vm2772_vm15, %v2818_v29, %v2820_v13  ;;  %v2817_v57 = vrot.slane %v2757_v27, 6  ;;  %3595 = vrsqrt.f32 %v5956_v39  ;;  %vm2680_vm1 = vcmp.eq.f32.partialorder %v5975_v12, inf }
 0x1c6   : > { %2824 = vrot.lane.b32.xlu1 %v2821_v59, %s3705_s15  ;;  %3597 = vrsqrt.f32 %v5963_v51  ;;  %vm2682_vm8 = vcmp.eq.f32.partialorder %v5975_v12, 0.0  ;;  %vm2666_vm2 = vcmp.eq.f32.partialorder %v6000_v34, inf }
 0x1c7   : > { %v2819_v35 = vsel %vm2772_vm15, %v2817_v57, %v2818_v29  ;;  %3599 = vrsqrt.f32 %v5968_v18 }
 0x1c8   : > { %v3584_v0 = vpop.eup %3583  ;;  %2822 = vrot.lane.b32.xlu0 %v2819_v35, %s3705_s15  ;;  %3601 = vrsqrt.f32 %v5975_v12  ;;  %s374_s15 = scalar_lea.vmem %s6387_s6, %s6414_s25 }
 0x1c9   : > { %v2761_v21 = vmul.f32 %v5663_v50, %v3584_v0  ;;  %v6006_v0 = vpop.permute.xlu0 %1389  ;;  %3603 = vrsqrt.f32 %v6000_v34 }
 0x1ca   : > { %v3586_v43 = vpop.eup %3585  ;;  %3605 = vrsqrt.f32 %v5987_v11 }
 0x1cb   : > { %v2762_v52 = vmul.f32 %v5861_v61, %v3586_v43  ;;  %v2834_v42 = vrot.slane %v2761_v21, 6  ;;  %v3588_v4 = vpop.eup %3587 }
 0x1cc   : > { %v3590_v28 = vpop.eup %3589  ;;  %v2651_v29 = vmul.f32 %v3588_v4, %v5933_v33 }
 0x1cd   : > { %v2836_v49 = vrot.slane %v2762_v52, 6  ;;  %v3592_v16 = vpop.eup %3591  ;;  %v2760_v13 = vmul.f32 %v5650_v20, %v3590_v28  ;;  %v2648_v52 = vand.u32 2147483648, %v5947_v41  ;;  %v6016_v28 = vpop.permute.xlu1 %1407 }
 0x1ce   : > { %v2653_v27 = vsel %vm2652_vm3, %v5933_v33, %v2651_v29  ;;  %v2658_v57 = vmul.f32 %v3592_v16, %v5939_v53  ;;  %v3594_v35 = vpop.eup %3593  ;;  %vm2668_vm3 = vcmp.eq.f32.partialorder %v6000_v34, 0.0 }
 0x1cf   : > { %v2837_v59 = vsel %vm2772_vm15, %v2834_v42, %v2836_v49  ;;  %v2833_v21 = vrot.slane %v2760_v13, 6  ;;  %v2656_v43 = vsel %vm2654_vm4, %v2655_v36, %v2653_v27  ;;  %v2644_v4 = vmul.f32 %v3594_v35, %v5947_v41  ;;  %v3596_v29 = vpop.eup %3595 }
 0x1d0   : > { %2840 = vrot.lane.b32.xlu1 %v2837_v59, %s3706_s16  ;;  %v2660_v56 = vsel %vm2659_vm6, %v5939_v53, %v2658_v57  ;;  %v2701_v33 = vmul.f32 -4.0, %v2656_v43  ;;  %v3598_v27 = vpop.eup %3597  ;;  %vm1083_vm4 = vcmp.eq.f32.partialorder %v5956_v39, inf  ;;  %vm1085_vm6 = vcmp.eq.f32.partialorder %v5956_v39, 0.0 }
 0x1d1   : > { %v2835_v49 = vsel %vm2772_vm15, %v2833_v21, %v2834_v42  ;;  %v2663_v36 = vsel %vm2661_vm7, %v2662_v2, %v2660_v56  ;;  %v2646_v59 = vsel %vm2645_vm11, %v5947_v41, %v2644_v4  ;;  %v3600_v35 = vpop.eup %3599  ;;  %v2676_v2 = vand.u32 2147483648, %v5968_v18  ;;  %v6028_v21 = vpop.permute.xlu0 %1405 }
 0x1d2   : > { %2838 = vrot.lane.b32.xlu0 %v2835_v49, %s3706_s16  ;;  %v2702_v16 = vmul.f32 -4.0, %v2663_v36  ;;  %v2738_v13 = vmul.f32 1.442695, %v2701_v33  ;;  %v2649_v57 = vsel %vm2647_vm12, %v2648_v52, %v2646_v59  ;;  %v3602_v43 = vpop.eup %3601  ;;  %v2672_v56 = vmul.f32 %v3600_v35, %v5968_v18  ;;  %v6036_v4 = vpop.permute.xlu1 %1691 }
 0x1d3   : > { %v2700_v53 = vmul.f32 -4.0, %v2649_v57  ;;  %v2683_v41 = vand.u32 2147483648, %v5975_v12  ;;  %v2679_v33 = vmul.f32 %v3602_v43, %v5975_v12  ;;  %6397 = vst [vmem:[#allocation6_spill] sm:$0xff] %v6036_v4  ;;  %v2669_v35 = vand.u32 2147483648, %v6000_v34 }
 0x1d4   : > { %3607 = vpow2.f32 %v2738_v13  ;;  %v2740_v42 = vmul.f32 1.442695, %v2702_v16  ;;  %v2674_v49 = vsel %vm2673_vm13, %v5968_v18, %v2672_v56  ;;  %v3604_v13 = vpop.eup %3603  ;;  %v1082_v18 = vmul.f32 %v3596_v29, %v5956_v39 }
 0x1d5   : > { %v2736_v52 = vmul.f32 1.442695, %v2700_v53  ;;  %v2677_v36 = vsel %vm2675_vm14, %v2676_v2, %v2674_v49  ;;  %v2681_v16 = vsel %vm2680_vm1, %v5975_v12, %v2679_v33  ;;  %v2665_v53 = vmul.f32 %v3604_v13, %v6000_v34  ;;  %v6046_v43 = vpop.permute.xlu0 %1689 }
 0x1d6   : > { %3609 = vpow2.f32 %v2740_v42  ;;  %v2684_v59 = vsel %vm2682_vm8, %v2683_v41, %v2681_v16  ;;  %v2704_v57 = vmul.f32 -4.0, %v2677_v36  ;;  %v6051_v56 = vpop.permute.xlu1 %1707  ;;  %v3606_v41 = vpop.eup %3605  ;;  %v1086_v36 = vand.u32 2147483648, %v5956_v39 }
 0x1d7   : > { %3611 = vpow2.f32 %v2736_v52  ;;  %v2705_v42 = vmul.f32 -4.0, %v2684_v59  ;;  %v2667_v2 = vsel %vm2666_vm2, %v6000_v34, %v2665_v53  ;;  %v1089_v52 = vmul.f32 %v3598_v27, %v5963_v51 }
 0x1d8   : > { %v2744_v4 = vmul.f32 1.442695, %v2704_v57  ;;  %v2670_v33 = vsel %vm2668_vm3, %v2669_v35, %v2667_v2  ;;  %vm1090_vm7 = vcmp.eq.f32.partialorder %v5963_v51, inf  ;;  %vm1092_vm11 = vcmp.eq.f32.partialorder %v5963_v51, 0.0 }
 0x1d9   : > { %v2746_v12 = vmul.f32 1.442695, %v2705_v42  ;;  %v2703_v29 = vmul.f32 -4.0, %v2670_v33  ;;  %v1093_v34 = vand.u32 2147483648, %v5963_v51  ;;  %vm1076_vm12 = vcmp.eq.f32.partialorder %v5987_v11, inf  ;;  %v6069_v35 = vpop.permute.xlu0 %1705 }
 0x1da   : > { %3613 = vpow2.f32 %v2744_v4  ;;  %v1084_v27 = vsel %vm1083_vm4, %v5956_v39, %v1082_v18  ;;  %v1075_v4 = vmul.f32 %v3606_v41, %v5987_v11  ;;  %v6067_v57 = vadd.f32 %v4373_v63, %v5249_v5  ;;  %v6077_v18 = vpop.permute.xlu1 %1723 }
 0x1db   : > { %3615 = vpow2.f32 %v2746_v12  ;;  %v2742_v59 = vmul.f32 1.442695, %v2703_v29  ;;  %v1091_v42 = vsel %vm1090_vm7, %v5963_v51, %v1089_v52  ;;  %v6075_v2 = vadd.f32 %v4377_v24, %v5521_v47 }
 0x1dc   : > { %v1087_v41 = vsel %vm1085_vm6, %v1086_v36, %v1084_v27  ;;  %v1079_v63 = vand.u32 2147483648, %v5987_v11  ;;  %v1094_v52 = vsel %vm1092_vm11, %v1093_v34, %v1091_v42  ;;  %v1077_v24 = vsel %vm1076_vm12, %v5987_v11, %v1075_v4  ;;  %v6398_v36 = vld [vmem:[#allocation2_spill] sm:$0xff] }
 0x1dd   : > { %3617 = vpow2.f32 %v2742_v59  ;;  %vm1078_vm13 = vcmp.eq.f32.partialorder %v5987_v11, 0.0  ;;  %v1222_v27 = vmul.f32 -4.0, %v1087_v41  ;;  %v6097_v51 = vpop.permute.xlu0 %1721  ;;  %v1223_v4 = vmul.f32 -4.0, %v1094_v52 }
 0x1de   : > { %v3608_v49 = vpop.eup %3607  ;;  %3619 = vrsqrt.f32 %v6067_v57  ;;  %6399 = vst [vmem:[#allocation2_spill] sm:$0xff] %v6097_v51  ;;  %v1080_v59 = vsel %vm1078_vm13, %v1079_v63, %v1077_v24  ;;  %vm1446_vm14 = vcmp.eq.f32.partialorder %v6067_v57, inf  ;;  %vm1453_vm1 = vcmp.eq.f32.partialorder %v6075_v2, inf }
 0x1df   : > { %v2764_v16 = vmul.f32 %v5663_v50, %v3608_v49  ;;  %3621 = vrsqrt.f32 %v6075_v2  ;;  %v1244_v41 = vmul.f32 1.442695, %v1222_v27  ;;  %vm1448_vm8 = vcmp.eq.f32.partialorder %v6067_v57, 0.0 }
 0x1e0   : > { %v3610_v13 = vpop.eup %3609  ;;  %vm1455_vm2 = vcmp.eq.f32.partialorder %v6075_v2, 0.0 }
 0x1e1   : > { %v2765_v53 = vmul.f32 %v5861_v61, %v3610_v13  ;;  %v2850_v12 = vrot.slane %v2764_v16, 6  ;;  %v3612_v33 = vpop.eup %3611  ;;  %v6094_v13 = vadd.f32 %v6398_v36, %v5207_v7  ;;  %v1246_v36 = vmul.f32 1.442695, %v1223_v4  ;;  %v6106_v63 = vpop.permute.xlu0 %1737 }
 0x1e2   : > { %v2763_v29 = vmul.f32 %v5650_v20, %v3612_v33  ;;  %v6102_v33 = vpop.permute.xlu1 %1739  ;;  %6400 = vst [vmem:[#allocation7_spill] sm:$0xff] %v6106_v63 }
 0x1e3   : > { %v2852_v49 = vrot.slane %v2765_v53, 6  ;;  %3623 = vrsqrt.f32 %v6094_v13  ;;  %vm1439_vm3 = vcmp.eq.f32.partialorder %v6094_v13, inf  ;;  %vm1441_vm4 = vcmp.eq.f32.partialorder %v6094_v13, 0.0 }
 0x1e4   : > { %v2849_v39 = vrot.slane %v2763_v29, 6  ;;  %v3614_v34 = vpop.eup %3613  ;;  %v1221_v29 = vmul.f32 -4.0, %v1080_v59  ;;  %3625 = vpow2.f32 %v1244_v41  ;;  %v6402_v41 = vld [vmem:[#allocation3_spill] sm:$0xff] }
 0x1e5   : > { %v2853_v16 = vsel %vm2772_vm15, %v2850_v12, %v2852_v49  ;;  %v3616_v42 = vpop.eup %3615  ;;  %v2767_v53 = vmul.f32 %v5663_v50, %v3614_v34  ;;  %3627 = vpow2.f32 %v1246_v36 }
 0x1e6   : > { %2856 = vrot.lane.b32.xlu1 %v2853_v16, %s3707_s17  ;;  %v2851_v11 = vsel %vm2772_vm15, %v2849_v39, %v2850_v12  ;;  %v2768_v49 = vmul.f32 %v5861_v61, %v3616_v42  ;;  %v1242_v34 = vmul.f32 1.442695, %v1221_v29  ;;  %v6123_v29 = vadd.f32 %v6402_v41, %v5249_v5 }
 0x1e7   : > { %2854 = vrot.lane.b32.xlu0 %v2851_v11, %s3707_s17  ;;  %v2866_v16 = vrot.slane %v2767_v53, 6  ;;  %v3618_v52 = vpop.eup %3617  ;;  %v6111_v11 = vpop.permute.xlu1 %1755 }
 0x1e8   : > { %v2868_v51 = vrot.slane %v2768_v49, 6  ;;  %v2766_v24 = vmul.f32 %v5650_v20, %v3618_v52  ;;  %v3620_v39 = vpop.eup %3619  ;;  %3629 = vpow2.f32 %v1242_v34  ;;  %v6118_v53 = vpop.permute.xlu0 %1753  ;;  %v6404_v52 = vld [vmem:[#allocation4_spill] sm:$0xff]  ;;  %vm1813_vm6 = vcmp.eq.f32.partialorder %v6123_v29, inf }
 0x1e9   : > { %v3622_v42 = vpop.eup %3621  ;;  %v1445_v59 = vmul.f32 %v3620_v39, %v6067_v57  ;;  %6401 = vst [vmem:[#allocation8_spill] sm:$0xff] %v6118_v53  ;;  %v1456_v39 = vand.u32 2147483648, %v6075_v2  ;;  %3631 = vrsqrt.f32 %v6123_v29  ;;  %vm1815_vm11 = vcmp.eq.f32.partialorder %v6123_v29, 0.0 }
 0x1ea   : > { %v2869_v12 = vsel %vm2772_vm15, %v2866_v16, %v2868_v51  ;;  %v2865_v27 = vrot.slane %v2766_v24, 6  ;;  %v1452_v51 = vmul.f32 %v3622_v42, %v6075_v2 }
 0x1eb   : > { %2872 = vrot.lane.b32.xlu1 %v2869_v12, %s3708_s18  ;;  %v6126_v36 = vpop.permute.xlu1 %1771  ;;  %v6130_v12 = vadd.f32 %v6404_v52, %v5521_v47  ;;  %v1447_v24 = vsel %vm1446_vm14, %v6067_v57, %v1445_v59 }
 0x1ec   : > { %v2867_v4 = vsel %vm2772_vm15, %v2865_v27, %v2866_v16  ;;  %v1449_v16 = vand.u32 2147483648, %v6067_v57  ;;  %6403 = vst [vmem:[#allocation3_spill] sm:$0xff] %v6126_v36  ;;  %v1454_v34 = vsel %vm1453_vm1, %v6075_v2, %v1452_v51  ;;  %v6140_v41 = vpop.permute.xlu0 %1769  ;;  %v6406_v57 = vld [vmem:[#allocation5_spill] sm:$0xff]  ;;  %v966_v2 = vadd.f32 %v5712_v1, %v5716_v31 }
 0x1ed   : > { %2870 = vrot.lane.b32.xlu0 %v2867_v4, %s3708_s18  ;;  %v3624_v49 = vpop.eup %3623  ;;  %6405 = vst [vmem:[#allocation4_spill] sm:$0xff] %v6140_v41  ;;  %3633 = vrsqrt.f32 %v6130_v12  ;;  %v6145_v59 = vadd.f32 %v6406_v57, %v5207_v7  ;;  %v1457_v51 = vsel %vm1455_vm2, %v1456_v39, %v1454_v34  ;;  %vm1820_vm7 = vcmp.eq.f32.partialorder %v6130_v12, inf }
 0x1ee   : > { %v1438_v42 = vmul.f32 %v3624_v49, %v6094_v13  ;;  %v3626_v27 = vpop.eup %3625  ;;  %v1450_v4 = vsel %vm1448_vm8, %v1449_v16, %v1447_v24  ;;  %v1442_v49 = vand.u32 2147483648, %v6094_v13  ;;  %v965_v24 = vadd.f32 %v5728_v22, %v5725_v48 }
 0x1ef   : > { %v3628_v52 = vpop.eup %3627  ;;  %v6152_v16 = vpop.permute.xlu1 %2058  ;;  %v982_v57 = vadd.f32 %v5739_v45, %v966_v2  ;;  %v1585_v41 = vmul.f32 -4.0, %v1450_v4  ;;  %v1285_v63 = vmul.f32 %v5663_v50, %v3626_v27  ;;  %v1586_v31 = vmul.f32 -4.0, %v1457_v51 }
 0x1f0   : > { %v1440_v53 = vsel %vm1439_vm3, %v6094_v13, %v1438_v42  ;;  %v1286_v1 = vmul.f32 %v5861_v61, %v3628_v52  ;;  %3635 = vrsqrt.f32 %v6145_v59  ;;  %v981_v39 = vadd.f32 %v5755_v40, %v965_v24  ;;  %v6162_v42 = vpop.permute.xlu0 %2056 }
 0x1f1   : > { %v998_v13 = vadd.f32 %v5762_v60, %v982_v57  ;;  %v1443_v34 = vsel %vm1441_vm4, %v1442_v49, %v1440_v53  ;;  %v1607_v4 = vmul.f32 1.442695, %v1585_v41  ;;  %v1309_v50 = vrot.slane %v1285_v63, 2 }
 0x1f2   : > { %v3630_v36 = vpop.eup %3629  ;;  %v997_v48 = vadd.f32 %v5781_v10, %v981_v39  ;;  %v1311_v27 = vrot.slane %v1286_v1, 2  ;;  %v1609_v52 = vmul.f32 1.442695, %v1586_v31  ;;  %v1584_v2 = vmul.f32 -4.0, %v1443_v34 }
 0x1f3   : > { %v1014_v22 = vadd.f32 %v5795_v38, %v998_v13  ;;  %v1284_v45 = vmul.f32 %v5650_v20, %v3630_v36  ;;  %v6168_v51 = vpop.permute.xlu1 %2074  ;;  %v3632_v40 = vpop.eup %3631  ;;  %3637 = vpow2.f32 %v1607_v4  ;;  %v6188_v24 = vadd.f32 %v5290_v37, %v5249_v5 }
 0x1f4   : > { %v1013_v60 = vadd.f32 %v5815_v32, %v997_v48  ;;  %v1312_v63 = vsel %vm382_vm0, %v1309_v50, %v1311_v27  ;;  %3639 = vpow2.f32 %v1609_v52  ;;  %v1605_v32 = vmul.f32 1.442695, %v1584_v2  ;;  %v6182_v36 = vpop.permute.xlu0 %2072 }
 0x1f5   : > { %v1030_v53 = vadd.f32 %v5829_v17, %v1014_v22  ;;  %v1308_v38 = vrot.slane %v1284_v45, 2  ;;  %v1812_v17 = vmul.f32 %v3632_v40, %v6123_v29  ;;  %v6196_v39 = vadd.f32 %v5295_v54, %v5521_v47 }
 0x1f6   : > { %v1029_v20 = vadd.f32 %v5849_v26, %v1013_v60  ;;  %v378_v26 = vld [vmem:[%s347_s22] sm:$0x3f]  ;;  %v1816_v37 = vand.u32 2147483648, %v6123_v29  ;;  %3641 = vpow2.f32 %v1605_v32  ;;  %vm1822_vm12 = vcmp.eq.f32.partialorder %v6130_v12, 0.0 }
 0x1f7   : > { %v3634_v49 = vpop.eup %3633  ;;  %v1046_v10 = vadd.f32 %v5870_v15, %v1030_v53  ;;  %v379_v15 = vld [vmem:[%s351_s27] sm:$0x3f]  ;;  %v6192_v31 = vpop.permute.xlu1 %2090  ;;  %v1310_v34 = vsel %vm382_vm0, %v1308_v38, %v1309_v50  ;;  %v1814_v48 = vsel %vm1813_vm6, %v6123_v29, %v1812_v17  ;;  %3643 = vrsqrt.f32 %v6188_v24 }
 0x1f8   : > { %v1819_v41 = vmul.f32 %v3634_v49, %v6130_v12  ;;  %v1045_v1 = vadd.f32 %v5883_v23, %v1029_v20  ;;  %v1823_v23 = vand.u32 2147483648, %v6130_v12  ;;  %v380_v22 = vsub.f32 %v378_v26, %v379_v15  ;;  %v6208_v4 = vpop.permute.xlu0 %2088  ;;  %v6232_v15 = vld [vmem:[%s3950_s12 + $0x8] sm:$0xff] }
 0x1f9   : > { %v1316_v13 = vadd.f32 %v1312_v63, %v1046_v10  ;;  %vm1806_vm13 = vcmp.eq.f32.partialorder %v6145_v59, inf  ;;  %3645 = vrsqrt.f32 %v6196_v39  ;;  %v6213_v50 = vadd.f32 %v5322_v62, %v5207_v7 }
 0x1fa   : > { %v3636_v57 = vpop.eup %3635  ;;  %v1821_v45 = vsel %vm1820_vm7, %v6130_v12, %v1819_v41  ;;  %v381_v27 = vmul.f32 %v380_v22, %v380_v22  ;;  %v1315_v52 = vadd.f32 %v1310_v34, %v1045_v1  ;;  %v1817_v2 = vsel %vm1815_vm11, %v1816_v37, %v1814_v48 }
 0x1fb   : > { %v1805_v54 = vmul.f32 %v3636_v57, %v6145_v59  ;;  %v1824_v12 = vsel %vm1822_vm12, %v1823_v23, %v1821_v45  ;;  %v1809_v40 = vand.u32 2147483648, %v6145_v59  ;;  %v6218_v60 = vpop.permute.xlu1 %2106  ;;  %v1332_v49 = vadd.f32 %v5889_v14, %v1316_v13 }
 0x1fc   : > { %vm1808_vm14 = vcmp.eq.f32.partialorder %v6145_v59, 0.0  ;;  %v1952_v10 = vmul.f32 -4.0, %v1817_v2  ;;  %3647 = vrsqrt.f32 %v6213_v50  ;;  %v383_v29 = vsel %vm382_vm0, %v381_v27, 0.0  ;;  %v6227_v41 = vpop.permute.xlu0 %2104  ;;  %v6243_v27 = vld [vmem:[%s3950_s12] sm:$0xff] }
 0x1fd   : > { %v3638_v53 = vpop.eup %3637  ;;  %v1807_v20 = vsel %vm1806_vm13, %v6145_v59, %v1805_v54  ;;  %v1331_v38 = vadd.f32 %v5903_v8, %v1315_v52  ;;  %v1348_v63 = vadd.f32 %v5914_v3, %v1332_v49  ;;  %v1953_v32 = vmul.f32 -4.0, %v1824_v12 }
 0x1fe   : > { %v3640_v62 = vpop.eup %3639  ;;  %v1810_v17 = vsel %vm1808_vm14, %v1809_v40, %v1807_v20  ;;  %v1648_v59 = vmul.f32 %v6232_v15, %v3638_v53  ;;  %v1974_v8 = vmul.f32 1.442695, %v1952_v10  ;;  %vm2180_vm0 = vcmp.eq.f32.partialorder %v6188_v24, inf }
 0x1ff   : > { %v1347_v14 = vadd.f32 %v5928_v58, %v1331_v38  ;;  %v1364_v26 = vadd.f32 %v5935_v44, %v1348_v63  ;;  %v1649_v57 = vmul.f32 %v5861_v61, %v3640_v62  ;;  %v6236_v13 = vpop.permute.xlu1 %2122  ;;  %v1976_v58 = vmul.f32 1.442695, %v1953_v32 }
 0x200   : > { %v3642_v1 = vpop.eup %3641  ;;  %v1951_v48 = vmul.f32 -4.0, %v1810_v17  ;;  %v1673_v45 = vrot.slane %v1648_v59, 3  ;;  %3649 = vpow2.f32 %v1974_v8  ;;  %v6246_v2 = vpop.permute.xlu0 %2120  ;;  %vm2187_vm1 = vcmp.eq.f32.partialorder %v6196_v39, inf }
 0x201   : > { %v3644_v3 = vpop.eup %3643  ;;  %v1363_v34 = vadd.f32 %v5949_v25, %v1347_v14  ;;  %v1380_v37 = vadd.f32 %v5958_v55, %v1364_v26  ;;  %v1675_v54 = vrot.slane %v1649_v57, 3  ;;  %v1647_v52 = vmul.f32 %v6243_v27, %v3642_v1  ;;  %v6407_v1 = vld [vmem:[#allocation6_spill] sm:$0xff] }
 0x202   : > { %v2179_v25 = vmul.f32 %v3644_v3, %v6188_v24  ;;  %v6251_v55 = vadd.f32 %v5671_v6, %v5249_v5  ;;  %3651 = vpow2.f32 %v1976_v58  ;;  %v1972_v12 = vmul.f32 1.442695, %v1951_v48 }
 0x203   : > { %v3646_v44 = vpop.eup %3645  ;;  %v1379_v23 = vadd.f32 %v5977_v19, %v1363_v34  ;;  %v1396_v22 = vadd.f32 %v5983_v46, %v1380_v37  ;;  %v6256_v53 = vpop.permute.xlu1 %2138  ;;  %v6261_v49 = vadd.f32 %v5678_v9, %v5521_v47  ;;  %v1676_v6 = vsel %vm1671_vm5, %v1673_v45, %v1675_v54 }
 0x204   : > { %v2186_v19 = vmul.f32 %v3646_v44, %v6196_v39  ;;  %vm2182_vm8 = vcmp.eq.f32.partialorder %v6188_v24, 0.0  ;;  %v2183_v20 = vand.u32 2147483648, %v6188_v24  ;;  %v1672_v62 = vrot.slane %v1647_v52, 3 }
 0x205   : > { %v1412_v40 = vadd.f32 %v6016_v28, %v1396_v22  ;;  %v1395_v5 = vadd.f32 %v6006_v0, %v1379_v23  ;;  %v2181_v10 = vsel %vm2180_vm0, %v6188_v24, %v2179_v25  ;;  %v2190_v28 = vand.u32 2147483648, %v6196_v39  ;;  %v6273_v0 = vpop.permute.xlu0 %2136 }
 0x206   : > { %v3648_v46 = vpop.eup %3647  ;;  %3653 = vrsqrt.f32 %v6251_v55  ;;  %vm2189_vm2 = vcmp.eq.f32.partialorder %v6196_v39, 0.0  ;;  %vm2173_vm3 = vcmp.eq.f32.partialorder %v6213_v50, inf  ;;  %v6279_v38 = vadd.f32 %v5707_v30, %v5207_v7 }
 0x207   : > { %3655 = vpow2.f32 %v1972_v12  ;;  %v2172_v47 = vmul.f32 %v3648_v46, %v6213_v50  ;;  %v1680_v9 = vadd.f32 %v1676_v6, %v1412_v40  ;;  %v1411_v63 = vadd.f32 %v6028_v21, %v1395_v5  ;;  %v6285_v14 = vpop.permute.xlu1 %2425 }
 0x208   : > { %3657 = vrsqrt.f32 %v6261_v49  ;;  %v2184_v32 = vsel %vm2182_vm8, %v2183_v20, %v2181_v10  ;;  %v2176_v26 = vand.u32 2147483648, %v6213_v50  ;;  %vm2175_vm4 = vcmp.eq.f32.partialorder %v6213_v50, 0.0 }
 0x209   : > { %v2174_v59 = vsel %vm2173_vm3, %v6213_v50, %v2172_v47  ;;  %v1696_v7 = vadd.f32 %v6407_v1, %v1680_v9  ;;  %v2319_v30 = vmul.f32 -4.0, %v2184_v32  ;;  %3659 = vrsqrt.f32 %v6279_v38  ;;  %v6293_v37 = vpop.permute.xlu0 %2423 }
 0x20a   : > { %v3650_v57 = vpop.eup %3649  ;;  %v2177_v34 = vsel %vm2175_vm4, %v2176_v26, %v2174_v59  ;;  %vm2549_vm6 = vcmp.eq.f32.partialorder %v6251_v55, 0.0  ;;  %vm2554_vm7 = vcmp.eq.f32.partialorder %v6261_v49, inf  ;;  %v2550_v9 = vand.u32 2147483648, %v6251_v55  ;;  %v6411_v26 = vld [vmem:[#allocation8_spill] sm:$0xff] }
 0x20b   : > { %v1712_v3 = vadd.f32 %v6051_v56, %v1696_v7  ;;  %v2015_v58 = vmul.f32 %v6232_v15, %v3650_v57  ;;  %v2341_v23 = vmul.f32 1.442695, %v2319_v30  ;;  %v6298_v22 = vpop.permute.xlu1 %2441  ;;  %v2318_v25 = vmul.f32 -4.0, %v2177_v34  ;;  %v6412_v30 = vld [vmem:[#allocation4_spill] sm:$0xff] }
 0x20c   : > { %384 = vadd.xlane.f32.xlu0 %v383_v29  ;;  %v2188_v29 = vsel %vm2187_vm1, %v6196_v39, %v2186_v19  ;;  %v1674_v39 = vsel %vm1671_vm5, %v1672_v62, %v1673_v45  ;;  %v3652_v21 = vpop.eup %3651  ;;  %vm2547_vm5 = vcmp.eq.f32.partialorder %v6251_v55, inf  ;;  %vm2556_vm11 = vcmp.eq.f32.partialorder %v6261_v49, 0.0 }
 0x20d   : > { %v2191_v17 = vsel %vm2189_vm2, %v2190_v28, %v2188_v29  ;;  %v1679_v24 = vadd.f32 %v1674_v39, %v1411_v63  ;;  %v1728_v44 = vadd.f32 %v6077_v18, %v1712_v3  ;;  %v2016_v50 = vmul.f32 %v5861_v61, %v3652_v21  ;;  %v6307_v6 = vpop.permute.xlu0 %2439  ;;  %v6410_v29 = vld [vmem:[#allocation3_spill] sm:$0xff] }
 0x20e   : > { %v2320_v8 = vmul.f32 -4.0, %v2191_v17  ;;  %v2040_v46 = vrot.slane %v2015_v58, 4  ;;  %3661 = vpow2.f32 %v2341_v23  ;;  %v2339_v62 = vmul.f32 1.442695, %v2318_v25 }
 0x20f   : > { %v1695_v54 = vadd.f32 %v6046_v43, %v1679_v24  ;;  %v1744_v56 = vadd.f32 %v6102_v33, %v1728_v44  ;;  %v2042_v18 = vrot.slane %v2016_v50, 4  ;;  %v6408_v43 = vld [vmem:[#allocation2_spill] sm:$0xff]  ;;  %v6311_v10 = vpop.permute.xlu1 %2457  ;;  %v2557_v17 = vand.u32 2147483648, %v6261_v49 }
 0x210   : > { %v3654_v48 = vpop.eup %3653  ;;  %v2343_v52 = vmul.f32 1.442695, %v2320_v8  ;;  %vm2540_vm12 = vcmp.eq.f32.partialorder %v6279_v38, inf  ;;  %vm2542_vm13 = vcmp.eq.f32.partialorder %v6279_v38, 0.0  ;;  %vm394_vm14 = vcmask 0  }
 0x211   : > { %v3656_v45 = vpop.eup %3655  ;;  %v1711_v19 = vadd.f32 %v6069_v35, %v1695_v54  ;;  %v2546_v40 = vmul.f32 %v3654_v48, %v6251_v55  ;;  %v1760_v61 = vadd.f32 %v6111_v11, %v1744_v56  ;;  %v6409_v11 = vld [vmem:[#allocation7_spill] sm:$0xff]  ;;  %v2043_v63 = vsel %vm2038_vm9, %v2040_v46, %v2042_v18  ;;  %v6327_v7 = vpop.permute.xlu0 %2455 }
 0x212   : > { %v3658_v12 = vpop.eup %3657  ;;  %v2014_v5 = vmul.f32 %v6243_v27, %v3656_v45  ;;  %3663 = vpow2.f32 %v2343_v52  ;;  %v2543_v48 = vand.u32 2147483648, %v6279_v38 }
 0x213   : > { %v1727_v20 = vadd.f32 %v6408_v43, %v1711_v19  ;;  %v2553_v33 = vmul.f32 %v3658_v12, %v6261_v49  ;;  %v3660_v35 = vpop.eup %3659  ;;  %v1776_v47 = vadd.f32 %v6410_v29, %v1760_v61  ;;  %v2548_v39 = vsel %vm2547_vm5, %v6251_v55, %v2546_v40  ;;  %v2474_v34 = vpop.permute.xlu1 %2473  ;;  %v3694_v19 = vld [vmem:[%s3950_s12 + $0x10] sm:$0x3f] }
 0x214   : > { %v2039_v32 = vrot.slane %v2014_v5, 4  ;;  %3665 = vpow2.f32 %v2339_v62  ;;  %v2539_v1 = vmul.f32 %v3660_v35, %v6279_v38  ;;  %v2551_v8 = vsel %vm2549_vm6, %v2550_v9, %v2548_v39 }
 0x215   : > { %v1743_v28 = vadd.f32 %v6409_v11, %v1727_v20  ;;  %v2555_v57 = vsel %vm2554_vm7, %v6261_v49, %v2553_v33  ;;  %v2047_v24 = vadd.f32 %v2043_v63, %v1776_v47  ;;  %v2686_v23 = vmul.f32 -4.0, %v2551_v8  ;;  %v2472_v25 = vpop.permute.xlu0 %2471 }
 0x216   : > { %v2041_v3 = vsel %vm2038_vm9, %v2039_v32, %v2040_v46  ;;  %v2558_v58 = vsel %vm2556_vm11, %v2557_v17, %v2555_v57  ;;  %v2541_v44 = vsel %vm2540_vm12, %v6279_v38, %v2539_v1 }
 0x217   : > { %v1759_v59 = vadd.f32 %v6411_v26, %v1743_v28  ;;  %v2063_v54 = vadd.f32 %v6152_v16, %v2047_v24  ;;  %v2687_v52 = vmul.f32 -4.0, %v2558_v58  ;;  %v2544_v12 = vsel %vm2542_vm13, %v2543_v48, %v2541_v44  ;;  %v2490_v40 = vpop.permute.xlu1 %2489 }
 0x218   : > { %v3662_v50 = vpop.eup %3661  ;;  %v2708_v61 = vmul.f32 1.442695, %v2686_v23  ;;  %v2685_v20 = vmul.f32 -4.0, %v2544_v12 }
 0x219   : > { %v1775_v21 = vadd.f32 %v6412_v30, %v1759_v59  ;;  %v2079_v56 = vadd.f32 %v6168_v51, %v2063_v54  ;;  %v2382_v49 = vmul.f32 %v6232_v15, %v3662_v50  ;;  %v2710_v43 = vmul.f32 1.442695, %v2687_v52  ;;  %v2488_v11 = vpop.permute.xlu0 %2487 }
 0x21a   : > { %3667 = vpow2.f32 %v2708_v61 }
 0x21b   : > { %v2046_v55 = vadd.f32 %v2041_v3, %v1775_v21  ;;  %v2095_v5 = vadd.f32 %v6192_v31, %v2079_v56  ;;  %v2407_v33 = vrot.slane %v2382_v49, 5  ;;  %3669 = vpow2.f32 %v2710_v43  ;;  %v2506_v47 = vpop.permute.xlu1 %2505 }
 0x21c   : > { %v3664_v45 = vpop.eup %3663 }
 0x21d   : > { %v2383_v46 = vmul.f32 %v3694_v19, %v3664_v45  ;;  %v2062_v38 = vadd.f32 %v6162_v42, %v2046_v55  ;;  %v2111_v62 = vadd.f32 %v6218_v60, %v2095_v5  ;;  %v2706_v42 = vmul.f32 1.442695, %v2685_v20  ;;  %v2504_v32 = vpop.permute.xlu0 %2503  ;;  %v406_v20 = vld [vmem:[%s371_s8 + $0x8] sm:$0xff] }
 0x21e   : > { %v3666_v18 = vpop.eup %3665  ;;  %vm2883_vm9 = vcmp.gt.f32.partialorder %v406_v20, 0.5 }
 0x21f   : > { %v2078_v16 = vadd.f32 %v6182_v36, %v2062_v38  ;;  %v2409_v35 = vrot.slane %v2383_v46, 5  ;;  %v2381_v51 = vmul.f32 %v6243_v27, %v3666_v18  ;;  %v2127_v29 = vadd.f32 %v6236_v13, %v2111_v62 }
 0x220   : > { %3671 = vpow2.f32 %v2706_v42 }
 0x221   : > { %v2094_v28 = vadd.f32 %v6208_v4, %v2078_v16  ;;  %v2143_v9 = vadd.f32 %v6256_v53, %v2127_v29  ;;  %v2410_v36 = vsel %vm2405_vm10, %v2407_v33, %v2409_v35  ;;  %v2406_v60 = vrot.slane %v2381_v51, 5 }
 0x223   : > { %v2110_v31 = vadd.f32 %v6227_v41, %v2094_v28  ;;  %v2414_v17 = vadd.f32 %v2410_v36, %v2143_v9  ;;  %v2408_v4 = vsel %vm2405_vm10, %v2406_v60, %v2407_v33 }
 0x224   : > { %v2793_v13 = vpop.permute.xlu1 %2792  ;;  %v3668_v26 = vpop.eup %3667 }
 0x225   : > { %v2126_v63 = vadd.f32 %v6246_v2, %v2110_v31  ;;  %v3670_v59 = vpop.eup %3669  ;;  %v2430_v57 = vadd.f32 %v6285_v14, %v2414_v17  ;;  %v2749_v30 = vmul.f32 %v6232_v15, %v3668_v26 }
 0x226   : > { %v2750_v21 = vmul.f32 %v3694_v19, %v3670_v59 }
 0x227   : > { %v2142_v39 = vadd.f32 %v6273_v0, %v2126_v63  ;;  %v2446_v53 = vadd.f32 %v6298_v22, %v2430_v57  ;;  %v2774_v48 = vrot.slane %v2749_v30, 6 }
 0x228   : > { %v2791_v1 = vpop.permute.xlu0 %2790  ;;  %v2776_v44 = vrot.slane %v2750_v21, 6 }
 0x229   : > { %v2413_v41 = vadd.f32 %v2408_v4, %v2142_v39  ;;  %v2462_v0 = vadd.f32 %v6311_v10, %v2446_v53 }
 0x22a   : > { %v3672_v24 = vpop.eup %3671  ;;  %v2777_v55 = vsel %vm2772_vm15, %v2774_v48, %v2776_v44 }
 0x22b   : > { %v2429_v8 = vadd.f32 %v6293_v37, %v2413_v41  ;;  %v2478_v58 = vadd.f32 %v2474_v34, %v2462_v0  ;;  %v2748_v14 = vmul.f32 %v6243_v27, %v3672_v24 }
 0x22d   : > { %v2445_v3 = vadd.f32 %v6307_v6, %v2429_v8  ;;  %v2494_v22 = vadd.f32 %v2490_v40, %v2478_v58  ;;  %v2773_v37 = vrot.slane %v2748_v14, 6 }
 0x22e   : > { %v2809_v2 = vpop.permute.xlu1 %2808 }
 0x22f   : > { %v2461_v23 = vadd.f32 %v6327_v7, %v2445_v3  ;;  %v2510_v54 = vadd.f32 %v2506_v47, %v2494_v22  ;;  %v2775_v34 = vsel %vm2772_vm15, %v2773_v37, %v2774_v48  ;;  %v3709_v47 = vmov 0.0  }
 0x230   : > { %v3089_v31 = vsel %vm2883_vm9, 1.0, %v3709_v47  ;;  %vm2894_vm15 = vcmask 130048  }
 0x231   : > { %v2477_v15 = vadd.f32 %v2472_v25, %v2461_v23  ;;  %v2781_v6 = vadd.f32 %v2777_v55, %v2510_v54 }
 0x233   : > { %v2493_v52 = vadd.f32 %v2488_v11, %v2477_v15  ;;  %v2797_v49 = vadd.f32 %v2793_v13, %v2781_v6  ;;  %v405_v11 = vld [vmem:[%s371_s8] sm:$0xff] }
 0x234   : > { %v2807_v50 = vpop.permute.xlu0 %2806  ;;  %vm2882_vm10 = vcmp.gt.f32.partialorder %v405_v11, 0.5 }
 0x235   : > { %v2509_v12 = vadd.f32 %v2504_v32, %v2493_v52  ;;  %v2813_v46 = vadd.f32 %v2809_v2, %v2797_v49  ;;  %v3088_v32 = vsel %vm2882_vm10, 1.0, %v3709_v47 }
 0x237   : > { %v2780_v27 = vadd.f32 %v2775_v34, %v2509_v12 }
 0x238   : > { %v2825_v45 = vpop.permute.xlu1 %2824 }
 0x239   : > { %v2796_v40 = vadd.f32 %v2791_v1, %v2780_v27  ;;  %v2829_v61 = vadd.f32 %v2825_v45, %v2813_v46 }
 0x23a   : > { %v2823_v10 = vpop.permute.xlu0 %2822 }
 0x23b   : > { %v2812_v25 = vadd.f32 %v2807_v50, %v2796_v40 }
 0x23d   : > { %v2828_v5 = vadd.f32 %v2823_v10, %v2812_v25 }
 0x242   : > { %v2841_v56 = vpop.permute.xlu1 %2840 }
 0x243   : > { %v2845_v18 = vadd.f32 %v2841_v56, %v2829_v61 }
 0x244   : > { %v2839_v19 = vpop.permute.xlu0 %2838 }
 0x245   : > { %v2844_v62 = vadd.f32 %v2839_v19, %v2828_v5 }
 0x258   : > { %v2857_v7 = vpop.permute.xlu1 %2856 }
 0x259   : > { %v2855_v38 = vpop.permute.xlu0 %2854  ;;  %v2861_v43 = vadd.f32 %v2857_v7, %v2845_v18 }
 0x25a   : > { %v2860_v35 = vadd.f32 %v2855_v38, %v2844_v62 }
 0x25d   : > { %v2873_v16 = vpop.permute.xlu1 %2872 }
 0x25e   : > { %v2877_v33 = vadd.f32 %v2873_v16, %v2861_v43 }
 0x25f   : > { %v2871_v28 = vpop.permute.xlu0 %2870 }
 0x260   : > { %v2879_v51 = vmax.f32 %v2877_v33, 0.0001  ;;  %v2876_v42 = vadd.f32 %v2871_v28, %v2860_v35 }
 0x262   : > { %v2881_v29 = vmin.f32 %v2879_v51, 0.9999  ;;  %v2878_v36 = vmax.f32 %v2876_v42, 0.0001 }
 0x264   : > { %v2889_v9 = vsub.f32 %v2881_v29, %v406_v20  ;;  %v2880_v63 = vmin.f32 %v2878_v36, 0.9999 }
 0x266   : > { %v2891_v60 = vmul.f32 %v3089_v31, %v2889_v9  ;;  %v2888_v39 = vsub.f32 %v2880_v63, %v405_v11 }
 0x268   : > { %v2893_v17 = vmul.f32 %v2891_v60, %v2889_v9  ;;  %v2890_v4 = vmul.f32 %v3088_v32, %v2888_v39 }
 0x26a   : > { %v2892_v13 = vmul.f32 %v2890_v4, %v2888_v39  ;;  %v2896_v26 = vsel %vm2894_vm15, %v2893_v17, 0.0 }
 0x26c   : > { %v2895_v59 = vsel %vm2894_vm15, %v2892_v13, 0.0 }
 0x26d   : > { %v2897_v57 = vadd.f32 %v2896_v26, %v2895_v59 }
 0x26f   : > { %2898 = vadd.xlane.f32.xlu1 %v2897_v57 }
 0x299   : > { %v385_v41 = vpop.xlane.xlu0 %384 }
 0x29a   : > { %v386_v1 = vrot.slane %v385_v41, 4 }
 0x29c   : > { %v387_v53 = vadd.f32 %v386_v1, %v385_v41 }
 0x29e   : > { %v388_v30 = vrot.slane %v387_v53, 2 }
 0x2a0   : > { %v389_v21 = vadd.f32 %v388_v30, %v387_v53 }
 0x2a2   : > { %v390_v2 = vrot.slane %v389_v21, 1 }
 0x2a4   : > { %v391_v24 = vadd.f32 %v390_v2, %v389_v21 }
 0x2a6   : > { %3094 = vpush %v391_v24 }
 0x2d7   : > { %s3095_s12 = spop %3094 }
 0x2d8   : > { %v393_v8 = vstv %s3095_s12 }
 0x2d9   : > { %395 = vst.msk [vmem:[%s377_s11] sm:$0x1] %vm394_vm14, %v393_v8 }
 0x2fc   : > { %v2899_v0 = vpop.xlane.xlu1 %2898 }
 0x2fd   : > { %v2900_v3 = vrot.slane %v2899_v0, 4 }
 0x2ff   : > { %v2901_v58 = vadd.f32 %v2900_v3, %v2899_v0 }
 0x301   : > { %v2902_v48 = vrot.slane %v2901_v58, 2 }
 0x303   : > { %v2903_v44 = vadd.f32 %v2902_v48, %v2901_v58 }
 0x305   : > { %v2904_v14 = vrot.slane %v2903_v44, 1 }
 0x307   : > { %v2905_v50 = vadd.f32 %v2904_v14, %v2903_v44 }
 0x309   : > { %3096 = vpush %v2905_v50 }
 0x33a   : > { %s3097_s16 = spop %3096 }
 0x33b   : > { %v2907_v23 = vstv %s3097_s16 }
 0x33c   : > { %2908 = vst.msk [vmem:[%s374_s15] sm:$0x1] %vm394_vm14, %v2907_v23 }
 0x33d PF: > { %s18_s24 = sadd.s32 1, %s3701_s24  }
 0x33e   : > { %p15_p4 = scmp.ge.s32.totalorder %s18_s24, 4  }
 0x340   :  { %17 = sbr.rel (!%p15_p4) target bundleno = 1 (0x1), region = 101 }

</bundles_post_ra>
